<compile_context>
chip_gen: v7x
topology: tpu7x:2x2x1
jax: 0.10.0
libtpu: 0.0.40
codegen_flags: <defaults>
</compile_context>

<pallas_src>
import jax
import jax.numpy as jnp
from jax.experimental import pallas as pl
from jax.experimental.pallas import tpu as pltpu


def _round_up(x, m):
    return (x + m - 1) // m * m


def _single_tensorcore_chip():
    """True for chips with one TensorCore per JAX device (v5e, v6e)."""
    try:
        kind = jax.devices()[0].device_kind.lower()
    except Exception:
        return True
    return any(t in kind for t in ("v5e", "v5 lite", "v5litepod", "v6e", "v6 lite"))


def _pick_bm(batch):
    """Batch tile: one tile per TensorCore at small batch, up to 512 rows at large batch."""
    n_tc = 1 if _single_tensorcore_chip() else 2
    per_core = -(-batch // n_tc)                       # ceil-div
    return min(512, max(128, _round_up(per_core, 128)))


def pack_params(params, skip_relu=(3, 7)):
    """One-time layout plumbing (call once, reuse for every forward).

    params: list of (W, b) with W shape (in, out) == PyTorch weight transposed.
    Layer i weight is zero-padded to (K_i, round_up(out_i, 128)) and cast to bf16,
    where K_0 = input_dim (x is NOT feature-padded) and K_i = padded width of h_{i-1}.
    Biases are zero-padded and lane-concatenated into one f32 (1, sum(padded_out)) row.
    Zero padding + ReLU(0)=0 keeps padded lanes exactly zero through every layer.
    """
    dims = [int(params[0][0].shape[0])] + [int(w.shape[1]) for (w, _) in params]
    pdims = [dims[0]] + [_round_up(d, 128) for d in dims[1:]]
    k_dims = [dims[0]] + list(pdims[1:-1])             # padded row count (K) per layer

    ws, b_blocks, b_col_off = [], [], [0]
    for i, (w, b) in enumerate(params):
        d_in, d_out = dims[i], dims[i + 1]
        k, p_out = k_dims[i], pdims[i + 1]
        wp = (jnp.zeros((k, p_out), jnp.float32)
              .at[:d_in, :d_out].set(w)
              .astype(jnp.bfloat16))
        ws.append(wp)
        b_blocks.append(jnp.zeros((p_out,), jnp.float32).at[:d_out].set(b))
        b_col_off.append(b_col_off[-1] + p_out)
    b_all = jnp.concatenate(b_blocks).reshape(1, -1)   # (1, sum(pdims[1:])) f32

    return dict(weights=tuple(ws), biases=b_all,
                dims=tuple(dims), pdims=tuple(pdims), k_dims=tuple(k_dims),
                b_col_off=tuple(b_col_off[:-1]), skip_relu=tuple(skip_relu))


def _make_kernel(n_layers, pdims, b_col_off, skip_relu):
    """Kernel refs: (x_ref, w0..w{n-1}, b_ref, out_ref).

      x_ref  : (bm, D_in)            bf16
      w_i    : (K_i, pdims[i+1])     bf16   grid-invariant, VMEM-resident
      b_ref  : (1, sum(pdims[1:]))   f32    grid-invariant
      out_ref: (bm, pdims[-1])       f32    lane-dense (128-multiple) store
    """
    def kernel(*refs):
        x_ref = refs[0]
        w_refs = refs[1:1 + n_layers]
        b_ref = refs[1 + n_layers]
        out_ref = refs[2 + n_layers]

        h = x_ref[...]                                          # bf16 (bm, D_in)
        for i in range(n_layers):
            d_out = pdims[i + 1]
            w = w_refs[i][...]                                  # bf16 (K_i, d_out)
            b = b_ref[:, pl.ds(b_col_off[i], d_out)]            # f32  (1, d_out)
            h = jnp.dot(h, w, preferred_element_type=jnp.float32) + b   # f32 acc
            if i not in skip_relu:
                h = jnp.maximum(h, 0.0)
            if i < n_layers - 1:
                h = h.astype(jnp.bfloat16)                      # MXU operand for next dot
        out_ref[...] = h.astype(out_ref.dtype)

    return kernel


def autoencoder_forward(x, packed, *, bm=None):
    """x: (B, input_dim) f32/bf16.  packed: result of pack_params()."""
    B, D_in = x.shape
    dims, pdims, k_dims = packed["dims"], packed["pdims"], packed["k_dims"]
    b_col_off, skip_relu = packed["b_col_off"], packed["skip_relu"]
    ws, b_all = packed["weights"], packed["biases"]
    n_layers = len(ws)
    assert D_in == dims[0]

    if bm is None:
        bm = _pick_bm(B)
    assert bm % 8 == 0
    Bp = _round_up(B, bm)

    # Only per-call wrapper work: bf16 cast (+ batch pad if needed), no feature padding.
    x_bf16 = x.astype(jnp.bfloat16)
    x_pad = x_bf16 if Bp == B else jnp.zeros((Bp, D_in), jnp.bfloat16).at[:B].set(x_bf16)

    kernel = _make_kernel(n_layers, pdims, b_col_off, skip_relu)

    flops = 2 * Bp * sum(k * po for k, po in zip(k_dims, pdims[1:]))
    bytes_accessed = (x_pad.size * 2                        # bf16 activations in
                      + sum(int(w.size) for w in ws) * 2    # bf16 weights, fetched once
                      + int(b_all.size) * 4                 # f32 biases, fetched once
                      + Bp * pdims[-1] * 4)                 # f32 padded output

    def _run(single_buffer_consts):
        def const_spec(shape):
            if single_buffer_consts:
                return pl.BlockSpec(shape, lambda i: (0, 0),
                                    pipeline_mode=pl.Buffered(1))
            return pl.BlockSpec(shape, lambda i: (0, 0))

        in_specs = [pl.BlockSpec((bm, D_in), lambda i: (i, 0))]    # batch-tiled bf16 x
        in_specs += [const_spec(w.shape) for w in ws]              # grid-invariant weights
        in_specs += [const_spec(b_all.shape)]                      # grid-invariant biases

        return pl.pallas_call(
            kernel,
            out_shape=jax.ShapeDtypeStruct((Bp, pdims[-1]), jnp.float32),
            grid_spec=pltpu.PrefetchScalarGridSpec(
                num_scalar_prefetch=0,
                grid=(Bp // bm,),
                in_specs=in_specs,
                out_specs=pl.BlockSpec((bm, pdims[-1]), lambda i: (i, 0)),
            ),
            compiler_params=pltpu.CompilerParams(
                dimension_semantics=("parallel",)),
            cost_estimate=pl.CostEstimate(
                flops=flops, transcendentals=0, bytes_accessed=bytes_accessed),
        )(x_pad, *ws, b_all)

    try:
        out_pad = _run(True)
    except Exception:
        out_pad = _run(False)   # Pallas without BlockSpec pipeline_mode: default buffering

    return out_pad[:B, :dims[-1]]


# ----------------------------- init & references ---------------------------------

def init_params(key, input_dim, n_featuremap=64):
    """Deterministic synthetic init (uniform fan-in scaling, like torch default)."""
    dims = [input_dim,
            n_featuremap, n_featuremap * 2, n_featuremap * 4, n_featuremap * 8,  # encoder
            n_featuremap * 4, n_featuremap * 2, n_featuremap, input_dim]         # decoder
    params = []
    for i in range(len(dims) - 1):
        fan_in, fan_out = dims[i], dims[i + 1]
        key, kw, kb = jax.random.split(key, 3)
        bound = 1.0 / jnp.sqrt(fan_in)
        w = jax.random.uniform(kw, (fan_in, fan_out), jnp.float32, -bound, bound)
        b = jax.random.uniform(kb, (fan_out,), jnp.float32, -bound, bound)
        params.append((w, b))
    return params


def reference_forward_f32(x, params):
    h = x
    for i, (w, b) in enumerate(params):
        h = h @ w + b
        if i not in (3, 7):          # no ReLU after encoder[-1] / decoder[-1]
            h = jnp.maximum(h, 0.0)
    return h


def reference_forward_bf16(x, params):
    """Exact mirror of the kernel numerics: bf16 matmul operands, f32 accumulation."""
    h = x.astype(jnp.bfloat16)
    n = len(params)
    for i, (w, b) in enumerate(params):
        h = jnp.dot(h, w.astype(jnp.bfloat16), preferred_element_type=jnp.float32) + b
        if i not in (3, 7):
            h = jnp.maximum(h, 0.0)
        if i < n - 1:
            h = h.astype(jnp.bfloat16)
    return h


if __name__ == "__main__":
    key = jax.random.PRNGKey(0)
    kx, kp = jax.random.split(key)

    B, input_dim, n_featuremap = 256, 32, 64
    x = jax.random.normal(kx, (B, input_dim), jnp.float32)
    params = init_params(kp, input_dim, n_featuremap)

    packed = pack_params(params)                 # one-time packing (hoisted out of forward)
    out = autoencoder_forward(x, packed)         # bm auto: 256/grid=1 (v5e/v6e), 128/grid=2 (v7x)
    out = jax.block_until_ready(out)
    assert out.shape == (B, input_dim)

    # Exact-math mirror of the kernel (bf16 operands, f32 accumulate).
    ref_bf16 = reference_forward_bf16(x, params)
    assert jnp.allclose(out, ref_bf16, atol=2e-3, rtol=1e-2)
    # Coarse sanity check against the full-f32 reference (bf16 rounding only).
    ref_f32 = reference_forward_f32(x, params)
    assert jnp.allclose(out, ref_f32, atol=5e-2, rtol=5e-2)

    print("KERNEL_OK")
</pallas_src>

<mosaic_0001>
module attributes {stable_mosaic.version = 11 : i64} {
  func.func @kernel(%arg0: i32, %arg1: memref<128x32xbf16, #tpu.memory_space<vmem>>, %arg2: memref<32x128xbf16, #tpu.memory_space<vmem>>, %arg3: memref<128x128xbf16, #tpu.memory_space<vmem>>, %arg4: memref<128x256xbf16, #tpu.memory_space<vmem>>, %arg5: memref<256x512xbf16, #tpu.memory_space<vmem>>, %arg6: memref<512x256xbf16, #tpu.memory_space<vmem>>, %arg7: memref<256x128xbf16, #tpu.memory_space<vmem>>, %arg8: memref<128x128xbf16, #tpu.memory_space<vmem>>, %arg9: memref<128x128xbf16, #tpu.memory_space<vmem>>, %arg10: memref<1x1664xf32, #tpu.memory_space<vmem>>, %arg11: memref<128x128xf32, #tpu.memory_space<vmem>>) attributes {dimension_semantics = [#tpu.dimension_semantics<parallel>], iteration_bounds = array<i64: 2>, scalar_prefetch = 0 : i64, scratch_operands = 0 : i64, tpu.core_type = #tpu.core_type<tc>, window_params = [{transform_indices = @transform_0, window_bounds = array<i64: 128, 32>}, {pipeline_mode = #tpu.pipeline_mode<synchronous>, transform_indices = @transform_1, window_bounds = array<i64: 32, 128>}, {pipeline_mode = #tpu.pipeline_mode<synchronous>, transform_indices = @transform_2, window_bounds = array<i64: 128, 128>}, {pipeline_mode = #tpu.pipeline_mode<synchronous>, transform_indices = @transform_3, window_bounds = array<i64: 128, 256>}, {pipeline_mode = #tpu.pipeline_mode<synchronous>, transform_indices = @transform_4, window_bounds = array<i64: 256, 512>}, {pipeline_mode = #tpu.pipeline_mode<synchronous>, transform_indices = @transform_5, window_bounds = array<i64: 512, 256>}, {pipeline_mode = #tpu.pipeline_mode<synchronous>, transform_indices = @transform_6, window_bounds = array<i64: 256, 128>}, {pipeline_mode = #tpu.pipeline_mode<synchronous>, transform_indices = @transform_7, window_bounds = array<i64: 128, 128>}, {pipeline_mode = #tpu.pipeline_mode<synchronous>, transform_indices = @transform_8, window_bounds = array<i64: 128, 128>}, {pipeline_mode = #tpu.pipeline_mode<synchronous>, transform_indices = @transform_9, window_bounds = array<i64: 1, 1664>}, {transform_indices = @transform_10, window_bounds = array<i64: 128, 128>}]} {
    %c0 = arith.constant 0 : index
    %c0_0 = arith.constant 0 : index
    %0 = vector.load %arg1[%c0, %c0_0] : memref<128x32xbf16, #tpu.memory_space<vmem>>, vector<128x32xbf16>
    %c0_1 = arith.constant 0 : index
    %c0_2 = arith.constant 0 : index
    %1 = vector.load %arg2[%c0_1, %c0_2] : memref<32x128xbf16, #tpu.memory_space<vmem>>, vector<32x128xbf16>
    %c0_3 = arith.constant 0 : index
    %c0_4 = arith.constant 0 : index
    %2 = vector.load %arg10[%c0_3, %c0_4] : memref<1x1664xf32, #tpu.memory_space<vmem>>, vector<1x128xf32>
    %cst = arith.constant dense<0.000000e+00> : vector<128x128xf32>
    %3 = tpu.matmul %0, %1, %cst {dimension_numbers = #tpu.dot_dimension_numbers<[1], [0], [0], [1], [0, 0, 1, 1], [], []>} : vector<128x32xbf16>, vector<32x128xbf16>, vector<128x128xf32> -> vector<128x128xf32>
    %4 = vector.broadcast %2 : vector<1x128xf32> to vector<128x128xf32>
    %5 = arith.addf %3, %4 : vector<128x128xf32>
    %cst_5 = arith.constant 0.000000e+00 : f32
    %6 = vector.broadcast %cst_5 : f32 to vector<128x128xf32>
    %7 = arith.maximumf %5, %6 : vector<128x128xf32>
    %8 = arith.truncf %7 : vector<128x128xf32> to vector<128x128xbf16>
    %c0_6 = arith.constant 0 : index
    %c0_7 = arith.constant 0 : index
    %9 = vector.load %arg3[%c0_6, %c0_7] : memref<128x128xbf16, #tpu.memory_space<vmem>>, vector<128x128xbf16>
    %c0_8 = arith.constant 0 : index
    %c128 = arith.constant 128 : index
    %10 = vector.load %arg10[%c0_8, %c128] : memref<1x1664xf32, #tpu.memory_space<vmem>>, vector<1x128xf32>
    %cst_9 = arith.constant dense<0.000000e+00> : vector<128x128xf32>
    %11 = tpu.matmul %8, %9, %cst_9 {dimension_numbers = #tpu.dot_dimension_numbers<[1], [0], [0], [1], [0, 0, 1, 1], [], []>} : vector<128x128xbf16>, vector<128x128xbf16>, vector<128x128xf32> -> vector<128x128xf32>
    %12 = vector.broadcast %10 : vector<1x128xf32> to vector<128x128xf32>
    %13 = arith.addf %11, %12 : vector<128x128xf32>
    %cst_10 = arith.constant 0.000000e+00 : f32
    %14 = vector.broadcast %cst_10 : f32 to vector<128x128xf32>
    %15 = arith.maximumf %13, %14 : vector<128x128xf32>
    %16 = arith.truncf %15 : vector<128x128xf32> to vector<128x128xbf16>
    %c0_11 = arith.constant 0 : index
    %c0_12 = arith.constant 0 : index
    %17 = vector.load %arg4[%c0_11, %c0_12] : memref<128x256xbf16, #tpu.memory_space<vmem>>, vector<128x256xbf16>
    %c0_13 = arith.constant 0 : index
    %c256 = arith.constant 256 : index
    %18 = vector.load %arg10[%c0_13, %c256] : memref<1x1664xf32, #tpu.memory_space<vmem>>, vector<1x256xf32>
    %cst_14 = arith.constant dense<0.000000e+00> : vector<128x256xf32>
    %19 = tpu.matmul %16, %17, %cst_14 {dimension_numbers = #tpu.dot_dimension_numbers<[1], [0], [0], [1], [0, 0, 1, 1], [], []>} : vector<128x128xbf16>, vector<128x256xbf16>, vector<128x256xf32> -> vector<128x256xf32>
    %20 = vector.broadcast %18 : vector<1x256xf32> to vector<128x256xf32>
    %21 = arith.addf %19, %20 : vector<128x256xf32>
    %cst_15 = arith.constant 0.000000e+00 : f32
    %22 = vector.broadcast %cst_15 : f32 to vector<128x256xf32>
    %23 = arith.maximumf %21, %22 : vector<128x256xf32>
    %24 = arith.truncf %23 : vector<128x256xf32> to vector<128x256xbf16>
    %c0_16 = arith.constant 0 : index
    %c0_17 = arith.constant 0 : index
    %25 = vector.load %arg5[%c0_16, %c0_17] : memref<256x512xbf16, #tpu.memory_space<vmem>>, vector<256x512xbf16>
    %c0_18 = arith.constant 0 : index
    %c512 = arith.constant 512 : index
    %26 = vector.load %arg10[%c0_18, %c512] : memref<1x1664xf32, #tpu.memory_space<vmem>>, vector<1x512xf32>
    %cst_19 = arith.constant dense<0.000000e+00> : vector<128x512xf32>
    %27 = tpu.matmul %24, %25, %cst_19 {dimension_numbers = #tpu.dot_dimension_numbers<[1], [0], [0], [1], [0, 0, 1, 1], [], []>} : vector<128x256xbf16>, vector<256x512xbf16>, vector<128x512xf32> -> vector<128x512xf32>
    %28 = vector.broadcast %26 : vector<1x512xf32> to vector<128x512xf32>
    %29 = arith.addf %27, %28 : vector<128x512xf32>
    %30 = arith.truncf %29 : vector<128x512xf32> to vector<128x512xbf16>
    %c0_20 = arith.constant 0 : index
    %c0_21 = arith.constant 0 : index
    %31 = vector.load %arg6[%c0_20, %c0_21] : memref<512x256xbf16, #tpu.memory_space<vmem>>, vector<512x256xbf16>
    %c0_22 = arith.constant 0 : index
    %c1024 = arith.constant 1024 : index
    %32 = vector.load %arg10[%c0_22, %c1024] : memref<1x1664xf32, #tpu.memory_space<vmem>>, vector<1x256xf32>
    %cst_23 = arith.constant dense<0.000000e+00> : vector<128x256xf32>
    %33 = tpu.matmul %30, %31, %cst_23 {dimension_numbers = #tpu.dot_dimension_numbers<[1], [0], [0], [1], [0, 0, 1, 1], [], []>} : vector<128x512xbf16>, vector<512x256xbf16>, vector<128x256xf32> -> vector<128x256xf32>
    %34 = vector.broadcast %32 : vector<1x256xf32> to vector<128x256xf32>
    %35 = arith.addf %33, %34 : vector<128x256xf32>
    %cst_24 = arith.constant 0.000000e+00 : f32
    %36 = vector.broadcast %cst_24 : f32 to vector<128x256xf32>
    %37 = arith.maximumf %35, %36 : vector<128x256xf32>
    %38 = arith.truncf %37 : vector<128x256xf32> to vector<128x256xbf16>
    %c0_25 = arith.constant 0 : index
    %c0_26 = arith.constant 0 : index
    %39 = vector.load %arg7[%c0_25, %c0_26] : memref<256x128xbf16, #tpu.memory_space<vmem>>, vector<256x128xbf16>
    %c0_27 = arith.constant 0 : index
    %c1280 = arith.constant 1280 : index
    %40 = vector.load %arg10[%c0_27, %c1280] : memref<1x1664xf32, #tpu.memory_space<vmem>>, vector<1x128xf32>
    %cst_28 = arith.constant dense<0.000000e+00> : vector<128x128xf32>
    %41 = tpu.matmul %38, %39, %cst_28 {dimension_numbers = #tpu.dot_dimension_numbers<[1], [0], [0], [1], [0, 0, 1, 1], [], []>} : vector<128x256xbf16>, vector<256x128xbf16>, vector<128x128xf32> -> vector<128x128xf32>
    %42 = vector.broadcast %40 : vector<1x128xf32> to vector<128x128xf32>
    %43 = arith.addf %41, %42 : vector<128x128xf32>
    %cst_29 = arith.constant 0.000000e+00 : f32
    %44 = vector.broadcast %cst_29 : f32 to vector<128x128xf32>
    %45 = arith.maximumf %43, %44 : vector<128x128xf32>
    %46 = arith.truncf %45 : vector<128x128xf32> to vector<128x128xbf16>
    %c0_30 = arith.constant 0 : index
    %c0_31 = arith.constant 0 : index
    %47 = vector.load %arg8[%c0_30, %c0_31] : memref<128x128xbf16, #tpu.memory_space<vmem>>, vector<128x128xbf16>
    %c0_32 = arith.constant 0 : index
    %c1408 = arith.constant 1408 : index
    %48 = vector.load %arg10[%c0_32, %c1408] : memref<1x1664xf32, #tpu.memory_space<vmem>>, vector<1x128xf32>
    %cst_33 = arith.constant dense<0.000000e+00> : vector<128x128xf32>
    %49 = tpu.matmul %46, %47, %cst_33 {dimension_numbers = #tpu.dot_dimension_numbers<[1], [0], [0], [1], [0, 0, 1, 1], [], []>} : vector<128x128xbf16>, vector<128x128xbf16>, vector<128x128xf32> -> vector<128x128xf32>
    %50 = vector.broadcast %48 : vector<1x128xf32> to vector<128x128xf32>
    %51 = arith.addf %49, %50 : vector<128x128xf32>
    %cst_34 = arith.constant 0.000000e+00 : f32
    %52 = vector.broadcast %cst_34 : f32 to vector<128x128xf32>
    %53 = arith.maximumf %51, %52 : vector<128x128xf32>
    %54 = arith.truncf %53 : vector<128x128xf32> to vector<128x128xbf16>
    %c0_35 = arith.constant 0 : index
    %c0_36 = arith.constant 0 : index
    %55 = vector.load %arg9[%c0_35, %c0_36] : memref<128x128xbf16, #tpu.memory_space<vmem>>, vector<128x128xbf16>
    %c0_37 = arith.constant 0 : index
    %c1536 = arith.constant 1536 : index
    %56 = vector.load %arg10[%c0_37, %c1536] : memref<1x1664xf32, #tpu.memory_space<vmem>>, vector<1x128xf32>
    %cst_38 = arith.constant dense<0.000000e+00> : vector<128x128xf32>
    %57 = tpu.matmul %54, %55, %cst_38 {dimension_numbers = #tpu.dot_dimension_numbers<[1], [0], [0], [1], [0, 0, 1, 1], [], []>} : vector<128x128xbf16>, vector<128x128xbf16>, vector<128x128xf32> -> vector<128x128xf32>
    %58 = vector.broadcast %56 : vector<1x128xf32> to vector<128x128xf32>
    %59 = arith.addf %57, %58 : vector<128x128xf32>
    %c0_39 = arith.constant 0 : index
    %c0_40 = arith.constant 0 : index
    %60 = vector.load %arg11[%c0_39, %c0_40] : memref<128x128xf32, #tpu.memory_space<vmem>>, vector<128x128xf32>
    tpu.vector_store %arg11[%c0_39, %c0_40], %59 {strides = array<i32>} : memref<128x128xf32, #tpu.memory_space<vmem>>, vector<128x128xf32>,
    return
  }
  func.func @transform_0(%arg0: i32) -> (i32, i32) {
    %c0_i32 = arith.constant 0 : i32
    %c0_i32_0 = arith.constant 0 : i32
    return %arg0, %c0_i32 : i32, i32
  }
  func.func @transform_1(%arg0: i32) -> (i32, i32) {
    %c0_i32 = arith.constant 0 : i32
    %c0_i32_0 = arith.constant 0 : i32
    %c0_i32_1 = arith.constant 0 : i32
    return %c0_i32, %c0_i32_0 : i32, i32
  }
  func.func @transform_2(%arg0: i32) -> (i32, i32) {
    %c0_i32 = arith.constant 0 : i32
    %c0_i32_0 = arith.constant 0 : i32
    %c0_i32_1 = arith.constant 0 : i32
    return %c0_i32, %c0_i32_0 : i32, i32
  }
  func.func @transform_3(%arg0: i32) -> (i32, i32) {
    %c0_i32 = arith.constant 0 : i32
    %c0_i32_0 = arith.constant 0 : i32
    %c0_i32_1 = arith.constant 0 : i32
    return %c0_i32, %c0_i32_0 : i32, i32
  }
  func.func @transform_4(%arg0: i32) -> (i32, i32) {
    %c0_i32 = arith.constant 0 : i32
    %c0_i32_0 = arith.constant 0 : i32
    %c0_i32_1 = arith.constant 0 : i32
    return %c0_i32, %c0_i32_0 : i32, i32
  }
  func.func @transform_5(%arg0: i32) -> (i32, i32) {
    %c0_i32 = arith.constant 0 : i32
    %c0_i32_0 = arith.constant 0 : i32
    %c0_i32_1 = arith.constant 0 : i32
    return %c0_i32, %c0_i32_0 : i32, i32
  }
  func.func @transform_6(%arg0: i32) -> (i32, i32) {
    %c0_i32 = arith.constant 0 : i32
    %c0_i32_0 = arith.constant 0 : i32
    %c0_i32_1 = arith.constant 0 : i32
    return %c0_i32, %c0_i32_0 : i32, i32
  }
  func.func @transform_7(%arg0: i32) -> (i32, i32) {
    %c0_i32 = arith.constant 0 : i32
    %c0_i32_0 = arith.constant 0 : i32
    %c0_i32_1 = arith.constant 0 : i32
    return %c0_i32, %c0_i32_0 : i32, i32
  }
  func.func @transform_8(%arg0: i32) -> (i32, i32) {
    %c0_i32 = arith.constant 0 : i32
    %c0_i32_0 = arith.constant 0 : i32
    %c0_i32_1 = arith.constant 0 : i32
    return %c0_i32, %c0_i32_0 : i32, i32
  }
  func.func @transform_9(%arg0: i32) -> (i32, i32) {
    %c0_i32 = arith.constant 0 : i32
    %c0_i32_0 = arith.constant 0 : i32
    %c0_i32_1 = arith.constant 0 : i32
    return %c0_i32, %c0_i32_0 : i32, i32
  }
  func.func @transform_10(%arg0: i32) -> (i32, i32) {
    %c0_i32 = arith.constant 0 : i32
    %c0_i32_0 = arith.constant 0 : i32
    return %arg0, %c0_i32 : i32, i32
  }
}

module attributes {stable_mosaic.version = 11 : i64} {
  func.func @kernel(%arg0: i32, %arg1: memref<128x32xbf16, #tpu.memory_space<vmem>>, %arg2: memref<32x128xbf16, #tpu.memory_space<vmem>>, %arg3: memref<128x128xbf16, #tpu.memory_space<vmem>>, %arg4: memref<128x256xbf16, #tpu.memory_space<vmem>>, %arg5: memref<256x512xbf16, #tpu.memory_space<vmem>>, %arg6: memref<512x256xbf16, #tpu.memory_space<vmem>>, %arg7: memref<256x128xbf16, #tpu.memory_space<vmem>>, %arg8: memref<128x128xbf16, #tpu.memory_space<vmem>>, %arg9: memref<128x128xbf16, #tpu.memory_space<vmem>>, %arg10: memref<1x1664xf32, #tpu.memory_space<vmem>>, %arg11: memref<128x128xf32, #tpu.memory_space<vmem>>) attributes {dimension_semantics = [#tpu.dimension_semantics<parallel>], iteration_bounds = array<i64: 2>, scalar_prefetch = 0 : i64, scratch_operands = 0 : i64, tpu.core_type = #tpu.core_type<tc>, window_params = [{transform_indices = @transform_0, window_bounds = array<i64: 128, 32>}, {pipeline_mode = #tpu.pipeline_mode<synchronous>, transform_indices = @transform_1, window_bounds = array<i64: 32, 128>}, {pipeline_mode = #tpu.pipeline_mode<synchronous>, transform_indices = @transform_2, window_bounds = array<i64: 128, 128>}, {pipeline_mode = #tpu.pipeline_mode<synchronous>, transform_indices = @transform_3, window_bounds = array<i64: 128, 256>}, {pipeline_mode = #tpu.pipeline_mode<synchronous>, transform_indices = @transform_4, window_bounds = array<i64: 256, 512>}, {pipeline_mode = #tpu.pipeline_mode<synchronous>, transform_indices = @transform_5, window_bounds = array<i64: 512, 256>}, {pipeline_mode = #tpu.pipeline_mode<synchronous>, transform_indices = @transform_6, window_bounds = array<i64: 256, 128>}, {pipeline_mode = #tpu.pipeline_mode<synchronous>, transform_indices = @transform_7, window_bounds = array<i64: 128, 128>}, {pipeline_mode = #tpu.pipeline_mode<synchronous>, transform_indices = @transform_8, window_bounds = array<i64: 128, 128>}, {pipeline_mode = #tpu.pipeline_mode<synchronous>, transform_indices = @transform_9, window_bounds = array<i64: 1, 1664>}, {transform_indices = @transform_10, window_bounds = array<i64: 128, 128>}]} {
    %c0 = arith.constant 0 : index
    %c0_0 = arith.constant 0 : index
    %0 = vector.load %arg1[%c0, %c0_0] : memref<128x32xbf16, #tpu.memory_space<vmem>>, vector<128x32xbf16>
    %c0_1 = arith.constant 0 : index
    %c0_2 = arith.constant 0 : index
    %1 = vector.load %arg2[%c0_1, %c0_2] : memref<32x128xbf16, #tpu.memory_space<vmem>>, vector<32x128xbf16>
    %c0_3 = arith.constant 0 : index
    %c0_4 = arith.constant 0 : index
    %2 = vector.load %arg10[%c0_3, %c0_4] : memref<1x1664xf32, #tpu.memory_space<vmem>>, vector<1x128xf32>
    %cst = arith.constant dense<0.000000e+00> : vector<128x128xf32>
    %3 = tpu.matmul %0, %1, %cst {dimension_numbers = #tpu.dot_dimension_numbers<[1], [0], [0], [1], [0, 0, 1, 1], [], []>} : vector<128x32xbf16>, vector<32x128xbf16>, vector<128x128xf32> -> vector<128x128xf32>
    %4 = vector.broadcast %2 : vector<1x128xf32> to vector<128x128xf32>
    %5 = arith.addf %3, %4 : vector<128x128xf32>
    %cst_5 = arith.constant 0.000000e+00 : f32
    %6 = vector.broadcast %cst_5 : f32 to vector<128x128xf32>
    %7 = arith.maximumf %5, %6 : vector<128x128xf32>
    %8 = arith.truncf %7 : vector<128x128xf32> to vector<128x128xbf16>
    %c0_6 = arith.constant 0 : index
    %c0_7 = arith.constant 0 : index
    %9 = vector.load %arg3[%c0_6, %c0_7] : memref<128x128xbf16, #tpu.memory_space<vmem>>, vector<128x128xbf16>
    %c0_8 = arith.constant 0 : index
    %c128 = arith.constant 128 : index
    %10 = vector.load %arg10[%c0_8, %c128] : memref<1x1664xf32, #tpu.memory_space<vmem>>, vector<1x128xf32>
    %cst_9 = arith.constant dense<0.000000e+00> : vector<128x128xf32>
    %11 = tpu.matmul %8, %9, %cst_9 {dimension_numbers = #tpu.dot_dimension_numbers<[1], [0], [0], [1], [0, 0, 1, 1], [], []>} : vector<128x128xbf16>, vector<128x128xbf16>, vector<128x128xf32> -> vector<128x128xf32>
    %12 = vector.broadcast %10 : vector<1x128xf32> to vector<128x128xf32>
    %13 = arith.addf %11, %12 : vector<128x128xf32>
    %cst_10 = arith.constant 0.000000e+00 : f32
    %14 = vector.broadcast %cst_10 : f32 to vector<128x128xf32>
    %15 = arith.maximumf %13, %14 : vector<128x128xf32>
    %16 = arith.truncf %15 : vector<128x128xf32> to vector<128x128xbf16>
    %c0_11 = arith.constant 0 : index
    %c0_12 = arith.constant 0 : index
    %17 = vector.load %arg4[%c0_11, %c0_12] : memref<128x256xbf16, #tpu.memory_space<vmem>>, vector<128x256xbf16>
    %c0_13 = arith.constant 0 : index
    %c256 = arith.constant 256 : index
    %18 = vector.load %arg10[%c0_13, %c256] : memref<1x1664xf32, #tpu.memory_space<vmem>>, vector<1x256xf32>
    %cst_14 = arith.constant dense<0.000000e+00> : vector<128x256xf32>
    %19 = tpu.matmul %16, %17, %cst_14 {dimension_numbers = #tpu.dot_dimension_numbers<[1], [0], [0], [1], [0, 0, 1, 1], [], []>} : vector<128x128xbf16>, vector<128x256xbf16>, vector<128x256xf32> -> vector<128x256xf32>
    %20 = vector.broadcast %18 : vector<1x256xf32> to vector<128x256xf32>
    %21 = arith.addf %19, %20 : vector<128x256xf32>
    %cst_15 = arith.constant 0.000000e+00 : f32
    %22 = vector.broadcast %cst_15 : f32 to vector<128x256xf32>
    %23 = arith.maximumf %21, %22 : vector<128x256xf32>
    %24 = arith.truncf %23 : vector<128x256xf32> to vector<128x256xbf16>
    %c0_16 = arith.constant 0 : index
    %c0_17 = arith.constant 0 : index
    %25 = vector.load %arg5[%c0_16, %c0_17] : memref<256x512xbf16, #tpu.memory_space<vmem>>, vector<256x512xbf16>
    %c0_18 = arith.constant 0 : index
    %c512 = arith.constant 512 : index
    %26 = vector.load %arg10[%c0_18, %c512] : memref<1x1664xf32, #tpu.memory_space<vmem>>, vector<1x512xf32>
    %cst_19 = arith.constant dense<0.000000e+00> : vector<128x512xf32>
    %27 = tpu.matmul %24, %25, %cst_19 {dimension_numbers = #tpu.dot_dimension_numbers<[1], [0], [0], [1], [0, 0, 1, 1], [], []>} : vector<128x256xbf16>, vector<256x512xbf16>, vector<128x512xf32> -> vector<128x512xf32>
    %28 = vector.broadcast %26 : vector<1x512xf32> to vector<128x512xf32>
    %29 = arith.addf %27, %28 : vector<128x512xf32>
    %30 = arith.truncf %29 : vector<128x512xf32> to vector<128x512xbf16>
    %c0_20 = arith.constant 0 : index
    %c0_21 = arith.constant 0 : index
    %31 = vector.load %arg6[%c0_20, %c0_21] : memref<512x256xbf16, #tpu.memory_space<vmem>>, vector<512x256xbf16>
    %c0_22 = arith.constant 0 : index
    %c1024 = arith.constant 1024 : index
    %32 = vector.load %arg10[%c0_22, %c1024] : memref<1x1664xf32, #tpu.memory_space<vmem>>, vector<1x256xf32>
    %cst_23 = arith.constant dense<0.000000e+00> : vector<128x256xf32>
    %33 = tpu.matmul %30, %31, %cst_23 {dimension_numbers = #tpu.dot_dimension_numbers<[1], [0], [0], [1], [0, 0, 1, 1], [], []>} : vector<128x512xbf16>, vector<512x256xbf16>, vector<128x256xf32> -> vector<128x256xf32>
    %34 = vector.broadcast %32 : vector<1x256xf32> to vector<128x256xf32>
    %35 = arith.addf %33, %34 : vector<128x256xf32>
    %cst_24 = arith.constant 0.000000e+00 : f32
    %36 = vector.broadcast %cst_24 : f32 to vector<128x256xf32>
    %37 = arith.maximumf %35, %36 : vector<128x256xf32>
    %38 = arith.truncf %37 : vector<128x256xf32> to vector<128x256xbf16>
    %c0_25 = arith.constant 0 : index
    %c0_26 = arith.constant 0 : index
    %39 = vector.load %arg7[%c0_25, %c0_26] : memref<256x128xbf16, #tpu.memory_space<vmem>>, vector<256x128xbf16>
    %c0_27 = arith.constant 0 : index
    %c1280 = arith.constant 1280 : index
    %40 = vector.load %arg10[%c0_27, %c1280] : memref<1x1664xf32, #tpu.memory_space<vmem>>, vector<1x128xf32>
    %cst_28 = arith.constant dense<0.000000e+00> : vector<128x128xf32>
    %41 = tpu.matmul %38, %39, %cst_28 {dimension_numbers = #tpu.dot_dimension_numbers<[1], [0], [0], [1], [0, 0, 1, 1], [], []>} : vector<128x256xbf16>, vector<256x128xbf16>, vector<128x128xf32> -> vector<128x128xf32>
    %42 = vector.broadcast %40 : vector<1x128xf32> to vector<128x128xf32>
    %43 = arith.addf %41, %42 : vector<128x128xf32>
    %cst_29 = arith.constant 0.000000e+00 : f32
    %44 = vector.broadcast %cst_29 : f32 to vector<128x128xf32>
    %45 = arith.maximumf %43, %44 : vector<128x128xf32>
    %46 = arith.truncf %45 : vector<128x128xf32> to vector<128x128xbf16>
    %c0_30 = arith.constant 0 : index
    %c0_31 = arith.constant 0 : index
    %47 = vector.load %arg8[%c0_30, %c0_31] : memref<128x128xbf16, #tpu.memory_space<vmem>>, vector<128x128xbf16>
    %c0_32 = arith.constant 0 : index
    %c1408 = arith.constant 1408 : index
    %48 = vector.load %arg10[%c0_32, %c1408] : memref<1x1664xf32, #tpu.memory_space<vmem>>, vector<1x128xf32>
    %cst_33 = arith.constant dense<0.000000e+00> : vector<128x128xf32>
    %49 = tpu.matmul %46, %47, %cst_33 {dimension_numbers = #tpu.dot_dimension_numbers<[1], [0], [0], [1], [0, 0, 1, 1], [], []>} : vector<128x128xbf16>, vector<128x128xbf16>, vector<128x128xf32> -> vector<128x128xf32>
    %50 = vector.broadcast %48 : vector<1x128xf32> to vector<128x128xf32>
    %51 = arith.addf %49, %50 : vector<128x128xf32>
    %cst_34 = arith.constant 0.000000e+00 : f32
    %52 = vector.broadcast %cst_34 : f32 to vector<128x128xf32>
    %53 = arith.maximumf %51, %52 : vector<128x128xf32>
    %54 = arith.truncf %53 : vector<128x128xf32> to vector<128x128xbf16>
    %c0_35 = arith.constant 0 : index
    %c0_36 = arith.constant 0 : index
    %55 = vector.load %arg9[%c0_35, %c0_36] : memref<128x128xbf16, #tpu.memory_space<vmem>>, vector<128x128xbf16>
    %c0_37 = arith.constant 0 : index
    %c1536 = arith.constant 1536 : index
    %56 = vector.load %arg10[%c0_37, %c1536] : memref<1x1664xf32, #tpu.memory_space<vmem>>, vector<1x128xf32>
    %cst_38 = arith.constant dense<0.000000e+00> : vector<128x128xf32>
    %57 = tpu.matmul %54, %55, %cst_38 {dimension_numbers = #tpu.dot_dimension_numbers<[1], [0], [0], [1], [0, 0, 1, 1], [], []>} : vector<128x128xbf16>, vector<128x128xbf16>, vector<128x128xf32> -> vector<128x128xf32>
    %58 = vector.broadcast %56 : vector<1x128xf32> to vector<128x128xf32>
    %59 = arith.addf %57, %58 : vector<128x128xf32>
    %c0_39 = arith.constant 0 : index
    %c0_40 = arith.constant 0 : index
    %60 = vector.load %arg11[%c0_39, %c0_40] : memref<128x128xf32, #tpu.memory_space<vmem>>, vector<128x128xf32>
    tpu.vector_store %arg11[%c0_39, %c0_40], %59 {strides = array<i32>} : memref<128x128xf32, #tpu.memory_space<vmem>>, vector<128x128xf32>,
    return
  }
  func.func @transform_0(%arg0: i32) -> (i32, i32) {
    %c0_i32 = arith.constant 0 : i32
    %c0_i32_0 = arith.constant 0 : i32
    return %arg0, %c0_i32 : i32, i32
  }
  func.func @transform_1(%arg0: i32) -> (i32, i32) {
    %c0_i32 = arith.constant 0 : i32
    %c0_i32_0 = arith.constant 0 : i32
    %c0_i32_1 = arith.constant 0 : i32
    return %c0_i32, %c0_i32_0 : i32, i32
  }
  func.func @transform_2(%arg0: i32) -> (i32, i32) {
    %c0_i32 = arith.constant 0 : i32
    %c0_i32_0 = arith.constant 0 : i32
    %c0_i32_1 = arith.constant 0 : i32
    return %c0_i32, %c0_i32_0 : i32, i32
  }
  func.func @transform_3(%arg0: i32) -> (i32, i32) {
    %c0_i32 = arith.constant 0 : i32
    %c0_i32_0 = arith.constant 0 : i32
    %c0_i32_1 = arith.constant 0 : i32
    return %c0_i32, %c0_i32_0 : i32, i32
  }
  func.func @transform_4(%arg0: i32) -> (i32, i32) {
    %c0_i32 = arith.constant 0 : i32
    %c0_i32_0 = arith.constant 0 : i32
    %c0_i32_1 = arith.constant 0 : i32
    return %c0_i32, %c0_i32_0 : i32, i32
  }
  func.func @transform_5(%arg0: i32) -> (i32, i32) {
    %c0_i32 = arith.constant 0 : i32
    %c0_i32_0 = arith.constant 0 : i32
    %c0_i32_1 = arith.constant 0 : i32
    return %c0_i32, %c0_i32_0 : i32, i32
  }
  func.func @transform_6(%arg0: i32) -> (i32, i32) {
    %c0_i32 = arith.constant 0 : i32
    %c0_i32_0 = arith.constant 0 : i32
    %c0_i32_1 = arith.constant 0 : i32
    return %c0_i32, %c0_i32_0 : i32, i32
  }
  func.func @transform_7(%arg0: i32) -> (i32, i32) {
    %c0_i32 = arith.constant 0 : i32
    %c0_i32_0 = arith.constant 0 : i32
    %c0_i32_1 = arith.constant 0 : i32
    return %c0_i32, %c0_i32_0 : i32, i32
  }
  func.func @transform_8(%arg0: i32) -> (i32, i32) {
    %c0_i32 = arith.constant 0 : i32
    %c0_i32_0 = arith.constant 0 : i32
    %c0_i32_1 = arith.constant 0 : i32
    return %c0_i32, %c0_i32_0 : i32, i32
  }
  func.func @transform_9(%arg0: i32) -> (i32, i32) {
    %c0_i32 = arith.constant 0 : i32
    %c0_i32_0 = arith.constant 0 : i32
    %c0_i32_1 = arith.constant 0 : i32
    return %c0_i32, %c0_i32_0 : i32, i32
  }
  func.func @transform_10(%arg0: i32) -> (i32, i32) {
    %c0_i32 = arith.constant 0 : i32
    %c0_i32_0 = arith.constant 0 : i32
    return %arg0, %c0_i32 : i32, i32
  }
}

</mosaic_0001>

<bundles_post_ra>
// kernel: tpu_custom_call.1
= control target key start
LH: loop header
LB: loop body
LE: loop exit
PB: predicated region body
PF: predicated region fallthrough
CT: control target
= control target key end

     0   :  { %s5169_s0 = inlined_call_operand.vmem [shape: bf16[256,32], index: 0, kind: input, shape index: {}]   ;;  %s5170_s1 = inlined_call_operand.vmem [shape: bf16[32,128], index: 1, kind: input, shape index: {}]   ;;  %s5171_s2 = inlined_call_operand.hbm [shape: bf16[128,128], index: 2, kind: input, shape index: {}]   ;;  %s5172_s3 = inlined_call_operand.vmem [shape: bf16[128,256], index: 3, kind: input, shape index: {}]   ;;  %s5173_s4 = inlined_call_operand.hbm [shape: bf16[256,512], index: 4, kind: input, shape index: {}]   ;;  %s5174_s5 = inlined_call_operand.hbm [shape: bf16[512,256], index: 5, kind: input, shape index: {}]   ;;  %s5175_s6 = inlined_call_operand.hbm [shape: bf16[256,128], index: 6, kind: input, shape index: {}]   ;;  %s5176_s7 = inlined_call_operand.hbm [shape: bf16[128,128], index: 7, kind: input, shape index: {}]   ;;  %s5177_s8 = inlined_call_operand.hbm [shape: bf16[128,128], index: 8, kind: input, shape index: {}]   ;;  %s5178_s9 = inlined_call_operand.vmem [shape: f32[1,1664], index: 9, kind: input, shape index: {}]   ;;  %s5179_s10 = inlined_call_operand.hbm [shape: f32[256,128], index: 10, kind: output, shape index: {}]  }
   0x1   :  { %5192 = sst [smem:[#allocation25_spill]] %s5179_s10 }
   0x2   :  { %15 = vsyncpa [#allocation3], 0 }
   0x3   :  { %16 = vsyncpa [#allocation6], 0 }
   0x4   :  { %17 = vsyncpa [#allocation9], 0 }
   0x5   :  { %18 = vsyncpa [#allocation12], 0 }
   0x6   :  { %19 = vsyncpa [#allocation4], 0 }
   0x7   :  { %21 = vsyncpa [#allocation4 + $0x1], 0  ;;  %s4466_s13 = smov 0   ;;  %s4468_s14 = smov 0  }
   0x8   :  { %s4470_s15 = smov 0   ;;  %s4472_s16 = smov 0  }
   0x9 LB: > { %5193 = sst [smem:[#allocation19_spill]] %s4381_s13  ;;  %s4487_s17 = sadd.s32 4294967295, %s4393_s16   ;;  %s4393_s16 = sphi %s4472_s16, %s5221_s16   ;;  %s4389_s15 = sphi %s4470_s15, %s5223_s15   ;;  %s4385_s14 = sphi %s4468_s14, %s5225_s14   ;;  %s4381_s13 = sphi %s4466_s13, %s5224_s13  }
   0xa   : > { %5194 = sst [smem:[#allocation20_spill]] %s4389_s15  ;;  %s3238_s18 = sadd.s32 4294967294, %s4393_s16  }
   0xb   : > { %5195 = sst [smem:[#allocation21_spill]] %s4393_s16  ;;  %s4491_s19 = sadd.s32 1, %s4393_s16  }
   0xc   : > { %5196 = sst [smem:[#allocation22_spill]] %s4491_s19  ;;  %s249_s20 = sadd.s32 1, %s4389_s15 }
   0xd   : > { %s246_s21 = ssub.s32 %s4393_s16, %s4491_s19  ;;  %p259_p0 = scmp.ne.s32.totalorder %s4389_s15, %s4385_s14 }
   0xe   : > { %p247_p1 = scmp.eq.s32.totalorder %s246_s21, 0  ;;  %p260_p2 = scmp.eq.s32.totalorder %s4487_s17, 1 }
   0xf   : > { %p265_p3 = scmp.ne.s32.totalorder %s4385_s14, %s4381_s13  ;;  %p266_p4 = scmp.eq.s32.totalorder %s3238_s18, 1 }
  0x10   : > { %s4502_s22 = scalar_select %p247_p1, %s4389_s15, %s249_s20  }
  0x11   : > { %p4504_p5 = por %p260_p2, %p259_p0  ;;  %p4508_p6 = por %p266_p4, %p265_p3 }
  0x12   : > { %5197 = sst [smem:[#allocation23_spill]] %s4502_s22  ;;  %p3239_p7 = scmp.ge.s32.totalorder %s4393_s16, 1 }
  0x13   : > { %s5198_s23 = scalar_select %p4504_p5, 1, 0 }
  0x14   : > { %s5199_s24 = scalar_select %p4508_p6, 1, 0 }
  0x15   : > { %p273_p8 = scmp.lt.s32.totalorder %s4393_s16, 3  ;;  %p5181_p9 = scmp.eq.s32.totalorder %s4487_s17, 0 }
  0x16   : > { %5200 = sst [smem:[#allocation24_spill]] %s5199_s24  ;;  %s4395_s26 = smov [#allocation5]  }
  0x17   : > { %p4515_p10 = pnand %p3239_p7, %p273_p8  ;;  %s304_s27 = sshll.u32 %s4395_s26, 4  ;;  %s305_s27 = int_to_ptr.vmem [resolvable:$true] %s304_s27 }
  0x18   : > { %s4396_s29 = smov [#allocation8]   ;;  %s4147_s18 = scalar_lea.hbm %s5173_s4, 8192 }
  0x19   : > { %s5201_s25 = scalar_select %p4515_p10, 1, 0 }
  0x1a   : > { %p3798_p11 = pneg %p4515_p10  ;;  %s330_s30 = sshll.u32 %s4396_s29, 4  ;;  %s331_s30 = int_to_ptr.vmem [resolvable:$true] %s330_s30 }
  0x1b   : > { %p4148_p13 = scmp.ne.s32.totalorder %s5173_s4, %s4147_s18  ;;  %p4154_p3 = scmp.lt.u32.totalorder %s4147_s18, %s5173_s4 }
  0x1c   : > { %p4523_p12 = pnand %p5181_p9, %p3798_p11 }
  0x1e   : > { %p4535_p0 = pneg %p4523_p12 }
  0x20   : > { %p4150_p1 = pnand %p4535_p0, %p4148_p13 }
  0x22   : > { %p4151_p2 = pneg %p4150_p1 }
  0x24   : > { %p4156_p4 = pnand %p4154_p3, %p4151_p2 }
  0x26   : > { %4159 = shalt.err (!%p4156_p4)
}
  0x27   : > { %s4160_s29 = scalar_lea.vmem %s305_s27, 8192  ;;  %p4168_p9 = scmp.lt.s32.totalorder %s305_s27, %s305_s27 }
  0x28   : > { %p4161_p7 = scmp.ne.s32.totalorder %s305_s27, %s4160_s29  ;;  %p4169_p6 = scmp.lt.s32.totalorder %s4160_s29, %s4160_s29 }
  0x2a   : > { %p4163_p8 = pnand %p4161_p7, %p4535_p0  ;;  %p4170_p5 = por %p4169_p6, %p4168_p9 }
  0x2c   : > { %p4164_p11 = pneg %p4163_p8 }
  0x2e   : > { %p4171_p10 = pnand %p4170_p5, %p4164_p11 }
  0x30   : > { %4174 = shalt.err (!%p4171_p10)
}
  0x31   : > { %s4397_s11 = smov 256   ;;  %s4398_s12 = smov 16  }
  0x32   : > { %3804 = dma.hbm_to_vmem [thread:$0]  (!%p4523_p12), %s5173_s4, 8192, %s305_s27, [#allocation6], %s4397_s11, %s4397_s11, %s4398_s12  }
  0x33   : > { %s4399_s18 = smov [#allocation2]   ;;  %s4175_s24 = scalar_lea.hbm %s5175_s6, 2048 }
  0x34   : > { %s288_s20 = sshll.u32 %s4399_s18, 4  ;;  %p4176_p5 = scmp.ne.s32.totalorder %s5175_s6, %s4175_s24  ;;  %s289_s20 = int_to_ptr.vmem [resolvable:$true] %s288_s20 }
  0x35   : > { %p4182_p10 = scmp.lt.u32.totalorder %s4175_s24, %s5175_s6 }
  0x36   : > { %p4178_p6 = pnand %p4176_p5, %p4535_p0 }
  0x38   : > { %p4179_p9 = pneg %p4178_p6 }
  0x3a   : > { %p4184_p13 = pnand %p4182_p10, %p4179_p9 }
  0x3c   : > { %4187 = shalt.err (!%p4184_p13)
}
  0x3d   : > { %s4188_s27 = scalar_lea.vmem %s331_s30, 2048  ;;  %p4196_p4 = scmp.lt.s32.totalorder %s331_s30, %s331_s30 }
  0x3e   : > { %p4189_p1 = scmp.ne.s32.totalorder %s331_s30, %s4188_s27  ;;  %p4197_p7 = scmp.lt.s32.totalorder %s4188_s27, %s4188_s27 }
  0x40   : > { %p4191_p2 = pnand %p4189_p1, %p4535_p0  ;;  %p4198_p8 = por %p4197_p7, %p4196_p4 }
  0x42   : > { %p4192_p3 = pneg %p4191_p2 }
  0x44   : > { %p4199_p11 = pnand %p4198_p8, %p4192_p3 }
  0x46   : > { %4202 = shalt.err (!%p4199_p11)
}
  0x47   : > { %s5190_s13 = smov 64   ;;  %s4401_s19 = smov 4  }
  0x48   : > { %3810 = dma.hbm_to_vmem [thread:$0]  (!%p4523_p12), %s5175_s6, 2048, %s331_s30, [#allocation9], %s5190_s13, %s5190_s13, %s4401_s19  }
  0x49   : > { %s4203_s12 = scalar_lea.hbm %s5171_s2, 1024 }
  0x4a   : > { %p4204_p5 = scmp.ne.s32.totalorder %s5171_s2, %s4203_s12  ;;  %p4210_p10 = scmp.lt.u32.totalorder %s4203_s12, %s5171_s2 }
  0x4c   : > { %p4206_p6 = pnand %p4204_p5, %p4535_p0 }
  0x4e   : > { %p4207_p9 = pneg %p4206_p6 }
  0x50   : > { %p4212_p13 = pnand %p4210_p10, %p4207_p9 }
  0x52   : > { %4215 = shalt.err (!%p4212_p13)
}
  0x53   : > { %s4216_s29 = scalar_lea.vmem %s289_s20, 1024  ;;  %p4224_p4 = scmp.lt.s32.totalorder %s289_s20, %s289_s20 }
  0x54   : > { %p4217_p1 = scmp.ne.s32.totalorder %s289_s20, %s4216_s29  ;;  %p4225_p7 = scmp.lt.s32.totalorder %s4216_s29, %s4216_s29 }
  0x56   : > { %p4219_p2 = pnand %p4217_p1, %p4535_p0  ;;  %p4226_p8 = por %p4225_p7, %p4224_p4 }
  0x58   : > { %p4220_p3 = pneg %p4219_p2 }
  0x5a   : > { %p4227_p11 = pnand %p4226_p8, %p4220_p3 }
  0x5c   : > { %4230 = shalt.err (!%p4227_p11)
}
  0x5d   : > { %3801 = dma.hbm_to_vmem [thread:$0]  (!%p4523_p12), %s5171_s2, 1024, %s289_s20, [#allocation3], %s5190_s13, %s5190_s13, %s4401_s19  }
  0x5e   : > { %s4402_s10 = smov [#allocation7]   ;;  %s4231_s12 = scalar_lea.hbm %s5174_s5, 8192 }
  0x5f   : > { %s317_s16 = sshll.u32 %s4402_s10, 4  ;;  %p4232_p5 = scmp.ne.s32.totalorder %s5174_s5, %s4231_s12  ;;  %s318_s16 = int_to_ptr.vmem [resolvable:$true] %s317_s16 }
  0x60   : > { %p4238_p10 = scmp.lt.u32.totalorder %s4231_s12, %s5174_s5 }
  0x61   : > { %p4234_p6 = pnand %p4232_p5, %p4535_p0 }
  0x63   : > { %p4235_p9 = pneg %p4234_p6 }
  0x65   : > { %p4240_p13 = pnand %p4238_p10, %p4235_p9 }
  0x67   : > { %4243 = shalt.err (!%p4240_p13)
}
  0x68   : > { %s4244_s20 = scalar_lea.vmem %s318_s16, 8192  ;;  %p4252_p4 = scmp.lt.s32.totalorder %s318_s16, %s318_s16 }
  0x69   : > { %p4245_p1 = scmp.ne.s32.totalorder %s318_s16, %s4244_s20  ;;  %p4253_p7 = scmp.lt.s32.totalorder %s4244_s20, %s4244_s20 }
  0x6b   : > { %p4247_p2 = pnand %p4245_p1, %p4535_p0  ;;  %p4254_p8 = por %p4253_p7, %p4252_p4 }
  0x6d   : > { %p4248_p3 = pneg %p4247_p2 }
  0x6f   : > { %p4255_p11 = pnand %p4254_p8, %p4248_p3 }
  0x71   : > { %4258 = shalt.err (!%p4255_p11)
}
  0x72   : > { %s4403_s29 = smov 128   ;;  %s4404_s30 = smov 8  }
  0x73   : > { %3807 = dma.hbm_to_vmem [thread:$0]  (!%p4523_p12), %s5174_s5, 8192, %s318_s16, [#allocation6], %s4403_s29, %s4403_s29, %s4404_s30  }
  0x74   : > { %s4405_s24 = smov [#allocation10]   ;;  %s4406_s12 = smov [#allocation11]  }
  0x75   : > { %s343_s11 = sshll.u32 %s4405_s24, 4  ;;  %s356_s15 = sshll.u32 %s4406_s12, 4  ;;  %s344_s11 = int_to_ptr.vmem [resolvable:$true] %s343_s11  ;;  %s4611_s15 = int_to_ptr.vmem [resolvable:$true] %s356_s15 }
  0x76   : > { %s4259_s21 = scalar_lea.hbm %s5176_s7, 1024 }
  0x77   : > { %p4260_p5 = scmp.ne.s32.totalorder %s5176_s7, %s4259_s21  ;;  %p4266_p10 = scmp.lt.u32.totalorder %s4259_s21, %s5176_s7 }
  0x79   : > { %p4262_p6 = pnand %p4260_p5, %p4535_p0 }
  0x7b   : > { %p4263_p9 = pneg %p4262_p6 }
  0x7d   : > { %p4268_p13 = pnand %p4266_p10, %p4263_p9 }
  0x7f   : > { %4271 = shalt.err (!%p4268_p13)
}
  0x80   : > { %s4272_s29 = scalar_lea.vmem %s344_s11, 1024  ;;  %p4280_p4 = scmp.lt.s32.totalorder %s344_s11, %s344_s11 }
  0x81   : > { %p4273_p1 = scmp.ne.s32.totalorder %s344_s11, %s4272_s29  ;;  %p4281_p7 = scmp.lt.s32.totalorder %s4272_s29, %s4272_s29 }
  0x83   : > { %p4275_p2 = pnand %p4273_p1, %p4535_p0  ;;  %p4282_p8 = por %p4281_p7, %p4280_p4 }
  0x85   : > { %p4276_p3 = pneg %p4275_p2 }
  0x87   : > { %p4283_p11 = pnand %p4282_p8, %p4276_p3 }
  0x89   : > { %4286 = shalt.err (!%p4283_p11)
}
  0x8a   : > { %s5204_s13 = smov 64   ;;  %s4287_s22 = scalar_lea.hbm %s5177_s8, 1024 }
  0x8b   : > { %3813 = dma.hbm_to_vmem [thread:$0]  (!%p4523_p12), %s5176_s7, 1024, %s344_s11, [#allocation9], %s5204_s13, %s5204_s13, %s4401_s19  }
  0x8c   : > { %p4288_p5 = scmp.ne.s32.totalorder %s5177_s8, %s4287_s22  ;;  %p4294_p10 = scmp.lt.u32.totalorder %s4287_s22, %s5177_s8 }
  0x8e   : > { %p4290_p6 = pnand %p4288_p5, %p4535_p0 }
  0x90   : > { %p4291_p9 = pneg %p4290_p6 }
  0x92   : > { %p4296_p13 = pnand %p4294_p10, %p4291_p9 }
  0x94   : > { %4299 = shalt.err (!%p4296_p13)
}
  0x95   : > { %s4300_s11 = scalar_lea.vmem %s4611_s15, 1024  ;;  %p4308_p4 = scmp.lt.s32.totalorder %s4611_s15, %s4611_s15 }
  0x96   : > { %p4301_p1 = scmp.ne.s32.totalorder %s4611_s15, %s4300_s11  ;;  %p4309_p7 = scmp.lt.s32.totalorder %s4300_s11, %s4300_s11 }
  0x98   : > { %p4303_p2 = pnand %p4301_p1, %p4535_p0  ;;  %p4310_p8 = por %p4309_p7, %p4308_p4 }
  0x9a   : > { %p4304_p3 = pneg %p4303_p2 }
  0x9c   : > { %p4311_p11 = pnand %p4310_p8, %p4304_p3 }
  0x9e   : > { %4314 = shalt.err (!%p4311_p11)
}
  0x9f   : > { %3816 = dma.hbm_to_vmem [thread:$0]  (!%p4523_p12), %s5177_s8, 1024, %s4611_s15, [#allocation12], %s5204_s13, %s5204_s13, %s4401_s19  }
  0xa0   : > { %p5205_p5 = scmp.ne.s32.totalorder %s5201_s25, 0 }
  0xa1   : > { %p5206_p0 = scmp.eq.s32.totalorder (!%p5205_p5), %s4487_s17, 0 }
  0xa2   : > { %384 = sbr.rel (%p5205_p5) target bundleno = 2092 (0x82c), region = 60 }
  0xa9   : > { %4360 = dma.done.wait (%p5206_p0), [#allocation3], 1024   ;;  %p5207_p6 = pmov %p5206_p0 }
  0xaa   : > { %p5208_p9 = pmov %p5206_p0 }
  0xab   : > { %4362 = vsyncadd (%p5207_p6), [#allocation3], 4294966272 }
  0xac   : > { %4364 = dma.done.wait (%p5208_p9), [#allocation6], 16384   ;;  %p5209_p10 = pmov %p5206_p0 }
  0xad   : > { %p5210_p13 = pmov %p5206_p0 }
  0xae   : > { %4366 = vsyncadd (%p5209_p10), [#allocation6], 4294950912 }
  0xaf   : > { %4368 = dma.done.wait (%p5210_p13), [#allocation9], 3072   ;;  %p5211_p12 = pmov %p5206_p0 }
  0xb0   : > { %p5212_p1 = pmov %p5206_p0 }
  0xb1   : > { %4370 = vsyncadd (%p5211_p12), [#allocation9], 4294964224 }
  0xb2   : > { %4372 = dma.done.wait (%p5212_p1), [#allocation12], 1024   ;;  %p5213_p2 = pmov %p5206_p0 }
  0xb3   : > { %s3255_s25 = sshll.u32 %s4487_s17, 4  ;;  %v3881_v0 = vld [vmem:[%s5170_s1] sm:$0xff]   ;;  %v3882_v1 = vld [vmem:[%s5170_s1 + $0x8] sm:$0xff]   ;;  %vm529_vm0 = vcmask 261120   ;;  %v3893_v8 = vld [vmem:[#allocation2 + $0x10] sm:$0xff]   ;;  %s3469_s30 = sshll.u32 %s4487_s17, 11 }
  0xb4   : > { %4374 = vsyncadd (%p5213_p2), [#allocation12], 4294966272  ;;  %p443_p3 = scmp.lt.s32.totalorder %s3255_s25, 31  ;;  %3592 = vmatprep.subr.bf16.mxu0 %v3881_v0  ;;  %v3891_v5 = vld [vmem:[#allocation2] sm:$0xff]   ;;  %v3892_v6 = vld [vmem:[#allocation2 + $0x8] sm:$0xff]   ;;  %s5215_s22 = sld [smem:[#allocation25_spill]] }
  0xb5   : > { %3593 = vmatpush3.bf16.msra.mxu0 %v3881_v0  ;;  %3612 = vmatprep.subr.bf16.mxu1 %v3891_v5  ;;  %v3894_v10 = vld [vmem:[#allocation2 + $0x18] sm:$0xff]   ;;  %v3895_v12 = vld [vmem:[#allocation2 + $0x20] sm:$0xff]   ;;  %v3896_v14 = vld [vmem:[#allocation2 + $0x28] sm:$0xff]   ;;  %p5216_p7 = scmp.ne.s32.totalorder %s5198_s23, 0  ;;  %s4408_s20 = smov [#allocation13]  }
  0xb6   : > { %s5227_s25 = smov (!%p443_p3, %s3255_s25), 31  ;;  %3594 = vmatprep.subr.bf16.mxu0 %v3882_v1  ;;  %3613 = vmatpush3.bf16.msra.mxu1 %v3891_v5  ;;  %v3897_v16 = vld [vmem:[#allocation2 + $0x30] sm:$0xff]   ;;  %v3898_v17 = vld [vmem:[#allocation2 + $0x38] sm:$0xff]   ;;  %v3899_v18 = vld [vmem:[%s5172_s3] ss:$8 sps:$4 sm:$0xff]   ;;  %s4319_s27 = sshll.u32 %s4408_s20, 4  ;;  %s4320_s27 = int_to_ptr.vmem [resolvable:$false] %s4319_s27 }
  0xb7   : > { %s3256_s28 = sshll.u32 %s5227_s25, 2  ;;  %3614 = vmatprep.subr.bf16.mxu1 %v3892_v6  ;;  %v3901_v19 = vld [vmem:[%s5172_s3 + $0x4] ss:$8 sps:$4 sm:$0xff]   ;;  %v3904_v20 = vld [vmem:[%s5172_s3 + $0x14] ss:$8 sps:$4 sm:$0xff]   ;;  %s4321_s11 = scalar_lea.vmem %s4320_s27, 4096 }
  0xb8   : > { %s4682_s15 = scalar_lea.vmem %s5169_s0, %s3256_s28  ;;  %v3902_v21 = vld [vmem:[%s5172_s3 + $0x10] ss:$8 sps:$4 sm:$0xff]   ;;  %v3907_v22 = vld [vmem:[%s5172_s3 + $0x24] ss:$8 sps:$4 sm:$0xff]   ;;  %v3905_v23 = vld [vmem:[%s5172_s3 + $0x20] ss:$8 sps:$4 sm:$0xff]  }
  0xb9   : > { %v3883_v2 = vld [vmem:[%s4682_s15] sm:$0xff]   ;;  %v3884_v3 = vld [vmem:[%s4682_s15 + $0x8] sm:$0xff]   ;;  %3595 = vmatpush3.bf16.msra.mxu0 %v3882_v1  ;;  %v3885_v4 = vld [vmem:[%s4682_s15 + $0x10] sm:$0xff]   ;;  %s439_s28 = sand.u32 1, %s4385_s14  }
  0xba   : > { %3596 = vmatprep.mubr.msk.bf16.mxu0 %vm529_vm0, %v3883_v2  ;;  %v3886_v7 = vld [vmem:[%s4682_s15 + $0x18] sm:$0xff]   ;;  %v3887_v9 = vld [vmem:[%s4682_s15 + $0x20] sm:$0xff]   ;;  %3615 = vmatpush3.bf16.msra.mxu1 %v3892_v6  ;;  %v3888_v11 = vld [vmem:[%s4682_s15 + $0x28] sm:$0xff]   ;;  %s3254_s26 = sshll.u32 %s439_s28, 7  ;;  %s5119_s18 = scalar_lea.hbm %s5215_s22, %s3469_s30 }
  0xbb   : > { %3616 = vmatprep.subr.bf16.mxu1 %v3893_v8  ;;  %v3889_v13 = vld [vmem:[%s4682_s15 + $0x30] sm:$0xff]   ;;  %v3890_v15 = vld [vmem:[%s4682_s15 + $0x38] sm:$0xff]   ;;  %975 = vmatprep.subr.bf16.mxu0 %v3901_v19  ;;  %v3913_v26 = vld [vmem:[%s5172_s3 + $0x44] ss:$8 sps:$4 sm:$0xff]   ;;  %s5099_s13 = scalar_lea.vmem [#allocation13], %s3254_s26  ;;  %s5128_s17 = scalar_lea.sflag [#allocation4], %s439_s28 }
  0xbc   : > { %3597 = vmatmul.mubr.msk.bf16.vlgmr.msra.gmra.mrb[0].mxu0 %vm529_vm0, %v3884_v3  ;;  %v3910_v24 = vld [vmem:[%s5172_s3 + $0x34] ss:$8 sps:$4 sm:$0xff]   ;;  %v3908_v25 = vld [vmem:[%s5172_s3 + $0x30] ss:$8 sps:$4 sm:$0xff]   ;;  %v3911_v27 = vld [vmem:[%s5172_s3 + $0x40] ss:$8 sps:$4 sm:$0xff]  }
  0xbd   : > { %3600 = vmatprep.mubr.msk.bf16.mxu0 %vm529_vm0, %v3885_v4  ;;  %976 = vmatpush1.bf16.msra.mxu0 %v3899_v18  ;;  %v3916_v28 = vld [vmem:[%s5172_s3 + $0x54] ss:$8 sps:$4 sm:$0xff]   ;;  %v3914_v29 = vld [vmem:[%s5172_s3 + $0x50] ss:$8 sps:$4 sm:$0xff]   ;;  %v3257_v30 = vld [vmem:[%s5178_s9] ss:$0 sm:$0xff] }
  0xbe   : > { %3617 = vmatpush3.bf16.msra.mxu1 %v3893_v8  ;;  %977 = vmatprep.subr.bf16.mxu0 %v3904_v20  ;;  %s3116_s10 = sshll.u32 %s5099_s13, 4  ;;  %s5121_s10 = int_to_ptr.vmem [resolvable:$true] %s3116_s10 }
  0xbf   : > { %3618 = vmatprep.subr.bf16.mxu1 %v3894_v10  ;;  %s4315_s21 = scalar_lea.vmem %s5121_s10, 2048  ;;  %p4322_p5 = scmp.lt.s32.totalorder %s5121_s10, %s4320_s27 }
  0xc0   : > { %p4316_p4 = scmp.ne.s32.totalorder %s5121_s10, %s4315_s21  ;;  %p4323_p0 = scmp.lt.s32.totalorder %s4321_s11, %s4315_s21 }
  0xc1   : > { %978 = vmatpush1.bf16.msra.mxu0 %v3902_v21 }
  0xc2   : > { %3619 = vmatpush3.bf16.msra.mxu1 %v3894_v10  ;;  %979 = vmatprep.subr.bf16.mxu0 %v3907_v22  ;;  %p4317_p8 = pnand %p4316_p4, %p5216_p7  ;;  %p4324_p6 = por %p4323_p0, %p4322_p5 }
  0xc3   : > { %3620 = vmatprep.subr.bf16.mxu1 %v3895_v12 }
  0xc4   : > { %3601 = vmatmul.mubr.msk.bf16.gmra.mrb[4].mxu0 %vm529_vm0, %v3886_v7  ;;  %p4318_p11 = pneg %p4317_p8 }
  0xc5   : > { %3604 = vmatprep.mubr.msk.bf16.mxu0 %vm529_vm0, %v3887_v9  ;;  %980 = vmatpush1.bf16.msra.mxu0 %v3905_v23  ;;  %v3919_v23 = vld [vmem:[%s5172_s3 + $0x64] ss:$8 sps:$4 sm:$0xff]  }
  0xc6   : > { %3621 = vmatpush3.bf16.msra.mxu1 %v3895_v12  ;;  %981 = vmatprep.subr.bf16.mxu0 %v3910_v24  ;;  %v3917_v24 = vld [vmem:[%s5172_s3 + $0x60] ss:$8 sps:$4 sm:$0xff]   ;;  %p4325_p9 = pnand %p4324_p6, %p4318_p11 }
  0xc7   : > { %3622 = vmatprep.subr.bf16.mxu1 %v3896_v14 }
  0xc9   : > { %982 = vmatpush1.bf16.msra.mxu0 %v3908_v25  ;;  %v3922_v25 = vld [vmem:[%s5172_s3 + $0x74] ss:$8 sps:$4 sm:$0xff]  }
  0xca   : > { %3623 = vmatpush3.bf16.msra.mxu1 %v3896_v14  ;;  %983 = vmatprep.subr.bf16.mxu0 %v3913_v26  ;;  %v3920_v26 = vld [vmem:[%s5172_s3 + $0x70] ss:$8 sps:$4 sm:$0xff]  }
  0xcb   : > { %3624 = vmatprep.subr.bf16.mxu1 %v3897_v16 }
  0xcc   : > { %3605 = vmatmul.mubr.msk.bf16.gmra.mrb[8].mxu0 %vm529_vm0, %v3888_v11 }
  0xcd   : > { %3608 = vmatprep.mubr.msk.bf16.mxu0 %vm529_vm0, %v3889_v13  ;;  %984 = vmatpush1.bf16.msra.mxu0 %v3911_v27  ;;  %v4407_v27 = vmov 0  }
  0xce   : > { %3625 = vmatpush3.bf16.msra.mxu1 %v3897_v16  ;;  %985 = vmatprep.subr.bf16.mxu0 %v3916_v28  ;;  %v3923_v28 = vld [vmem:[#allocation5] ss:$16 sps:$4 sm:$0xff]  }
  0xcf   : > { %3626 = vmatprep.subr.bf16.mxu1 %v3898_v17 }
  0xd1   : > { %986 = vmatpush1.bf16.msra.mxu0 %v3914_v29  ;;  %v3925_v29 = vld [vmem:[#allocation5 + $0x4] ss:$16 sps:$4 sm:$0xff]  }
  0xd2   : > { %3627 = vmatpush3.bf16.msra.mxu1 %v3898_v17  ;;  %987 = vmatprep.subr.bf16.mxu0 %v3919_v23 }
  0xd3   : > { %1542 = vmatprep.subr.bf16.mxu1 %v3925_v29  ;;  %v3946_v29 = vld [vmem:[#allocation5 + $0x6c] ss:$16 sps:$4 sm:$0xff]  }
  0xd4   : > { %3609 = vmatmul.mubr.msk.bf16.gmra.mrb[12].mxu0 %vm529_vm0, %v3890_v15 }
  0xd5   : > { %988 = vmatpush1.bf16.msra.mxu0 %v3917_v24  ;;  %1007 = vmatprep.mubr.bf16.mxu0 %v4407_v27 }
  0xd6   : > { %989 = vmatprep.subr.bf16.mxu0 %v3922_v25  ;;  %v3938_v25 = vld [vmem:[#allocation5 + $0x48] ss:$16 sps:$4 sm:$0xff]  }
  0xd9   : > { %990 = vmatpush1.bf16.msra.mxu0 %v3920_v26 }
 0x18f   : > { %v3598_v31 = vpop.f32.mrb[0].mxu0 }
 0x190   : > { %v597_v32 = vadd.f32 %v3598_v31, %v3257_v30  ;;  %v588_v33 = vpop.f32.mrb[1].mxu0  ;;  %v3931_v31 = vld [vmem:[#allocation5 + $0x24] ss:$16 sps:$4 sm:$0xff]  }
 0x191   : > { %v589_v34 = vadd.f32 %v3257_v30, %v588_v33  ;;  %v3599_v35 = vpop.f32.mrb[2].mxu0  ;;  %v3937_v33 = vld [vmem:[#allocation5 + $0x44] ss:$16 sps:$4 sm:$0xff]  }
 0x192   : > { %v600_v36 = vadd.f32 %v3599_v35, %v3257_v30  ;;  %v591_v37 = vpop.f32.mrb[3].mxu0  ;;  %v653_v39 = vmax.f32 %v597_v32, 0.0  ;;  %v3929_v32 = vld [vmem:[#allocation5 + $0x20] ss:$16 sps:$4 sm:$0xff]   ;;  %v3943_v35 = vld [vmem:[#allocation5 + $0x64] ss:$16 sps:$4 sm:$0xff]  }
 0x193   : > { %v592_v38 = vadd.f32 %v3257_v30, %v591_v37  ;;  %v651_v41 = vmax.f32 %v589_v34, 0.0  ;;  %v3935_v34 = vld [vmem:[#allocation5 + $0x40] ss:$16 sps:$4 sm:$0xff]   ;;  %v3949_v37 = vld [vmem:[#allocation5 + $0x84] ss:$16 sps:$4 sm:$0xff]  }
 0x194   : > { %v654_v40 = vmax.f32 %v600_v36, 0.0  ;;  %v3941_v36 = vld [vmem:[#allocation5 + $0x60] ss:$16 sps:$4 sm:$0xff]  }
 0x195   : > { %v652_v42 = vmax.f32 %v592_v38, 0.0  ;;  %v3947_v38 = vld [vmem:[#allocation5 + $0x80] ss:$16 sps:$4 sm:$0xff]  }
 0x196   : > { %v668_v43 = vpack.c.bf16 %v654_v40, %v653_v39  ;;  %v3955_v39 = vld [vmem:[#allocation5 + $0xa4] ss:$16 sps:$4 sm:$0xff]   ;;  %v3953_v40 = vld [vmem:[#allocation5 + $0xa0] ss:$16 sps:$4 sm:$0xff]  }
 0x197   : > { %v3602_v44 = vpop.f32.mrb[4].mxu0  ;;  %v667_v45 = vpack.c.bf16 %v652_v42, %v651_v41  ;;  %v3961_v41 = vld [vmem:[#allocation5 + $0xc4] ss:$16 sps:$4 sm:$0xff]   ;;  %v3959_v42 = vld [vmem:[#allocation5 + $0xc0] ss:$16 sps:$4 sm:$0xff]  }
 0x198   : > { %v613_v46 = vadd.f32 %v3602_v44, %v3257_v30  ;;  %v604_v47 = vpop.f32.mrb[5].mxu0  ;;  %v3965_v44 = vld [vmem:[#allocation5 + $0xe0] ss:$16 sps:$4 sm:$0xff]  }
 0x199   : > { %v605_v48 = vadd.f32 %v3257_v30, %v604_v47  ;;  %3628 = vmatprep.mubr.bf16.mxu1 %v667_v45  ;;  %v3603_v49 = vpop.f32.mrb[6].mxu0  ;;  %v3973_v45 = vld [vmem:[#allocation5 + $0x104] ss:$16 sps:$4 sm:$0xff]  }
 0x19a   : > { %v657_v50 = vmax.f32 %v613_v46, 0.0  ;;  %v616_v51 = vadd.f32 %v3603_v49, %v3257_v30  ;;  %3629 = vmatmul.mubr.bf16.vlgmr.msra.gmra.mrb[0].mxu1 %v668_v43  ;;  %v607_v52 = vpop.f32.mrb[7].mxu0  ;;  %v3967_v43 = vld [vmem:[#allocation5 + $0xe4] ss:$16 sps:$4 sm:$0xff]   ;;  %v3971_v46 = vld [vmem:[#allocation5 + $0x100] ss:$16 sps:$4 sm:$0xff]  }
 0x19b   : > { %v655_v53 = vmax.f32 %v605_v48, 0.0  ;;  %v608_v54 = vadd.f32 %v3257_v30, %v607_v52  ;;  %1543 = vmatpush1.bf16.msra.mxu1 %v3923_v28  ;;  %v3979_v47 = vld [vmem:[#allocation5 + $0x124] ss:$16 sps:$4 sm:$0xff]   ;;  %v3977_v48 = vld [vmem:[#allocation5 + $0x120] ss:$16 sps:$4 sm:$0xff]  }
 0x19c   : > { %v658_v55 = vmax.f32 %v616_v51, 0.0  ;;  %1544 = vmatprep.subr.bf16.mxu1 %v3931_v31  ;;  %v3985_v49 = vld [vmem:[#allocation5 + $0x144] ss:$16 sps:$4 sm:$0xff]   ;;  %v3989_v52 = vld [vmem:[#allocation5 + $0x160] ss:$16 sps:$4 sm:$0xff]  }
 0x19d   : > { %v656_v56 = vmax.f32 %v608_v54, 0.0  ;;  %v3991_v51 = vld [vmem:[#allocation5 + $0x164] ss:$16 sps:$4 sm:$0xff]   ;;  %v3995_v54 = vld [vmem:[#allocation5 + $0x180] ss:$16 sps:$4 sm:$0xff]  }
 0x19e   : > { %v670_v57 = vpack.c.bf16 %v658_v55, %v657_v50  ;;  %v3983_v50 = vld [vmem:[#allocation5 + $0x140] ss:$16 sps:$4 sm:$0xff]   ;;  %v4003_v55 = vld [vmem:[#allocation5 + $0x1a4] ss:$16 sps:$4 sm:$0xff]  }
 0x19f   : > { %v669_v58 = vpack.c.bf16 %v656_v56, %v655_v53  ;;  %v3606_v59 = vpop.f32.mrb[8].mxu0  ;;  %1545 = vmatpush1.bf16.msra.mxu1 %v3929_v32  ;;  %v3997_v53 = vld [vmem:[#allocation5 + $0x184] ss:$16 sps:$4 sm:$0xff]   ;;  %v4001_v56 = vld [vmem:[#allocation5 + $0x1a0] ss:$16 sps:$4 sm:$0xff]  }
 0x1a0   : > { %v629_v60 = vadd.f32 %v3606_v59, %v3257_v30  ;;  %v620_v61 = vpop.f32.mrb[9].mxu0  ;;  %1546 = vmatprep.subr.bf16.mxu1 %v3937_v33 }
 0x1a1   : > { %3632 = vmatprep.mubr.bf16.mxu1 %v669_v58  ;;  %v621_v62 = vadd.f32 %v3257_v30, %v620_v61  ;;  %v3607_v63 = vpop.f32.mrb[10].mxu0 }
 0x1a2   : > { %3633 = vmatmul.mubr.bf16.gmra.mrb[4].mxu1 %v670_v57  ;;  %v661_v0 = vmax.f32 %v629_v60, 0.0  ;;  %v632_v1 = vadd.f32 %v3607_v63, %v3257_v30  ;;  %v623_v2 = vpop.f32.mrb[11].mxu0  ;;  %v4761_v57 = vld [vmem:[%s5178_s9 + $0x1] ss:$0 sm:$0xff] }
 0x1a3   : > { %v659_v3 = vmax.f32 %v621_v62, 0.0  ;;  %v624_v4 = vadd.f32 %v3257_v30, %v623_v2  ;;  %1547 = vmatpush1.bf16.msra.mxu1 %v3935_v34 }
 0x1a4   : > { %v662_v5 = vmax.f32 %v632_v1, 0.0  ;;  %1548 = vmatprep.subr.bf16.mxu1 %v3943_v35 }
 0x1a5   : > { %v660_v6 = vmax.f32 %v624_v4, 0.0 }
 0x1a6   : > { %v672_v7 = vpack.c.bf16 %v662_v5, %v661_v0 }
 0x1a7   : > { %v671_v8 = vpack.c.bf16 %v660_v6, %v659_v3  ;;  %v3610_v9 = vpop.f32.mrb[12].mxu0  ;;  %1549 = vmatpush1.bf16.msra.mxu1 %v3941_v36 }
 0x1a8   : > { %v645_v10 = vadd.f32 %v3610_v9, %v3257_v30  ;;  %v636_v11 = vpop.f32.mrb[13].mxu0  ;;  %1550 = vmatprep.subr.bf16.mxu1 %v3949_v37  ;;  %v3944_v37 = vld [vmem:[#allocation5 + $0x68] ss:$16 sps:$4 sm:$0xff]  }
 0x1a9   : > { %3636 = vmatprep.mubr.bf16.mxu1 %v671_v8  ;;  %v637_v12 = vadd.f32 %v3257_v30, %v636_v11  ;;  %v3611_v13 = vpop.f32.mrb[14].mxu0 }
 0x1aa   : > { %3637 = vmatmul.mubr.bf16.gmra.mrb[8].mxu1 %v672_v7  ;;  %v665_v14 = vmax.f32 %v645_v10, 0.0  ;;  %v648_v15 = vadd.f32 %v3611_v13, %v3257_v30  ;;  %v639_v16 = vpop.f32.mrb[15].mxu0  ;;  %v3926_v7 = vld [vmem:[#allocation5 + $0x8] ss:$16 sps:$4 sm:$0xff]   ;;  %v3934_v10 = vld [vmem:[#allocation5 + $0x2c] ss:$16 sps:$4 sm:$0xff]  }
 0x1ab   : > { %v663_v17 = vmax.f32 %v637_v12, 0.0  ;;  %v640_v18 = vadd.f32 %v3257_v30, %v639_v16  ;;  %v3928_v30 = vld [vmem:[#allocation5 + $0xc] ss:$16 sps:$4 sm:$0xff]   ;;  %1551 = vmatpush1.bf16.msra.mxu1 %v3947_v38 }
 0x1ac   : > { %v666_v19 = vmax.f32 %v648_v15, 0.0  ;;  %1655 = vmatprep.subr.bf16.mxu0 %v3928_v30  ;;  %1552 = vmatprep.subr.bf16.mxu1 %v3955_v39 }
 0x1ad   : > { %v664_v20 = vmax.f32 %v640_v18, 0.0  ;;  %v3932_v18 = vld [vmem:[#allocation5 + $0x28] ss:$16 sps:$4 sm:$0xff]  }
 0x1ae   : > { %v674_v21 = vpack.c.bf16 %v666_v19, %v665_v14 }
 0x1af   : > { %v673_v22 = vpack.c.bf16 %v664_v20, %v663_v17  ;;  %1553 = vmatpush1.bf16.msra.mxu1 %v3953_v40  ;;  %v3952_v40 = vld [vmem:[#allocation5 + $0x8c] ss:$16 sps:$4 sm:$0xff]  }
 0x1b0   : > { %1554 = vmatprep.subr.bf16.mxu1 %v3961_v41 }
 0x1b1   : > { %3640 = vmatprep.mubr.bf16.mxu1 %v673_v22 }
 0x1b2   : > { %3641 = vmatmul.mubr.bf16.gmra.mrb[12].mxu1 %v674_v21  ;;  %v3940_v21 = vld [vmem:[#allocation5 + $0x4c] ss:$16 sps:$4 sm:$0xff]  }
 0x1b3   : > { %1555 = vmatpush1.bf16.msra.mxu1 %v3959_v42 }
 0x1b4   : > { %1556 = vmatprep.subr.bf16.mxu1 %v3967_v43 }
 0x1b7   : > { %1557 = vmatpush1.bf16.msra.mxu1 %v3965_v44  ;;  %v3950_v44 = vld [vmem:[#allocation5 + $0x88] ss:$16 sps:$4 sm:$0xff]  }
 0x1b8   : > { %1558 = vmatprep.subr.bf16.mxu1 %v3973_v45 }
 0x1bb   : > { %1559 = vmatpush1.bf16.msra.mxu1 %v3971_v46 }
 0x1bc   : > { %1560 = vmatprep.subr.bf16.mxu1 %v3979_v47  ;;  %v3958_v47 = vld [vmem:[#allocation5 + $0xac] ss:$16 sps:$4 sm:$0xff]  }
 0x1bf   : > { %1561 = vmatpush1.bf16.msra.mxu1 %v3977_v48 }
 0x1c0   : > { %1562 = vmatprep.subr.bf16.mxu1 %v3985_v49 }
 0x1c3   : > { %1563 = vmatpush1.bf16.msra.mxu1 %v3983_v50 }
 0x1c4   : > { %1564 = vmatprep.subr.bf16.mxu1 %v3991_v51 }
 0x1c7   : > { %1565 = vmatpush1.bf16.msra.mxu1 %v3989_v52 }
 0x1c8   : > { %1566 = vmatprep.subr.bf16.mxu1 %v3997_v53 }
 0x1cb   : > { %1567 = vmatpush1.bf16.msra.mxu1 %v3995_v54 }
 0x1cc   : > { %1568 = vmatprep.subr.bf16.mxu1 %v4003_v55  ;;  %v3956_v55 = vld [vmem:[#allocation5 + $0xa8] ss:$16 sps:$4 sm:$0xff]  }
 0x1cf   : > { %1569 = vmatpush1.bf16.msra.mxu1 %v4001_v56 }
 0x26d   : > { %v3630_v58 = vpop.f32.mrb[0].mxu1 }
 0x26e   : > { %v789_v59 = vadd.f32 %v3630_v58, %v4761_v57  ;;  %v780_v60 = vpop.f32.mrb[1].mxu1 }
 0x26f   : > { %v781_v61 = vadd.f32 %v4761_v57, %v780_v60  ;;  %v3631_v62 = vpop.f32.mrb[2].mxu1 }
 0x270   : > { %v792_v63 = vadd.f32 %v3631_v62, %v4761_v57  ;;  %v783_v0 = vpop.f32.mrb[3].mxu1  ;;  %v845_v2 = vmax.f32 %v789_v59, 0.0  ;;  %v3964_v59 = vld [vmem:[#allocation5 + $0xcc] ss:$16 sps:$4 sm:$0xff]  }
 0x271   : > { %v784_v1 = vadd.f32 %v4761_v57, %v783_v0  ;;  %v843_v4 = vmax.f32 %v781_v61, 0.0 }
 0x272   : > { %v846_v3 = vmax.f32 %v792_v63, 0.0  ;;  %v3962_v63 = vld [vmem:[#allocation5 + $0xc8] ss:$16 sps:$4 sm:$0xff]  }
 0x273   : > { %v844_v5 = vmax.f32 %v784_v1, 0.0  ;;  %v3970_v1 = vld [vmem:[#allocation5 + $0xec] ss:$16 sps:$4 sm:$0xff]  }
 0x274   : > { %v860_v6 = vpack.c.bf16 %v846_v3, %v845_v2  ;;  %v3968_v2 = vld [vmem:[#allocation5 + $0xe8] ss:$16 sps:$4 sm:$0xff]   ;;  %v3976_v3 = vld [vmem:[#allocation5 + $0x10c] ss:$16 sps:$4 sm:$0xff]  }
 0x275   : > { %v859_v8 = vpack.c.bf16 %v844_v5, %v843_v4  ;;  %v3634_v9 = vpop.f32.mrb[4].mxu1  ;;  %v3974_v4 = vld [vmem:[#allocation5 + $0x108] ss:$16 sps:$4 sm:$0xff]  }
 0x276   : > { %v805_v11 = vadd.f32 %v3634_v9, %v4761_v57  ;;  %v796_v12 = vpop.f32.mrb[5].mxu1  ;;  %v3980_v5 = vld [vmem:[#allocation5 + $0x128] ss:$16 sps:$4 sm:$0xff]  }
 0x277   : > { %v797_v13 = vadd.f32 %v4761_v57, %v796_v12  ;;  %1008 = vmatmul.mubr.bf16.vlgmr.msra.gmra.mrb[16].mxu0 %v859_v8  ;;  %v3635_v14 = vpop.f32.mrb[6].mxu1  ;;  %v3994_v8 = vld [vmem:[#allocation5 + $0x16c] ss:$16 sps:$4 sm:$0xff]   ;;  %v3992_v9 = vld [vmem:[#allocation5 + $0x168] ss:$16 sps:$4 sm:$0xff]  }
 0x278   : > { %v849_v15 = vmax.f32 %v805_v11, 0.0  ;;  %v808_v16 = vadd.f32 %v3635_v14, %v4761_v57  ;;  %v799_v17 = vpop.f32.mrb[7].mxu1  ;;  %1017 = vmatprep.mubr.bf16.mxu0 %v4407_v27  ;;  %1656 = vmatpush1.bf16.msra.mxu0 %v3926_v7  ;;  %v3986_v7 = vld [vmem:[#allocation5 + $0x148] ss:$16 sps:$4 sm:$0xff]   ;;  %v4006_v12 = vld [vmem:[#allocation5 + $0x1ac] ss:$16 sps:$4 sm:$0xff]  }
 0x279   : > { %v847_v19 = vmax.f32 %v797_v13, 0.0  ;;  %v800_v20 = vadd.f32 %v4761_v57, %v799_v17  ;;  %1657 = vmatprep.subr.bf16.mxu0 %v3934_v10  ;;  %v4000_v10 = vld [vmem:[#allocation5 + $0x18c] ss:$16 sps:$4 sm:$0xff]   ;;  %v3998_v11 = vld [vmem:[#allocation5 + $0x188] ss:$16 sps:$4 sm:$0xff]  }
 0x27a   : > { %v850_v22 = vmax.f32 %v808_v16, 0.0  ;;  %v4004_v13 = vld [vmem:[#allocation5 + $0x1a8] ss:$16 sps:$4 sm:$0xff]   ;;  %v4009_v14 = vld [vmem:[#allocation5 + $0x1c4] ss:$16 sps:$4 sm:$0xff]  }
 0x27b   : > { %v848_v23 = vmax.f32 %v800_v20, 0.0  ;;  %v4007_v16 = vld [vmem:[#allocation5 + $0x1c0] ss:$16 sps:$4 sm:$0xff]   ;;  %v4010_v17 = vld [vmem:[#allocation5 + $0x1c8] ss:$16 sps:$4 sm:$0xff]   ;;  %1570 = vmatprep.subr.bf16.mxu1 %v4009_v14 }
 0x27c   : > { %v862_v24 = vpack.c.bf16 %v850_v22, %v849_v15  ;;  %1658 = vmatpush1.bf16.msra.mxu0 %v3932_v18  ;;  %v4012_v15 = vld [vmem:[#allocation5 + $0x1cc] ss:$16 sps:$4 sm:$0xff]   ;;  %1571 = vmatpush1.bf16.msra.mxu1 %v4007_v16  ;;  %v4015_v18 = vld [vmem:[#allocation5 + $0x1e4] ss:$16 sps:$4 sm:$0xff]   ;;  %v4013_v20 = vld [vmem:[#allocation5 + $0x1e0] ss:$16 sps:$4 sm:$0xff]   ;;  %v885_v22 = vlaneseq }
 0x27d   : > { %v861_v26 = vpack.c.bf16 %v848_v23, %v847_v19  ;;  %v3638_v28 = vpop.f32.mrb[8].mxu1  ;;  %1659 = vmatprep.subr.bf16.mxu0 %v3940_v21  ;;  %v4018_v19 = vld [vmem:[#allocation5 + $0x1ec] ss:$16 sps:$4 sm:$0xff]   ;;  %v4016_v21 = vld [vmem:[#allocation5 + $0x1e8] ss:$16 sps:$4 sm:$0xff]   ;;  %1572 = vmatprep.subr.bf16.mxu1 %v4015_v18 }
 0x27e   : > { %v821_v30 = vadd.f32 %v3638_v28, %v4761_v57  ;;  %v812_v31 = vpop.f32.mrb[9].mxu1  ;;  %v4786_v23 = vshrl.u32 %v885_v22, 7 }
 0x27f   : > { %1018 = vmatmul.mubr.bf16.gmra.mrb[20].mxu0 %v860_v6  ;;  %v813_v32 = vadd.f32 %v4761_v57, %v812_v31  ;;  %v3639_v33 = vpop.f32.mrb[10].mxu1  ;;  %v3988_v6 = vld [vmem:[#allocation5 + $0x14c] ss:$16 sps:$4 sm:$0xff]  }
 0x280   : > { %v853_v34 = vmax.f32 %v821_v30, 0.0  ;;  %1027 = vmatprep.mubr.bf16.mxu0 %v4407_v27  ;;  %v824_v35 = vadd.f32 %v3639_v33, %v4761_v57  ;;  %v815_v36 = vpop.f32.mrb[11].mxu1  ;;  %1660 = vmatpush1.bf16.msra.mxu0 %v3938_v25  ;;  %v883_v25 = vld [vmem:[%s5178_s9 + $0x2] sm:$0x3] }
 0x281   : > { %v851_v38 = vmax.f32 %v813_v32, 0.0  ;;  %v816_v39 = vadd.f32 %v4761_v57, %v815_v36  ;;  %1661 = vmatprep.subr.bf16.mxu0 %v3946_v29  ;;  %1573 = vmatpush1.bf16.msra.mxu1 %v4013_v20  ;;  %v4036_v20 = vld [vmem:[#allocation7 + $0x54] ss:$8 sps:$4 sm:$0xff]  }
 0x282   : > { %v854_v41 = vmax.f32 %v824_v35, 0.0 }
 0x283   : > { %v852_v42 = vmax.f32 %v816_v39, 0.0 }
 0x284   : > { %v864_v43 = vpack.c.bf16 %v854_v41, %v853_v34  ;;  %1662 = vmatpush1.bf16.msra.mxu0 %v3944_v37 }
 0x285   : > { %v863_v45 = vpack.c.bf16 %v852_v42, %v851_v38  ;;  %v3642_v46 = vpop.f32.mrb[12].mxu1  ;;  %1663 = vmatprep.subr.bf16.mxu0 %v3952_v40 }
 0x286   : > { %v837_v48 = vadd.f32 %v3642_v46, %v4761_v57  ;;  %v828_v49 = vpop.f32.mrb[13].mxu1 }
 0x287   : > { %1028 = vmatmul.mubr.bf16.gmra.mrb[24].mxu0 %v861_v26  ;;  %v829_v50 = vadd.f32 %v4761_v57, %v828_v49  ;;  %v3643_v51 = vpop.f32.mrb[14].mxu1  ;;  %v4795_v26 = vsub.s32 1, %v4786_v23 }
 0x288   : > { %1037 = vmatprep.mubr.bf16.mxu0 %v4407_v27  ;;  %v857_v52 = vmax.f32 %v837_v48, 0.0  ;;  %v840_v53 = vadd.f32 %v3643_v51, %v4761_v57  ;;  %v831_v54 = vpop.f32.mrb[15].mxu1  ;;  %1664 = vmatpush1.bf16.msra.mxu0 %v3950_v44  ;;  %v4024_v48 = vld [vmem:[#allocation7 + $0x14] ss:$8 sps:$4 sm:$0xff]  }
 0x289   : > { %v855_v56 = vmax.f32 %v829_v50, 0.0  ;;  %v832_v58 = vadd.f32 %v4761_v57, %v831_v54  ;;  %1665 = vmatprep.subr.bf16.mxu0 %v3958_v47  ;;  %v3982_v57 = vld [vmem:[#allocation5 + $0x12c] ss:$16 sps:$4 sm:$0xff]   ;;  %v4801_v29 = vrot.slane %v883_v25, %v4795_v26  ;;  %v4022_v54 = vld [vmem:[#allocation7 + $0x10] ss:$8 sps:$4 sm:$0xff]  }
 0x28a   : > { %v858_v60 = vmax.f32 %v840_v53, 0.0 }
 0x28b   : > { %v856_v61 = vmax.f32 %v832_v58, 0.0  ;;  %v4027_v58 = vld [vmem:[#allocation7 + $0x24] ss:$8 sps:$4 sm:$0xff]  }
 0x28c   : > { %v866_v62 = vpack.c.bf16 %v858_v60, %v857_v52  ;;  %1666 = vmatpush1.bf16.msra.mxu0 %v3956_v55 }
 0x28d   : > { %v865_v0 = vpack.c.bf16 %v856_v61, %v855_v56  ;;  %1667 = vmatprep.subr.bf16.mxu0 %v3964_v59 }
 0x28f   : > { %1038 = vmatmul.mubr.bf16.gmra.mrb[28].mxu0 %v862_v24  ;;  %v4789_v24 = vsub.s32 0, %v4786_v23 }
 0x290   : > { %1047 = vmatprep.mubr.bf16.mxu0 %v4407_v27  ;;  %1668 = vmatpush1.bf16.msra.mxu0 %v3962_v63 }
 0x291   : > { %1669 = vmatprep.subr.bf16.mxu0 %v3970_v1  ;;  %v4798_v28 = vrot.slane %v883_v25, %v4789_v24 }
 0x294   : > { %1670 = vmatpush1.bf16.msra.mxu0 %v3968_v2 }
 0x295   : > { %1671 = vmatprep.subr.bf16.mxu0 %v3976_v3  ;;  %v4030_v3 = vld [vmem:[#allocation7 + $0x34] ss:$8 sps:$4 sm:$0xff]  }
 0x297   : > { %1048 = vmatmul.mubr.bf16.gmra.mrb[32].mxu0 %v863_v45  ;;  %v4019_v45 = vld [vmem:[#allocation7] ss:$8 sps:$4 sm:$0xff]  }
 0x298   : > { %1057 = vmatprep.mubr.bf16.mxu0 %v4407_v27  ;;  %1672 = vmatpush1.bf16.msra.mxu0 %v3974_v4 }
 0x299   : > { %1673 = vmatprep.subr.bf16.mxu0 %v3982_v57 }
 0x29c   : > { %1674 = vmatpush1.bf16.msra.mxu0 %v3980_v5 }
 0x29d   : > { %1675 = vmatprep.subr.bf16.mxu0 %v3988_v6 }
 0x29f   : > { %1058 = vmatmul.mubr.bf16.gmra.mrb[36].mxu0 %v864_v43 }
 0x2a0   : > { %1067 = vmatprep.mubr.bf16.mxu0 %v4407_v27  ;;  %1676 = vmatpush1.bf16.msra.mxu0 %v3986_v7 }
 0x2a1   : > { %1677 = vmatprep.subr.bf16.mxu0 %v3994_v8  ;;  %v4028_v8 = vld [vmem:[#allocation7 + $0x30] ss:$8 sps:$4 sm:$0xff]  }
 0x2a4   : > { %1678 = vmatpush1.bf16.msra.mxu0 %v3992_v9 }
 0x2a5   : > { %1679 = vmatprep.subr.bf16.mxu0 %v4000_v10 }
 0x2a7   : > { %1068 = vmatmul.mubr.bf16.gmra.mrb[40].mxu0 %v865_v0  ;;  %v4025_v0 = vld [vmem:[#allocation7 + $0x20] ss:$8 sps:$4 sm:$0xff]  }
 0x2a8   : > { %1077 = vmatprep.mubr.bf16.mxu0 %v4407_v27  ;;  %1680 = vmatpush1.bf16.msra.mxu0 %v3998_v11  ;;  %v4021_v27 = vld [vmem:[#allocation7 + $0x4] ss:$8 sps:$4 sm:$0xff]  }
 0x2a9   : > { %1681 = vmatprep.subr.bf16.mxu0 %v4006_v12  ;;  %2196 = vmatprep.subr.bf16.mxu1 %v4021_v27  ;;  %v4033_v11 = vld [vmem:[#allocation7 + $0x44] ss:$8 sps:$4 sm:$0xff]  }
 0x2ac   : > { %1682 = vmatpush1.bf16.msra.mxu0 %v4004_v13 }
 0x2ad   : > { %1683 = vmatprep.subr.bf16.mxu0 %v4012_v15 }
 0x2af   : > { %1078 = vmatmul.mubr.bf16.gmra.mrb[44].mxu0 %v866_v62 }
 0x2b0   : > { %1684 = vmatpush1.bf16.msra.mxu0 %v4010_v17  ;;  %v4031_v17 = vld [vmem:[#allocation7 + $0x40] ss:$8 sps:$4 sm:$0xff]  }
 0x2b1   : > { %1685 = vmatprep.subr.bf16.mxu0 %v4018_v19 }
 0x2b4   : > { %1686 = vmatpush1.bf16.msra.mxu0 %v4016_v21 }
 0x34a   : > { %v1009_v30 = vpop.f32.mrb[16].mxu0 }
 0x34b   : > { %v1010_v31 = vadd.f32 %v1009_v30, %v4798_v28  ;;  %v1011_v32 = vpop.f32.mrb[17].mxu0 }
 0x34c   : > { %v1012_v33 = vadd.f32 %v1011_v32, %v4801_v29  ;;  %v1013_v34 = vpop.f32.mrb[18].mxu0 }
 0x34d   : > { %v1014_v35 = vadd.f32 %v1013_v34, %v4798_v28  ;;  %v1015_v36 = vpop.f32.mrb[19].mxu0  ;;  %v1088_v38 = vmax.f32 %v1010_v31, 0.0  ;;  %v4034_v31 = vld [vmem:[#allocation7 + $0x50] ss:$8 sps:$4 sm:$0xff]   ;;  %v4039_v34 = vld [vmem:[#allocation7 + $0x64] ss:$8 sps:$4 sm:$0xff]  }
 0x34e   : > { %v1016_v37 = vadd.f32 %v1015_v36, %v4801_v29  ;;  %v1089_v40 = vmax.f32 %v1012_v33, 0.0 }
 0x34f   : > { %v1090_v39 = vmax.f32 %v1014_v35, 0.0 }
 0x350   : > { %v1091_v41 = vmax.f32 %v1016_v37, 0.0 }
 0x351   : > { %v1120_v42 = vpack.c.bf16 %v1090_v39, %v1088_v38 }
 0x352   : > { %v1121_v43 = vpack.c.bf16 %v1091_v41, %v1089_v40  ;;  %v1019_v44 = vpop.f32.mrb[20].mxu0  ;;  %v4037_v40 = vld [vmem:[#allocation7 + $0x60] ss:$8 sps:$4 sm:$0xff]  }
 0x353   : > { %v1020_v46 = vadd.f32 %v1019_v44, %v4798_v28  ;;  %v1021_v47 = vpop.f32.mrb[21].mxu0 }
 0x354   : > { %v1022_v49 = vadd.f32 %v1021_v47, %v4801_v29  ;;  %v1023_v50 = vpop.f32.mrb[22].mxu0  ;;  %1574 = vmatprep.mubr.bf16.mxu1 %v1121_v43  ;;  %1687 = vmatprep.mubr.bf16.mxu0 %v1121_v43  ;;  %v4042_v43 = vld [vmem:[#allocation7 + $0x74] ss:$8 sps:$4 sm:$0xff]  }
 0x355   : > { %v1024_v51 = vadd.f32 %v1023_v50, %v4798_v28  ;;  %v1025_v52 = vpop.f32.mrb[23].mxu0  ;;  %1575 = vmatmul.mubr.bf16.vlgmr.msra.gmra.mrb[16].mxu1 %v1120_v42  ;;  %1688 = vmatmul.mubr.bf16.vlgmr.msra.gmra.mrb[48].mxu0 %v1120_v42  ;;  %v1092_v55 = vmax.f32 %v1020_v46, 0.0 }
 0x356   : > { %v1026_v53 = vadd.f32 %v1025_v52, %v4801_v29  ;;  %2197 = vmatpush1.bf16.msra.mxu1 %v4019_v45  ;;  %v1093_v59 = vmax.f32 %v1022_v49, 0.0  ;;  %v4040_v49 = vld [vmem:[#allocation7 + $0x70] ss:$8 sps:$4 sm:$0xff]   ;;  %v4045_v52 = vld [vmem:[#allocation7 + $0x84] ss:$8 sps:$4 sm:$0xff]  }
 0x357   : > { %v1094_v56 = vmax.f32 %v1024_v51, 0.0  ;;  %2198 = vmatprep.subr.bf16.mxu1 %v4024_v48 }
 0x358   : > { %v1095_v60 = vmax.f32 %v1026_v53, 0.0 }
 0x359   : > { %v1122_v61 = vpack.c.bf16 %v1094_v56, %v1092_v55 }
 0x35a   : > { %v1123_v62 = vpack.c.bf16 %v1095_v60, %v1093_v59  ;;  %v1029_v63 = vpop.f32.mrb[24].mxu0  ;;  %2199 = vmatpush1.bf16.msra.mxu1 %v4022_v54  ;;  %v4043_v59 = vld [vmem:[#allocation7 + $0x80] ss:$8 sps:$4 sm:$0xff]  }
 0x35b   : > { %v1030_v1 = vadd.f32 %v1029_v63, %v4798_v28  ;;  %v1031_v2 = vpop.f32.mrb[25].mxu0  ;;  %2200 = vmatprep.subr.bf16.mxu1 %v4027_v58 }
 0x35c   : > { %v1032_v4 = vadd.f32 %v1031_v2, %v4801_v29  ;;  %v1033_v57 = vpop.f32.mrb[26].mxu0  ;;  %1584 = vmatprep.mubr.bf16.mxu1 %v1123_v62  ;;  %1697 = vmatprep.mubr.bf16.mxu0 %v1123_v62  ;;  %v4048_v62 = vld [vmem:[#allocation7 + $0x94] ss:$8 sps:$4 sm:$0xff]  }
 0x35d   : > { %v1034_v5 = vadd.f32 %v1033_v57, %v4798_v28  ;;  %v1035_v6 = vpop.f32.mrb[27].mxu0  ;;  %1585 = vmatmul.mubr.bf16.gmra.mrb[20].mxu1 %v1122_v61  ;;  %1698 = vmatmul.mubr.bf16.gmra.mrb[52].mxu0 %v1122_v61  ;;  %v1096_v9 = vmax.f32 %v1030_v1, 0.0 }
 0x35e   : > { %v1036_v7 = vadd.f32 %v1035_v6, %v4801_v29  ;;  %2201 = vmatpush1.bf16.msra.mxu1 %v4025_v0  ;;  %v1097_v12 = vmax.f32 %v1032_v4, 0.0  ;;  %v4046_v4 = vld [vmem:[#allocation7 + $0x90] ss:$8 sps:$4 sm:$0xff]   ;;  %v4051_v6 = vld [vmem:[#allocation7 + $0xa4] ss:$8 sps:$4 sm:$0xff]  }
 0x35f   : > { %v1098_v10 = vmax.f32 %v1034_v5, 0.0  ;;  %2202 = vmatprep.subr.bf16.mxu1 %v4030_v3 }
 0x360   : > { %v1099_v13 = vmax.f32 %v1036_v7, 0.0 }
 0x361   : > { %v1124_v14 = vpack.c.bf16 %v1098_v10, %v1096_v9 }
 0x362   : > { %v1125_v15 = vpack.c.bf16 %v1099_v13, %v1097_v12  ;;  %v1039_v16 = vpop.f32.mrb[28].mxu0  ;;  %2203 = vmatpush1.bf16.msra.mxu1 %v4028_v8  ;;  %v4049_v12 = vld [vmem:[#allocation7 + $0xa0] ss:$8 sps:$4 sm:$0xff]  }
 0x363   : > { %v1040_v18 = vadd.f32 %v1039_v16, %v4798_v28  ;;  %v1041_v19 = vpop.f32.mrb[29].mxu0  ;;  %2204 = vmatprep.subr.bf16.mxu1 %v4033_v11 }
 0x364   : > { %v1042_v21 = vadd.f32 %v1041_v19, %v4801_v29  ;;  %v1043_v27 = vpop.f32.mrb[30].mxu0  ;;  %1594 = vmatprep.mubr.bf16.mxu1 %v1125_v15  ;;  %1707 = vmatprep.mubr.bf16.mxu0 %v1125_v15  ;;  %v4054_v15 = vld [vmem:[#allocation7 + $0xb4] ss:$8 sps:$4 sm:$0xff]  }
 0x365   : > { %v1044_v22 = vadd.f32 %v1043_v27, %v4798_v28  ;;  %v1045_v25 = vpop.f32.mrb[31].mxu0  ;;  %1595 = vmatmul.mubr.bf16.gmra.mrb[24].mxu1 %v1124_v14  ;;  %1708 = vmatmul.mubr.bf16.gmra.mrb[56].mxu0 %v1124_v14  ;;  %v1100_v32 = vmax.f32 %v1040_v18, 0.0 }
 0x366   : > { %v1046_v30 = vadd.f32 %v1045_v25, %v4801_v29  ;;  %2205 = vmatpush1.bf16.msra.mxu1 %v4031_v17  ;;  %v1101_v35 = vmax.f32 %v1042_v21, 0.0  ;;  %v4052_v21 = vld [vmem:[#allocation7 + $0xb0] ss:$8 sps:$4 sm:$0xff]   ;;  %v4057_v25 = vld [vmem:[#allocation7 + $0xc4] ss:$8 sps:$4 sm:$0xff]  }
 0x367   : > { %v1102_v33 = vmax.f32 %v1044_v22, 0.0  ;;  %2206 = vmatprep.subr.bf16.mxu1 %v4036_v20 }
 0x368   : > { %v1103_v36 = vmax.f32 %v1046_v30, 0.0 }
 0x369   : > { %v1126_v37 = vpack.c.bf16 %v1102_v33, %v1100_v32 }
 0x36a   : > { %v1127_v38 = vpack.c.bf16 %v1103_v36, %v1101_v35  ;;  %v1049_v39 = vpop.f32.mrb[32].mxu0  ;;  %2207 = vmatpush1.bf16.msra.mxu1 %v4034_v31  ;;  %v4055_v35 = vld [vmem:[#allocation7 + $0xc0] ss:$8 sps:$4 sm:$0xff]  }
 0x36b   : > { %v1050_v41 = vadd.f32 %v1049_v39, %v4798_v28  ;;  %v1051_v42 = vpop.f32.mrb[33].mxu0  ;;  %2208 = vmatprep.subr.bf16.mxu1 %v4039_v34 }
 0x36c   : > { %v1052_v44 = vadd.f32 %v1051_v42, %v4801_v29  ;;  %v1053_v45 = vpop.f32.mrb[34].mxu0  ;;  %1604 = vmatprep.mubr.bf16.mxu1 %v1127_v38  ;;  %1717 = vmatprep.mubr.bf16.mxu0 %v1127_v38  ;;  %v4060_v38 = vld [vmem:[#allocation7 + $0xd4] ss:$8 sps:$4 sm:$0xff]  }
 0x36d   : > { %v1054_v46 = vadd.f32 %v1053_v45, %v4798_v28  ;;  %v1055_v47 = vpop.f32.mrb[35].mxu0  ;;  %1605 = vmatmul.mubr.bf16.gmra.mrb[28].mxu1 %v1126_v37  ;;  %1718 = vmatmul.mubr.bf16.gmra.mrb[60].mxu0 %v1126_v37  ;;  %v1104_v50 = vmax.f32 %v1050_v41, 0.0 }
 0x36e   : > { %v1056_v48 = vadd.f32 %v1055_v47, %v4801_v29  ;;  %2209 = vmatpush1.bf16.msra.mxu1 %v4037_v40  ;;  %v1105_v53 = vmax.f32 %v1052_v44, 0.0  ;;  %v4058_v44 = vld [vmem:[#allocation7 + $0xd0] ss:$8 sps:$4 sm:$0xff]  }
 0x36f   : > { %v1106_v51 = vmax.f32 %v1054_v46, 0.0  ;;  %2210 = vmatprep.subr.bf16.mxu1 %v4042_v43 }
 0x370   : > { %v1107_v54 = vmax.f32 %v1056_v48, 0.0 }
 0x371   : > { %v1128_v55 = vpack.c.bf16 %v1106_v51, %v1104_v50  ;;  %v4061_v51 = vld [vmem:[#allocation7 + $0xe0] ss:$8 sps:$4 sm:$0xff]  }
 0x372   : > { %v1129_v56 = vpack.c.bf16 %v1107_v54, %v1105_v53  ;;  %v1059_v58 = vpop.f32.mrb[36].mxu0  ;;  %2211 = vmatpush1.bf16.msra.mxu1 %v4040_v49  ;;  %v4069_v53 = vld [vmem:[#allocation7 + $0x104] ss:$8 sps:$4 sm:$0xff]   ;;  %v1212_v54 = vsub.s32 2, %v4786_v23 }
 0x373   : > { %v1060_v60 = vadd.f32 %v1059_v58, %v4798_v28  ;;  %v1061_v61 = vpop.f32.mrb[37].mxu0  ;;  %2212 = vmatprep.subr.bf16.mxu1 %v4045_v52  ;;  %v4066_v52 = vld [vmem:[#allocation7 + $0xf4] ss:$8 sps:$4 sm:$0xff]  }
 0x374   : > { %v1062_v63 = vadd.f32 %v1061_v61, %v4801_v29  ;;  %v1063_v0 = vpop.f32.mrb[38].mxu0  ;;  %1614 = vmatprep.mubr.bf16.mxu1 %v1129_v56  ;;  %1727 = vmatprep.mubr.bf16.mxu0 %v1129_v56  ;;  %v1216_v56 = vsub.s32 3, %v4786_v23 }
 0x375   : > { %v1064_v1 = vadd.f32 %v1063_v0, %v4798_v28  ;;  %v1065_v2 = vpop.f32.mrb[39].mxu0  ;;  %1615 = vmatmul.mubr.bf16.gmra.mrb[32].mxu1 %v1128_v55  ;;  %1728 = vmatmul.mubr.bf16.gmra.mrb[64].mxu0 %v1128_v55  ;;  %v1108_v57 = vmax.f32 %v1060_v60, 0.0  ;;  %v1200_v55 = vld [vmem:[%s5178_s9 + $0x4] sm:$0xf] }
 0x376   : > { %v1066_v3 = vadd.f32 %v1065_v2, %v4801_v29  ;;  %2213 = vmatpush1.bf16.msra.mxu1 %v4043_v59  ;;  %v1109_v7 = vmax.f32 %v1062_v63, 0.0  ;;  %v4841_v58 = vrot.slane %v1200_v55, %v4789_v24  ;;  %v4843_v59 = vrot.slane %v1200_v55, %v1212_v54  ;;  %v4115_v2 = vld [vmem:[#allocation8 + $0x40] sm:$0xff]  }
 0x377   : > { %v1110_v5 = vmax.f32 %v1064_v1, 0.0  ;;  %2214 = vmatprep.subr.bf16.mxu1 %v4048_v62  ;;  %v4846_v62 = vrot.slane %v1200_v55, %v4795_v26  ;;  %v4848_v63 = vrot.slane %v1200_v55, %v1216_v56  ;;  %3496 = vmatprep.subr.bf16.mxu0 %v4115_v2  ;;  %v4124_v56 = vld [vmem:[#allocation8 + $0x20] sm:$0xff]  }
 0x378   : > { %v1111_v8 = vmax.f32 %v1066_v3, 0.0  ;;  %v4116_v3 = vld [vmem:[#allocation8] sm:$0xff]  }
 0x379   : > { %v1130_v9 = vpack.c.bf16 %v1110_v5, %v1108_v57  ;;  %3497 = vmatpush3.bf16.msra.mxu0 %v4116_v3  ;;  %v4076_v3 = vld [vmem:[#allocation7 + $0x130] ss:$8 sps:$4 sm:$0xff]  }
 0x37a   : > { %v1131_v10 = vpack.c.bf16 %v1111_v8, %v1109_v7  ;;  %v1069_v11 = vpop.f32.mrb[40].mxu0  ;;  %2215 = vmatpush1.bf16.msra.mxu1 %v4046_v4  ;;  %v4117_v4 = vld [vmem:[#allocation8 + $0x48] sm:$0xff]  }
 0x37b   : > { %v1070_v13 = vadd.f32 %v1069_v11, %v4798_v28  ;;  %v1071_v14 = vpop.f32.mrb[41].mxu0  ;;  %2216 = vmatprep.subr.bf16.mxu1 %v4051_v6  ;;  %3498 = vmatprep.subr.bf16.mxu0 %v4117_v4 }
 0x37c   : > { %v1072_v16 = vadd.f32 %v1071_v14, %v4801_v29  ;;  %v1073_v17 = vpop.f32.mrb[42].mxu0  ;;  %1624 = vmatprep.mubr.bf16.mxu1 %v1131_v10  ;;  %1737 = vmatprep.mubr.bf16.mxu0 %v1131_v10 }
 0x37d   : > { %v1074_v18 = vadd.f32 %v1073_v17, %v4798_v28  ;;  %v1075_v19 = vpop.f32.mrb[43].mxu0  ;;  %1625 = vmatmul.mubr.bf16.gmra.mrb[36].mxu1 %v1130_v9  ;;  %1738 = vmatmul.mubr.bf16.gmra.mrb[68].mxu0 %v1130_v9  ;;  %v1112_v27 = vmax.f32 %v1070_v13, 0.0 }
 0x37e   : > { %v1076_v20 = vadd.f32 %v1075_v19, %v4801_v29  ;;  %2217 = vmatpush1.bf16.msra.mxu1 %v4049_v12  ;;  %v1113_v30 = vmax.f32 %v1072_v16, 0.0 }
 0x37f   : > { %v1114_v22 = vmax.f32 %v1074_v18, 0.0  ;;  %2218 = vmatprep.subr.bf16.mxu1 %v4054_v15  ;;  %v4118_v15 = vld [vmem:[#allocation8 + $0x8] sm:$0xff]   ;;  %v4119_v18 = vld [vmem:[#allocation8 + $0x50] sm:$0xff]  }
 0x380   : > { %v1115_v31 = vmax.f32 %v1076_v20, 0.0  ;;  %3499 = vmatpush3.bf16.msra.mxu0 %v4118_v15 }
 0x381   : > { %v1132_v32 = vpack.c.bf16 %v1114_v22, %v1112_v27  ;;  %v4072_v27 = vld [vmem:[#allocation7 + $0x114] ss:$8 sps:$4 sm:$0xff]   ;;  %3500 = vmatprep.subr.bf16.mxu0 %v4119_v18  ;;  %v4126_v18 = vld [vmem:[#allocation8 + $0x28] sm:$0xff]  }
 0x382   : > { %v1133_v33 = vpack.c.bf16 %v1115_v31, %v1113_v30  ;;  %v1079_v34 = vpop.f32.mrb[44].mxu0  ;;  %2219 = vmatpush1.bf16.msra.mxu1 %v4052_v21  ;;  %v4067_v21 = vld [vmem:[#allocation7 + $0x100] ss:$8 sps:$4 sm:$0xff]   ;;  %v4120_v30 = vld [vmem:[#allocation8 + $0x10] sm:$0xff]  }
 0x383   : > { %v1080_v36 = vadd.f32 %v1079_v34, %v4798_v28  ;;  %v1081_v37 = vpop.f32.mrb[45].mxu0  ;;  %2220 = vmatprep.subr.bf16.mxu1 %v4057_v25 }
 0x384   : > { %v1082_v39 = vadd.f32 %v1081_v37, %v4801_v29  ;;  %v1083_v40 = vpop.f32.mrb[46].mxu0  ;;  %1634 = vmatprep.mubr.bf16.mxu1 %v1133_v33  ;;  %1747 = vmatprep.mubr.bf16.mxu0 %v1133_v33  ;;  %v4121_v33 = vld [vmem:[#allocation8 + $0x58] sm:$0xff]  }
 0x385   : > { %v1084_v41 = vadd.f32 %v1083_v40, %v4798_v28  ;;  %v1085_v42 = vpop.f32.mrb[47].mxu0  ;;  %1635 = vmatmul.mubr.bf16.gmra.mrb[40].mxu1 %v1132_v32  ;;  %1748 = vmatmul.mubr.bf16.gmra.mrb[72].mxu0 %v1132_v32  ;;  %v1116_v45 = vmax.f32 %v1080_v36, 0.0  ;;  %v4063_v28 = vld [vmem:[#allocation7 + $0xe4] ss:$8 sps:$4 sm:$0xff]   ;;  %v4070_v36 = vld [vmem:[#allocation7 + $0x110] ss:$8 sps:$4 sm:$0xff]  }
 0x386   : > { %v1086_v43 = vadd.f32 %v1085_v42, %v4801_v29  ;;  %2221 = vmatpush1.bf16.msra.mxu1 %v4055_v35  ;;  %v1117_v47 = vmax.f32 %v1082_v39, 0.0  ;;  %v4064_v29 = vld [vmem:[#allocation7 + $0xf0] ss:$8 sps:$4 sm:$0xff]   ;;  %3501 = vmatpush3.bf16.msra.mxu0 %v4120_v30  ;;  %v4079_v30 = vld [vmem:[#allocation7 + $0x140] ss:$8 sps:$4 sm:$0xff]  }
 0x387   : > { %v1118_v46 = vmax.f32 %v1084_v41, 0.0  ;;  %2222 = vmatprep.subr.bf16.mxu1 %v4060_v38  ;;  %3502 = vmatprep.subr.bf16.mxu0 %v4121_v33 }
 0x388   : > { %v1119_v48 = vmax.f32 %v1086_v43, 0.0  ;;  %v4075_v43 = vld [vmem:[#allocation7 + $0x124] ss:$8 sps:$4 sm:$0xff]  }
 0x389   : > { %v1134_v49 = vpack.c.bf16 %v1118_v46, %v1116_v45 }
 0x38a   : > { %v1135_v50 = vpack.c.bf16 %v1119_v48, %v1117_v47  ;;  %2223 = vmatpush1.bf16.msra.mxu1 %v4058_v44  ;;  %v4122_v48 = vld [vmem:[#allocation8 + $0x18] sm:$0xff]  }
 0x38b   : > { %2224 = vmatprep.subr.bf16.mxu1 %v4063_v28  ;;  %v4123_v28 = vld [vmem:[#allocation8 + $0x60] sm:$0xff]   ;;  %3503 = vmatpush3.bf16.msra.mxu0 %v4122_v48 }
 0x38c   : > { %1644 = vmatprep.mubr.bf16.mxu1 %v1135_v50  ;;  %1757 = vmatprep.mubr.bf16.mxu0 %v1135_v50 }
 0x38d   : > { %1645 = vmatmul.mubr.bf16.gmra.mrb[44].mxu1 %v1134_v49  ;;  %1758 = vmatmul.mubr.bf16.gmra.mrb[76].mxu0 %v1134_v49 }
 0x38e   : > { %2225 = vmatpush1.bf16.msra.mxu1 %v4061_v51  ;;  %3504 = vmatprep.subr.bf16.mxu0 %v4123_v28  ;;  %v4087_v28 = vld [vmem:[#allocation7 + $0x164] ss:$8 sps:$4 sm:$0xff]  }
 0x38f   : > { %2226 = vmatprep.subr.bf16.mxu1 %v4066_v52  ;;  %3505 = vmatpush3.bf16.msra.mxu0 %v4124_v56 }
 0x392   : > { %2227 = vmatpush1.bf16.msra.mxu1 %v4064_v29  ;;  %v4073_v29 = vld [vmem:[#allocation7 + $0x120] ss:$8 sps:$4 sm:$0xff]  }
 0x393   : > { %2309 = vmatprep.subr.bf16.mxu1 %v4069_v53  ;;  %v4078_v53 = vld [vmem:[#allocation7 + $0x134] ss:$8 sps:$4 sm:$0xff]  }
 0x428   : > { %v1576_v60 = vpop.f32.mrb[16].mxu1  ;;  %v1689_v61 = vpop.f32.mrb[48].mxu0 }
 0x429   : > { %v1578_v0 = vpop.f32.mrb[17].mxu1  ;;  %v1691_v1 = vpop.f32.mrb[49].mxu0  ;;  %v1577_v23 = vadd.f32 %v1576_v60, %v4841_v58  ;;  %v4852_v6 = vadd.f32 %v1689_v61, %v4843_v59 }
 0x42a   : > { %v1580_v57 = vpop.f32.mrb[18].mxu1  ;;  %v1693_v5 = vpop.f32.mrb[50].mxu0  ;;  %v1579_v11 = vadd.f32 %v1578_v0, %v4846_v62  ;;  %v4860_v12 = vadd.f32 %v1691_v1, %v4848_v63  ;;  %v4125_v0 = vld [vmem:[#allocation8 + $0x68] sm:$0xff]  }
 0x42b   : > { %v1581_v7 = vadd.f32 %v1580_v57, %v4841_v58  ;;  %v4856_v8 = vadd.f32 %v1693_v5, %v4843_v59  ;;  %v1582_v9 = vpop.f32.mrb[19].mxu1  ;;  %v1695_v10 = vpop.f32.mrb[51].mxu0  ;;  %3506 = vmatprep.subr.bf16.mxu0 %v4125_v0  ;;  %v4085_v0 = vld [vmem:[#allocation7 + $0x160] ss:$8 sps:$4 sm:$0xff]  }
 0x42c   : > { %v1583_v13 = vadd.f32 %v1582_v9, %v4846_v62  ;;  %v4864_v14 = vadd.f32 %v1695_v10, %v4848_v63  ;;  %v4081_v10 = vld [vmem:[#allocation7 + $0x144] ss:$8 sps:$4 sm:$0xff]   ;;  %3507 = vmatpush3.bf16.msra.mxu0 %v4126_v18 }
 0x42d   : > { %v1768_v16 = vpack.c.bf16 %v1581_v7, %v1577_v23  ;;  %v1770_v17 = vpack.c.bf16 %v4856_v8, %v4852_v6  ;;  %v4130_v6 = vld [vmem:[#allocation8 + $0x38] sm:$0xff]   ;;  %v4131_v8 = vld [vmem:[#allocation10] sm:$0xff]  }
 0x42e   : > { %v1769_v19 = vpack.c.bf16 %v1583_v13, %v1579_v11  ;;  %v1771_v20 = vpack.c.bf16 %v4864_v14, %v4860_v12  ;;  %v1864_v12 = vld [vmem:[%s5178_s9 + $0x8] sm:$0x3] }
 0x42f   : > { %v5032_v14 = vrot.slane %v1864_v12, %v4789_v24 }
 0x430   : > { %v1586_v22 = vpop.f32.mrb[20].mxu1  ;;  %v1699_v25 = vpop.f32.mrb[52].mxu0  ;;  %2228 = vmatprep.mubr.bf16.mxu1 %v1769_v19 }
 0x431   : > { %v1588_v31 = vpop.f32.mrb[21].mxu1  ;;  %v1701_v32 = vpop.f32.mrb[53].mxu0  ;;  %2229 = vmatmul.mubr.bf16.vlgmr.msra.gmra.mrb[48].mxu1 %v1768_v16  ;;  %v1587_v37 = vadd.f32 %v1586_v22, %v4841_v58  ;;  %v4872_v38 = vadd.f32 %v1699_v25, %v4843_v59 }
 0x432   : > { %2310 = vmatpush1.bf16.msra.mxu1 %v4067_v21  ;;  %v1590_v34 = vpop.f32.mrb[22].mxu1  ;;  %v1703_v35 = vpop.f32.mrb[54].mxu0  ;;  %v1589_v44 = vadd.f32 %v1588_v31, %v4846_v62  ;;  %v4880_v45 = vadd.f32 %v1701_v32, %v4848_v63  ;;  %v4084_v31 = vld [vmem:[#allocation7 + $0x154] ss:$8 sps:$4 sm:$0xff]  }
 0x433   : > { %v1591_v39 = vadd.f32 %v1590_v34, %v4841_v58  ;;  %v4876_v40 = vadd.f32 %v1703_v35, %v4843_v59  ;;  %v1592_v41 = vpop.f32.mrb[23].mxu1  ;;  %v1705_v42 = vpop.f32.mrb[55].mxu0  ;;  %2311 = vmatprep.subr.bf16.mxu1 %v4072_v27  ;;  %v4127_v27 = vld [vmem:[#allocation8 + $0x70] sm:$0xff]  }
 0x434   : > { %v1593_v46 = vadd.f32 %v1592_v41, %v4846_v62  ;;  %v4884_v47 = vadd.f32 %v1705_v42, %v4848_v63  ;;  %v4128_v34 = vld [vmem:[#allocation8 + $0x30] sm:$0xff]   ;;  %3508 = vmatprep.subr.bf16.mxu0 %v4127_v27 }
 0x435   : > { %v1772_v49 = vpack.c.bf16 %v1591_v39, %v1587_v37  ;;  %v1774_v50 = vpack.c.bf16 %v4876_v40, %v4872_v38  ;;  %v4082_v41 = vld [vmem:[#allocation7 + $0x150] ss:$8 sps:$4 sm:$0xff]   ;;  %3509 = vmatpush3.bf16.msra.mxu0 %v4128_v34 }
 0x436   : > { %v1773_v51 = vpack.c.bf16 %v1593_v46, %v1589_v44  ;;  %v1775_v52 = vpack.c.bf16 %v4884_v47, %v4880_v45  ;;  %2312 = vmatpush1.bf16.msra.mxu1 %v4070_v36 }
 0x437   : > { %2313 = vmatprep.subr.bf16.mxu1 %v4075_v43 }
 0x438   : > { %v1596_v54 = vpop.f32.mrb[24].mxu1  ;;  %v1709_v55 = vpop.f32.mrb[56].mxu0  ;;  %2238 = vmatprep.mubr.bf16.mxu1 %v1773_v51 }
 0x439   : > { %v1598_v60 = vpop.f32.mrb[25].mxu1  ;;  %v1711_v61 = vpop.f32.mrb[57].mxu0  ;;  %2239 = vmatmul.mubr.bf16.gmra.mrb[52].mxu1 %v1772_v49  ;;  %v1597_v4 = vadd.f32 %v1596_v54, %v4841_v58  ;;  %v4892_v57 = vadd.f32 %v1709_v55, %v4843_v59 }
 0x43a   : > { %2314 = vmatpush1.bf16.msra.mxu1 %v4073_v29  ;;  %v1600_v1 = vpop.f32.mrb[26].mxu1  ;;  %v1713_v2 = vpop.f32.mrb[58].mxu0  ;;  %v1599_v11 = vadd.f32 %v1598_v60, %v4846_v62  ;;  %v4900_v13 = vadd.f32 %v1711_v61, %v4848_v63 }
 0x43b   : > { %v1601_v5 = vadd.f32 %v1600_v1, %v4841_v58  ;;  %v4896_v23 = vadd.f32 %v1713_v2, %v4843_v59  ;;  %v1602_v7 = vpop.f32.mrb[27].mxu1  ;;  %v1715_v9 = vpop.f32.mrb[59].mxu0  ;;  %2315 = vmatprep.subr.bf16.mxu1 %v4078_v53  ;;  %v4090_v1 = vld [vmem:[#allocation7 + $0x174] ss:$8 sps:$4 sm:$0xff]  }
 0x43c   : > { %v1603_v15 = vadd.f32 %v1602_v7, %v4846_v62  ;;  %v4904_v16 = vadd.f32 %v1715_v9, %v4848_v63 }
 0x43d   : > { %v1776_v19 = vpack.c.bf16 %v1601_v5, %v1597_v4  ;;  %v1778_v21 = vpack.c.bf16 %v4896_v23, %v4892_v57 }
 0x43e   : > { %v1777_v22 = vpack.c.bf16 %v1603_v15, %v1599_v11  ;;  %v1779_v25 = vpack.c.bf16 %v4904_v16, %v4900_v13  ;;  %2316 = vmatpush1.bf16.msra.mxu1 %v4076_v3 }
 0x43f   : > { %2317 = vmatprep.subr.bf16.mxu1 %v4081_v10  ;;  %v4088_v10 = vld [vmem:[#allocation7 + $0x170] ss:$8 sps:$4 sm:$0xff]  }
 0x440   : > { %v1606_v32 = vpop.f32.mrb[28].mxu1  ;;  %v1719_v33 = vpop.f32.mrb[60].mxu0  ;;  %2248 = vmatprep.mubr.bf16.mxu1 %v1777_v22 }
 0x441   : > { %v1608_v35 = vpop.f32.mrb[29].mxu1  ;;  %v1721_v36 = vpop.f32.mrb[61].mxu0  ;;  %2249 = vmatmul.mubr.bf16.gmra.mrb[56].mxu1 %v1776_v19  ;;  %v1607_v42 = vadd.f32 %v1606_v32, %v4841_v58  ;;  %v4912_v43 = vadd.f32 %v1719_v33, %v4843_v59 }
 0x442   : > { %2318 = vmatpush1.bf16.msra.mxu1 %v4079_v30  ;;  %v1610_v37 = vpop.f32.mrb[30].mxu1  ;;  %v1723_v39 = vpop.f32.mrb[62].mxu0  ;;  %v1609_v51 = vadd.f32 %v1608_v35, %v4846_v62  ;;  %v4920_v29 = vadd.f32 %v1721_v36, %v4848_v63  ;;  %v4093_v30 = vld [vmem:[#allocation7 + $0x184] ss:$8 sps:$4 sm:$0xff]  }
 0x443   : > { %v1611_v44 = vadd.f32 %v1610_v37, %v4841_v58  ;;  %v4916_v46 = vadd.f32 %v1723_v39, %v4843_v59  ;;  %v1612_v48 = vpop.f32.mrb[31].mxu1  ;;  %v1725_v49 = vpop.f32.mrb[63].mxu0  ;;  %2319 = vmatprep.subr.bf16.mxu1 %v4084_v31 }
 0x444   : > { %v1613_v53 = vadd.f32 %v1612_v48, %v4846_v62  ;;  %v4924_v54 = vadd.f32 %v1725_v49, %v4848_v63 }
 0x445   : > { %v1780_v55 = vpack.c.bf16 %v1611_v44, %v1607_v42  ;;  %v1782_v56 = vpack.c.bf16 %v4916_v46, %v4912_v43  ;;  %v4096_v42 = vld [vmem:[#allocation7 + $0x194] ss:$8 sps:$4 sm:$0xff]  }
 0x446   : > { %v1781_v60 = vpack.c.bf16 %v1613_v53, %v1609_v51  ;;  %v1783_v61 = vpack.c.bf16 %v4924_v54, %v4920_v29  ;;  %2320 = vmatpush1.bf16.msra.mxu1 %v4082_v41  ;;  %v4091_v41 = vld [vmem:[#allocation7 + $0x180] ss:$8 sps:$4 sm:$0xff]  }
 0x447   : > { %2321 = vmatprep.subr.bf16.mxu1 %v4087_v28  ;;  %v4132_v29 = vld [vmem:[#allocation10 + $0x8] sm:$0xff]  }
 0x448   : > { %v1616_v2 = vpop.f32.mrb[32].mxu1  ;;  %v1729_v3 = vpop.f32.mrb[64].mxu0  ;;  %2258 = vmatprep.mubr.bf16.mxu1 %v1781_v60 }
 0x449   : > { %v1618_v4 = vpop.f32.mrb[33].mxu1  ;;  %v1731_v5 = vpop.f32.mrb[65].mxu0  ;;  %2259 = vmatmul.mubr.bf16.gmra.mrb[60].mxu1 %v1780_v55  ;;  %v1617_v11 = vadd.f32 %v1616_v2, %v4841_v58  ;;  %v4932_v15 = vadd.f32 %v1729_v3, %v4843_v59  ;;  %v4094_v55 = vld [vmem:[#allocation7 + $0x190] ss:$8 sps:$4 sm:$0xff]  }
 0x44a   : > { %2322 = vmatpush1.bf16.msra.mxu1 %v4085_v0  ;;  %v1620_v7 = vpop.f32.mrb[34].mxu1  ;;  %v1733_v9 = vpop.f32.mrb[66].mxu0  ;;  %v1619_v31 = vadd.f32 %v1618_v4, %v4846_v62  ;;  %v4940_v32 = vadd.f32 %v1731_v5, %v4848_v63  ;;  %v4099_v5 = vld [vmem:[#allocation7 + $0x1a4] ss:$8 sps:$4 sm:$0xff]  }
 0x44b   : > { %v1621_v18 = vadd.f32 %v1620_v7, %v4841_v58  ;;  %v4936_v19 = vadd.f32 %v1733_v9, %v4843_v59  ;;  %v1622_v27 = vpop.f32.mrb[35].mxu1  ;;  %v1735_v22 = vpop.f32.mrb[67].mxu0  ;;  %2323 = vmatprep.subr.bf16.mxu1 %v4090_v1 }
 0x44c   : > { %v1623_v33 = vadd.f32 %v1622_v27, %v4846_v62  ;;  %v4944_v34 = vadd.f32 %v1735_v22, %v4848_v63 }
 0x44d   : > { %v1784_v35 = vpack.c.bf16 %v1621_v18, %v1617_v11  ;;  %v1786_v36 = vpack.c.bf16 %v4936_v19, %v4932_v15 }
 0x44e   : > { %v1785_v37 = vpack.c.bf16 %v1623_v33, %v1619_v31  ;;  %v1787_v39 = vpack.c.bf16 %v4944_v34, %v4940_v32  ;;  %2324 = vmatpush1.bf16.msra.mxu1 %v4088_v10  ;;  %v4097_v31 = vld [vmem:[#allocation7 + $0x1a0] ss:$8 sps:$4 sm:$0xff]   ;;  %v4102_v33 = vld [vmem:[#allocation7 + $0x1b4] ss:$8 sps:$4 sm:$0xff]  }
 0x44f   : > { %2325 = vmatprep.subr.bf16.mxu1 %v4093_v30 }
 0x450   : > { %v1626_v44 = vpop.f32.mrb[36].mxu1  ;;  %v1739_v48 = vpop.f32.mrb[68].mxu0  ;;  %2268 = vmatprep.mubr.bf16.mxu1 %v1785_v37 }
 0x451   : > { %v1628_v49 = vpop.f32.mrb[37].mxu1  ;;  %v1741_v28 = vpop.f32.mrb[69].mxu0  ;;  %2269 = vmatmul.mubr.bf16.gmra.mrb[64].mxu1 %v1784_v35  ;;  %v1627_v60 = vadd.f32 %v1626_v44, %v4841_v58  ;;  %v4952_v0 = vadd.f32 %v1739_v48, %v4843_v59 }
 0x452   : > { %2326 = vmatpush1.bf16.msra.mxu1 %v4091_v41  ;;  %v1630_v51 = vpop.f32.mrb[38].mxu1  ;;  %v1743_v53 = vpop.f32.mrb[70].mxu0  ;;  %v1629_v7 = vadd.f32 %v1628_v49, %v4846_v62  ;;  %v4960_v9 = vadd.f32 %v1741_v28, %v4848_v63  ;;  %v4100_v49 = vld [vmem:[#allocation7 + $0x1b0] ss:$8 sps:$4 sm:$0xff]  }
 0x453   : > { %v1631_v1 = vadd.f32 %v1630_v51, %v4841_v58  ;;  %v4956_v2 = vadd.f32 %v1743_v53, %v4843_v59  ;;  %v1632_v3 = vpop.f32.mrb[39].mxu1  ;;  %v1745_v4 = vpop.f32.mrb[71].mxu0  ;;  %2327 = vmatprep.subr.bf16.mxu1 %v4096_v42 }
 0x454   : > { %v1633_v10 = vadd.f32 %v1632_v3, %v4846_v62  ;;  %v4964_v11 = vadd.f32 %v1745_v4, %v4848_v63  ;;  %v4105_v3 = vld [vmem:[#allocation7 + $0x1c4] ss:$8 sps:$4 sm:$0xff]  }
 0x455   : > { %v1788_v18 = vpack.c.bf16 %v1631_v1, %v1627_v60 }
 0x456   : > { %v1789_v22 = vpack.c.bf16 %v1633_v10, %v1629_v7  ;;  %v1791_v30 = vpack.c.bf16 %v4964_v11, %v4960_v9  ;;  %2328 = vmatpush1.bf16.msra.mxu1 %v4094_v55 }
 0x457   : > { %2329 = vmatprep.subr.bf16.mxu1 %v4099_v5 }
 0x458   : > { %v1636_v35 = vpop.f32.mrb[40].mxu1  ;;  %v1749_v37 = vpop.f32.mrb[72].mxu0  ;;  %2278 = vmatprep.mubr.bf16.mxu1 %v1789_v22 }
 0x459   : > { %v1638_v41 = vpop.f32.mrb[41].mxu1  ;;  %v1751_v42 = vpop.f32.mrb[73].mxu0  ;;  %2279 = vmatmul.mubr.bf16.gmra.mrb[68].mxu1 %v1788_v18  ;;  %v1637_v28 = vadd.f32 %v1636_v35, %v4841_v58  ;;  %v4972_v51 = vadd.f32 %v1749_v37, %v4843_v59  ;;  %v4103_v37 = vld [vmem:[#allocation7 + $0x1c0] ss:$8 sps:$4 sm:$0xff]  }
 0x45a   : > { %2330 = vmatpush1.bf16.msra.mxu1 %v4097_v31  ;;  %v1640_v44 = vpop.f32.mrb[42].mxu1  ;;  %v1753_v48 = vpop.f32.mrb[74].mxu0  ;;  %v1639_v4 = vadd.f32 %v1638_v41, %v4846_v62  ;;  %v1752_v5 = vadd.f32 %v1751_v42, %v4848_v63 }
 0x45b   : > { %v1641_v53 = vadd.f32 %v1640_v44, %v4841_v58  ;;  %v4976_v55 = vadd.f32 %v1753_v48, %v4843_v59  ;;  %v1642_v60 = vpop.f32.mrb[43].mxu1  ;;  %v1755_v1 = vpop.f32.mrb[75].mxu0  ;;  %2331 = vmatprep.subr.bf16.mxu1 %v4102_v33  ;;  %v4108_v44 = vld [vmem:[#allocation7 + $0x1d4] ss:$8 sps:$4 sm:$0xff]  }
 0x45c   : > { %v1643_v7 = vadd.f32 %v1642_v60, %v4846_v62  ;;  %v1756_v10 = vadd.f32 %v1755_v1, %v4848_v63  ;;  %v4106_v1 = vld [vmem:[#allocation7 + $0x1d0] ss:$8 sps:$4 sm:$0xff]  }
 0x45d   : > { %v1792_v18 = vpack.c.bf16 %v1641_v53, %v1637_v28  ;;  %v1794_v22 = vpack.c.bf16 %v4976_v55, %v4972_v51 }
 0x45e   : > { %v1793_v31 = vpack.c.bf16 %v1643_v7, %v1639_v4  ;;  %v1795_v35 = vpack.c.bf16 %v1756_v10, %v1752_v5  ;;  %2332 = vmatpush1.bf16.msra.mxu1 %v4100_v49  ;;  %v4111_v4 = vld [vmem:[#allocation7 + $0x1e4] ss:$8 sps:$4 sm:$0xff]  }
 0x45f   : > { %2333 = vmatprep.subr.bf16.mxu1 %v4105_v3 }
 0x460   : > { %v1646_v33 = vpop.f32.mrb[44].mxu1  ;;  %v1759_v48 = vpop.f32.mrb[76].mxu0  ;;  %2288 = vmatprep.mubr.bf16.mxu1 %v1793_v31 }
 0x461   : > { %v1648_v41 = vpop.f32.mrb[45].mxu1  ;;  %v1761_v27 = vpop.f32.mrb[77].mxu0  ;;  %2289 = vmatmul.mubr.bf16.gmra.mrb[72].mxu1 %v1792_v18  ;;  %v1647_v28 = vadd.f32 %v1646_v33, %v4841_v58  ;;  %v1760_v51 = vadd.f32 %v1759_v48, %v4843_v59 }
 0x462   : > { %2334 = vmatpush1.bf16.msra.mxu1 %v4103_v37  ;;  %v1650_v42 = vpop.f32.mrb[46].mxu1  ;;  %v1763_v60 = vpop.f32.mrb[78].mxu0  ;;  %v1649_v5 = vadd.f32 %v1648_v41, %v4846_v62  ;;  %v1762_v7 = vadd.f32 %v1761_v27, %v4848_v63  ;;  %v4112_v27 = vld [vmem:[#allocation7 + $0x1f0] ss:$8 sps:$4 sm:$0xff]  }
 0x463   : > { %v1651_v53 = vadd.f32 %v1650_v42, %v4841_v58  ;;  %v1764_v49 = vadd.f32 %v1763_v60, %v4843_v59  ;;  %v1652_v55 = vpop.f32.mrb[47].mxu1  ;;  %v1765_v3 = vpop.f32.mrb[79].mxu0  ;;  %2335 = vmatprep.subr.bf16.mxu1 %v4108_v44  ;;  %v4109_v58 = vld [vmem:[#allocation7 + $0x1e0] ss:$8 sps:$4 sm:$0xff]   ;;  %v4114_v59 = vld [vmem:[#allocation7 + $0x1f4] ss:$8 sps:$4 sm:$0xff]  }
 0x464   : > { %v1653_v10 = vadd.f32 %v1652_v55, %v4846_v62  ;;  %v1766_v18 = vadd.f32 %v1765_v3, %v4848_v63  ;;  %v5214_v62 = vpack.c.bf16 %v4956_v2, %v4952_v0  ;;  %v4129_v63 = vld [vmem:[#allocation8 + $0x78] sm:$0xff]  }
 0x465   : > { %v1796_v31 = vpack.c.bf16 %v1651_v53, %v1647_v28  ;;  %v1798_v37 = vpack.c.bf16 %v1764_v49, %v1760_v51  ;;  %3510 = vmatprep.subr.bf16.mxu0 %v4129_v63 }
 0x466   : > { %v1797_v33 = vpack.c.bf16 %v1653_v10, %v1649_v5  ;;  %v1799_v48 = vpack.c.bf16 %v1766_v18, %v1762_v7  ;;  %2336 = vmatpush1.bf16.msra.mxu1 %v4106_v1  ;;  %3511 = vmatpush3.bf16.msra.mxu0 %v4130_v6 }
 0x467   : > { %2337 = vmatprep.subr.bf16.mxu1 %v4111_v4  ;;  %3644 = vmatprep.subr.bf16.mxu0 %v4131_v8 }
 0x468   : > { %2298 = vmatprep.mubr.bf16.mxu1 %v1797_v33 }
 0x469   : > { %2299 = vmatmul.mubr.bf16.gmra.mrb[76].mxu1 %v1796_v31 }
 0x46a   : > { %2338 = vmatpush1.bf16.msra.mxu1 %v4109_v58  ;;  %2341 = vmatprep.mubr.bf16.mxu1 %v1771_v20 }
 0x46b   : > { %2339 = vmatprep.subr.bf16.mxu1 %v4114_v59 }
 0x46e   : > { %2340 = vmatpush1.bf16.msra.mxu1 %v4112_v27 }
 0x471   : > { %2342 = vmatmul.mubr.bf16.vlgmr.msra.gmra.mrb[48].mxu1 %v1770_v17  ;;  %v5035_v17 = vrot.slane %v1864_v12, %v4795_v26 }
 0x472   : > { %2351 = vmatprep.mubr.bf16.mxu1 %v1775_v52 }
 0x479   : > { %2352 = vmatmul.mubr.bf16.gmra.mrb[52].mxu1 %v1774_v50 }
 0x47a   : > { %2361 = vmatprep.mubr.bf16.mxu1 %v1779_v25 }
 0x481   : > { %2362 = vmatmul.mubr.bf16.gmra.mrb[56].mxu1 %v1778_v21 }
 0x482   : > { %2371 = vmatprep.mubr.bf16.mxu1 %v1783_v61 }
 0x489   : > { %2372 = vmatmul.mubr.bf16.gmra.mrb[60].mxu1 %v1782_v56 }
 0x48a   : > { %2381 = vmatprep.mubr.bf16.mxu1 %v1787_v39 }
 0x491   : > { %2382 = vmatmul.mubr.bf16.gmra.mrb[64].mxu1 %v1786_v36  ;;  %v4133_v36 = vld [vmem:[#allocation10 + $0x10] sm:$0xff]  }
 0x492   : > { %2391 = vmatprep.mubr.bf16.mxu1 %v1791_v30 }
 0x499   : > { %2392 = vmatmul.mubr.bf16.gmra.mrb[68].mxu1 %v5214_v62 }
 0x49a   : > { %2401 = vmatprep.mubr.bf16.mxu1 %v1795_v35 }
 0x4a1   : > { %2402 = vmatmul.mubr.bf16.gmra.mrb[72].mxu1 %v1794_v22 }
 0x4a2   : > { %2411 = vmatprep.mubr.bf16.mxu1 %v1799_v48 }
 0x4a9   : > { %2412 = vmatmul.mubr.bf16.gmra.mrb[76].mxu1 %v1798_v37 }
 0x544   : > { %v2343_v20 = vpop.f32.mrb[48].mxu1 }
 0x545   : > { %v3708_v38 = vadd.f32 %v2343_v20, %v5032_v14  ;;  %v2345_v40 = vpop.f32.mrb[49].mxu1 }
 0x546   : > { %v3709_v45 = vadd.f32 %v2345_v40, %v5035_v17  ;;  %v2347_v47 = vpop.f32.mrb[50].mxu1 }
 0x547   : > { %v3710_v50 = vadd.f32 %v2347_v47, %v5032_v14  ;;  %v2349_v52 = vpop.f32.mrb[51].mxu1  ;;  %v2422_v23 = vmax.f32 %v3708_v38, 0.0 }
 0x548   : > { %v3711_v57 = vadd.f32 %v2349_v52, %v5035_v17  ;;  %v2423_v16 = vmax.f32 %v3709_v45, 0.0 }
 0x549   : > { %v2424_v13 = vmax.f32 %v3710_v50, 0.0 }
 0x54a   : > { %v2425_v24 = vmax.f32 %v3711_v57, 0.0 }
 0x54b   : > { %v2454_v21 = vpack.c.bf16 %v2424_v13, %v2422_v23 }
 0x54c   : > { %v2455_v25 = vpack.c.bf16 %v2425_v24, %v2423_v16  ;;  %v2353_v26 = vpop.f32.mrb[52].mxu1 }
 0x54d   : > { %v3712_v43 = vadd.f32 %v2353_v26, %v5032_v14  ;;  %v2355_v46 = vpop.f32.mrb[53].mxu1 }
 0x54e   : > { %v3713_v54 = vadd.f32 %v2355_v46, %v5035_v17  ;;  %v2357_v56 = vpop.f32.mrb[54].mxu1  ;;  %2637 = vmatprep.mubr.bf16.mxu0 %v2455_v25 }
 0x54f   : > { %v3714_v61 = vadd.f32 %v2357_v56, %v5032_v14  ;;  %v2359_v15 = vpop.f32.mrb[55].mxu1  ;;  %2638 = vmatmul.mubr.bf16.vlgmr.msra.gmra.mrb[80].mxu0 %v2454_v21  ;;  %v2426_v32 = vmax.f32 %v3712_v43, 0.0 }
 0x550   : > { %v3715_v19 = vadd.f32 %v2359_v15, %v5035_v17  ;;  %3645 = vmatpush3.bf16.msra.mxu0 %v4131_v8  ;;  %v2427_v39 = vmax.f32 %v3713_v54, 0.0 }
 0x551   : > { %v2428_v34 = vmax.f32 %v3714_v61, 0.0  ;;  %3646 = vmatprep.subr.bf16.mxu0 %v4132_v29 }
 0x552   : > { %v2429_v0 = vmax.f32 %v3715_v19, 0.0 }
 0x553   : > { %v2456_v2 = vpack.c.bf16 %v2428_v34, %v2426_v32 }
 0x554   : > { %v2457_v9 = vpack.c.bf16 %v2429_v0, %v2427_v39  ;;  %v2363_v11 = vpop.f32.mrb[56].mxu1  ;;  %3647 = vmatpush3.bf16.msra.mxu0 %v4132_v29 }
 0x555   : > { %v3716_v30 = vadd.f32 %v2363_v11, %v5032_v14  ;;  %v2365_v22 = vpop.f32.mrb[57].mxu1  ;;  %3648 = vmatprep.subr.bf16.mxu0 %v4133_v36 }
 0x556   : > { %v3717_v35 = vadd.f32 %v2365_v22, %v5035_v17  ;;  %v2367_v44 = vpop.f32.mrb[58].mxu1  ;;  %2645 = vmatprep.mubr.bf16.mxu0 %v2457_v9 }
 0x557   : > { %v3718_v41 = vadd.f32 %v2367_v44, %v5032_v14  ;;  %v2369_v42 = vpop.f32.mrb[59].mxu1  ;;  %2646 = vmatmul.mubr.bf16.gmra.mrb[84].mxu0 %v2456_v2  ;;  %v2430_v1 = vmax.f32 %v3716_v30, 0.0 }
 0x558   : > { %v3719_v60 = vadd.f32 %v2369_v42, %v5035_v17  ;;  %3649 = vmatpush3.bf16.msra.mxu0 %v4133_v36  ;;  %v2431_v51 = vmax.f32 %v3717_v35, 0.0 }
 0x559   : > { %v2432_v28 = vmax.f32 %v3718_v41, 0.0 }
 0x55a   : > { %v2433_v53 = vmax.f32 %v3719_v60, 0.0 }
 0x55b   : > { %v2458_v49 = vpack.c.bf16 %v2432_v28, %v2430_v1 }
 0x55c   : > { %v2459_v55 = vpack.c.bf16 %v2433_v53, %v2431_v51  ;;  %v2373_v3 = vpop.f32.mrb[60].mxu1 }
 0x55d   : > { %v3720_v4 = vadd.f32 %v2373_v3, %v5032_v14  ;;  %v2375_v5 = vpop.f32.mrb[61].mxu1 }
 0x55e   : > { %v3721_v7 = vadd.f32 %v2375_v5, %v5035_v17  ;;  %v2377_v10 = vpop.f32.mrb[62].mxu1  ;;  %2653 = vmatprep.mubr.bf16.mxu0 %v2459_v55 }
 0x55f   : > { %v3722_v18 = vadd.f32 %v2377_v10, %v5032_v14  ;;  %v2379_v31 = vpop.f32.mrb[63].mxu1  ;;  %2654 = vmatmul.mubr.bf16.gmra.mrb[88].mxu0 %v2458_v49  ;;  %v2434_v33 = vmax.f32 %v3720_v4, 0.0 }
 0x560   : > { %v3723_v37 = vadd.f32 %v2379_v31, %v5035_v17  ;;  %v2435_v58 = vmax.f32 %v3721_v7, 0.0 }
 0x561   : > { %v2436_v48 = vmax.f32 %v3722_v18, 0.0 }
 0x562   : > { %v2437_v59 = vmax.f32 %v3723_v37, 0.0 }
 0x563   : > { %v2460_v27 = vpack.c.bf16 %v2436_v48, %v2434_v33  ;;  %v4134_v33 = vld [vmem:[#allocation10 + $0x18] sm:$0xff]   ;;  %v4135_v48 = vld [vmem:[#allocation10 + $0x20] sm:$0xff]  }
 0x564   : > { %v2461_v62 = vpack.c.bf16 %v2437_v59, %v2435_v58  ;;  %v2383_v63 = vpop.f32.mrb[64].mxu1  ;;  %3650 = vmatprep.subr.bf16.mxu0 %v4134_v33  ;;  %v4136_v58 = vld [vmem:[#allocation10 + $0x28] sm:$0xff]   ;;  %v4139_v59 = vld [vmem:[#allocation11] sm:$0xff]  }
 0x565   : > { %v3724_v6 = vadd.f32 %v2383_v63, %v5032_v14  ;;  %v2385_v8 = vpop.f32.mrb[65].mxu1  ;;  %3651 = vmatpush3.bf16.msra.mxu0 %v4134_v33 }
 0x566   : > { %v3725_v12 = vadd.f32 %v2385_v8, %v5035_v17  ;;  %v2387_v20 = vpop.f32.mrb[66].mxu1  ;;  %2661 = vmatprep.mubr.bf16.mxu0 %v2461_v62  ;;  %3652 = vmatprep.subr.bf16.mxu0 %v4135_v48  ;;  %v5072_v62 = vld [vmem:[%s5178_s9 + $0xa] ss:$0 sm:$0xff] }
 0x567   : > { %v3726_v38 = vadd.f32 %v2387_v20, %v5032_v14  ;;  %v2389_v40 = vpop.f32.mrb[67].mxu1  ;;  %2662 = vmatmul.mubr.bf16.gmra.mrb[92].mxu0 %v2460_v27  ;;  %v2438_v47 = vmax.f32 %v3724_v6, 0.0 }
 0x568   : > { %v3727_v45 = vadd.f32 %v2389_v40, %v5035_v17  ;;  %v2439_v52 = vmax.f32 %v3725_v12, 0.0 }
 0x569   : > { %v2440_v50 = vmax.f32 %v3726_v38, 0.0  ;;  %3653 = vmatpush3.bf16.msra.mxu0 %v4135_v48 }
 0x56a   : > { %v2441_v57 = vmax.f32 %v3727_v45, 0.0  ;;  %3654 = vmatprep.subr.bf16.mxu0 %v4136_v58 }
 0x56b   : > { %v2462_v23 = vpack.c.bf16 %v2440_v50, %v2438_v47 }
 0x56c   : > { %v2463_v13 = vpack.c.bf16 %v2441_v57, %v2439_v52  ;;  %v2393_v16 = vpop.f32.mrb[68].mxu1 }
 0x56d   : > { %v3728_v24 = vadd.f32 %v2393_v16, %v5032_v14  ;;  %v2395_v21 = vpop.f32.mrb[69].mxu1  ;;  %3655 = vmatpush3.bf16.msra.mxu0 %v4136_v58 }
 0x56e   : > { %v3729_v25 = vadd.f32 %v2395_v21, %v5035_v17  ;;  %v2397_v26 = vpop.f32.mrb[70].mxu1  ;;  %2669 = vmatprep.mubr.bf16.mxu0 %v2463_v13 }
 0x56f   : > { %v3730_v43 = vadd.f32 %v2397_v26, %v5032_v14  ;;  %v2399_v46 = vpop.f32.mrb[71].mxu1  ;;  %2670 = vmatmul.mubr.bf16.gmra.mrb[96].mxu0 %v2462_v23  ;;  %v2442_v54 = vmax.f32 %v3728_v24, 0.0 }
 0x570   : > { %v3731_v29 = vadd.f32 %v2399_v46, %v5035_v17  ;;  %v2443_v61 = vmax.f32 %v3729_v25, 0.0 }
 0x571   : > { %v2444_v56 = vmax.f32 %v3730_v43, 0.0 }
 0x572   : > { %v2445_v15 = vmax.f32 %v3731_v29, 0.0 }
 0x573   : > { %v2464_v19 = vpack.c.bf16 %v2444_v56, %v2442_v54 }
 0x574   : > { %v2465_v32 = vpack.c.bf16 %v2445_v15, %v2443_v61  ;;  %v2403_v34 = vpop.f32.mrb[72].mxu1  ;;  %v4140_v15 = vld [vmem:[#allocation11 + $0x8] sm:$0xff]  }
 0x575   : > { %v3732_v36 = vadd.f32 %v2403_v34, %v5032_v14  ;;  %v2405_v39 = vpop.f32.mrb[73].mxu1 }
 0x576   : > { %v3733_v0 = vadd.f32 %v2405_v39, %v5035_v17  ;;  %v2407_v2 = vpop.f32.mrb[74].mxu1  ;;  %2677 = vmatprep.mubr.bf16.mxu0 %v2465_v32  ;;  %v4141_v39 = vld [vmem:[#allocation11 + $0x10] sm:$0xff]  }
 0x577   : > { %v3734_v9 = vadd.f32 %v2407_v2, %v5032_v14  ;;  %v2409_v11 = vpop.f32.mrb[75].mxu1  ;;  %2678 = vmatmul.mubr.bf16.gmra.mrb[100].mxu0 %v2464_v19  ;;  %v2446_v22 = vmax.f32 %v3732_v36, 0.0 }
 0x578   : > { %v3735_v30 = vadd.f32 %v2409_v11, %v5035_v17  ;;  %v2447_v44 = vmax.f32 %v3733_v0, 0.0 }
 0x579   : > { %v2448_v35 = vmax.f32 %v3734_v9, 0.0 }
 0x57a   : > { %v2449_v41 = vmax.f32 %v3735_v30, 0.0 }
 0x57b   : > { %v2466_v42 = vpack.c.bf16 %v2448_v35, %v2446_v22 }
 0x57c   : > { %v2467_v60 = vpack.c.bf16 %v2449_v41, %v2447_v44  ;;  %v2413_v1 = vpop.f32.mrb[76].mxu1  ;;  %v4142_v44 = vld [vmem:[#allocation11 + $0x18] sm:$0xff]  }
 0x57d   : > { %v3736_v28 = vadd.f32 %v2413_v1, %v5032_v14  ;;  %v2415_v51 = vpop.f32.mrb[77].mxu1 }
 0x57e   : > { %v3737_v53 = vadd.f32 %v2415_v51, %v5035_v17  ;;  %v2417_v49 = vpop.f32.mrb[78].mxu1  ;;  %2685 = vmatprep.mubr.bf16.mxu0 %v2467_v60 }
 0x57f   : > { %v3738_v55 = vadd.f32 %v2417_v49, %v5032_v14  ;;  %v2419_v3 = vpop.f32.mrb[79].mxu1  ;;  %2686 = vmatmul.mubr.bf16.gmra.mrb[104].mxu0 %v2466_v42  ;;  %v2450_v5 = vmax.f32 %v3736_v28, 0.0  ;;  %v4137_v14 = vld [vmem:[#allocation10 + $0x30] sm:$0xff]   ;;  %v4143_v28 = vld [vmem:[#allocation11 + $0x20] sm:$0xff]  }
 0x580   : > { %v3739_v4 = vadd.f32 %v2419_v3, %v5035_v17  ;;  %v2451_v10 = vmax.f32 %v3737_v53, 0.0  ;;  %3656 = vmatprep.subr.bf16.mxu0 %v4137_v14  ;;  %v4138_v17 = vld [vmem:[#allocation10 + $0x38] sm:$0xff]  }
 0x581   : > { %v2452_v7 = vmax.f32 %v3738_v55, 0.0  ;;  %3657 = vmatpush3.bf16.msra.mxu0 %v4137_v14 }
 0x582   : > { %v2453_v18 = vmax.f32 %v3739_v4, 0.0  ;;  %3658 = vmatprep.subr.bf16.mxu0 %v4138_v17 }
 0x583   : > { %v2468_v31 = vpack.c.bf16 %v2452_v7, %v2450_v5  ;;  %v4144_v7 = vld [vmem:[#allocation11 + $0x28] sm:$0xff]  }
 0x584   : > { %v2469_v37 = vpack.c.bf16 %v2453_v18, %v2451_v10 }
 0x585   : > { %3659 = vmatpush3.bf16.msra.mxu0 %v4138_v17 }
 0x586   : > { %2693 = vmatprep.mubr.bf16.mxu0 %v2469_v37  ;;  %3676 = vmatprep.subr.bf16.mxu0 %v4139_v59 }
 0x587   : > { %2694 = vmatmul.mubr.bf16.gmra.mrb[108].mxu0 %v2468_v31 }
 0x622   : > { %v3512_v27 = vpop.f32.mrb[80].mxu0 }
 0x623   : > { %v3513_v63 = vpop.f32.mrb[81].mxu0 }
 0x624   : > { %v3514_v6 = vadd.f32 %v3513_v63, %v3512_v27  ;;  %v3515_v8 = vpop.f32.mrb[82].mxu0 }
 0x625   : > { %v3516_v12 = vpop.f32.mrb[83].mxu0 }
 0x626   : > { %v2640_v20 = vadd.f32 %v3514_v6, %v5072_v62  ;;  %v3517_v38 = vadd.f32 %v3516_v12, %v3515_v8 }
 0x628   : > { %v2643_v40 = vadd.f32 %v3517_v38, %v5072_v62  ;;  %v2702_v45 = vmax.f32 %v2640_v20, 0.0 }
 0x62a   : > { %v2703_v47 = vmax.f32 %v2643_v40, 0.0  ;;  %v3518_v50 = vpop.f32.mrb[84].mxu0 }
 0x62b   : > { %v3519_v52 = vpop.f32.mrb[85].mxu0 }
 0x62c   : > { %v3520_v57 = vadd.f32 %v3519_v52, %v3518_v50  ;;  %v3521_v23 = vpop.f32.mrb[86].mxu0  ;;  %v2718_v13 = vpack.c.bf16 %v2703_v47, %v2702_v45 }
 0x62d   : > { %v3522_v16 = vpop.f32.mrb[87].mxu0 }
 0x62e   : > { %v2648_v24 = vadd.f32 %v3520_v57, %v5072_v62  ;;  %v3523_v21 = vadd.f32 %v3522_v16, %v3521_v23  ;;  %3660 = vmatprep.mubr.bf16.mxu0 %v2718_v13 }
 0x630   : > { %v2651_v25 = vadd.f32 %v3523_v21, %v5072_v62  ;;  %v2704_v26 = vmax.f32 %v2648_v24, 0.0 }
 0x632   : > { %v2705_v43 = vmax.f32 %v2651_v25, 0.0  ;;  %v3524_v46 = vpop.f32.mrb[88].mxu0 }
 0x633   : > { %v3525_v29 = vpop.f32.mrb[89].mxu0 }
 0x634   : > { %v2719_v54 = vpack.c.bf16 %v2705_v43, %v2704_v26  ;;  %v3526_v56 = vadd.f32 %v3525_v29, %v3524_v46  ;;  %v3527_v61 = vpop.f32.mrb[90].mxu0 }
 0x635   : > { %v3528_v19 = vpop.f32.mrb[91].mxu0 }
 0x636   : > { %v2656_v32 = vadd.f32 %v3526_v56, %v5072_v62  ;;  %v3529_v34 = vadd.f32 %v3528_v19, %v3527_v61  ;;  %3661 = vmatmul.mubr.bf16.vlgmr.msra.gmra.mrb[112].mxu0 %v2719_v54 }
 0x637   : > { %3677 = vmatpush3.bf16.msra.mxu0 %v4139_v59 }
 0x638   : > { %v2659_v36 = vadd.f32 %v3529_v34, %v5072_v62  ;;  %3678 = vmatprep.subr.bf16.mxu0 %v4140_v15  ;;  %v2706_v0 = vmax.f32 %v2656_v32, 0.0 }
 0x63a   : > { %v2707_v2 = vmax.f32 %v2659_v36, 0.0  ;;  %v3530_v9 = vpop.f32.mrb[92].mxu0  ;;  %v4145_v36 = vld [vmem:[#allocation11 + $0x30] sm:$0xff]  }
 0x63b   : > { %v3531_v11 = vpop.f32.mrb[93].mxu0  ;;  %3679 = vmatpush3.bf16.msra.mxu0 %v4140_v15 }
 0x63c   : > { %v3532_v30 = vadd.f32 %v3531_v11, %v3530_v9  ;;  %v3533_v22 = vpop.f32.mrb[94].mxu0  ;;  %v2720_v35 = vpack.c.bf16 %v2707_v2, %v2706_v0  ;;  %3680 = vmatprep.subr.bf16.mxu0 %v4141_v39  ;;  %v3446_v0 = vld [vmem:[%s5178_s9 + $0xb] ss:$0 sm:$0xff] }
 0x63d   : > { %v3534_v41 = vpop.f32.mrb[95].mxu0 }
 0x63e   : > { %v2664_v42 = vadd.f32 %v3532_v30, %v5072_v62  ;;  %v3535_v60 = vadd.f32 %v3534_v41, %v3533_v22  ;;  %3664 = vmatprep.mubr.bf16.mxu0 %v2720_v35 }
 0x63f   : > { %3681 = vmatpush3.bf16.msra.mxu0 %v4141_v39  ;;  %v4146_v39 = vld [vmem:[#allocation11 + $0x38] sm:$0xff]  }
 0x640   : > { %v2667_v1 = vadd.f32 %v3535_v60, %v5072_v62  ;;  %3682 = vmatprep.subr.bf16.mxu0 %v4142_v44  ;;  %v2708_v51 = vmax.f32 %v2664_v42, 0.0 }
 0x642   : > { %v2709_v53 = vmax.f32 %v2667_v1, 0.0  ;;  %v3536_v49 = vpop.f32.mrb[96].mxu0 }
 0x643   : > { %v3537_v55 = vpop.f32.mrb[97].mxu0  ;;  %3683 = vmatpush3.bf16.msra.mxu0 %v4142_v44 }
 0x644   : > { %v3538_v3 = vadd.f32 %v3537_v55, %v3536_v49  ;;  %v3539_v4 = vpop.f32.mrb[98].mxu0  ;;  %v2721_v5 = vpack.c.bf16 %v2709_v53, %v2708_v51  ;;  %3684 = vmatprep.subr.bf16.mxu0 %v4143_v28 }
 0x645   : > { %v3540_v10 = vpop.f32.mrb[99].mxu0 }
 0x646   : > { %v2672_v18 = vadd.f32 %v3538_v3, %v5072_v62  ;;  %v3541_v31 = vadd.f32 %v3540_v10, %v3539_v4  ;;  %3665 = vmatmul.mubr.bf16.gmra.mrb[116].mxu0 %v2721_v5 }
 0x647   : > { %3685 = vmatpush3.bf16.msra.mxu0 %v4143_v28 }
 0x648   : > { %v2675_v37 = vadd.f32 %v3541_v31, %v5072_v62  ;;  %3686 = vmatprep.subr.bf16.mxu0 %v4144_v7  ;;  %v2710_v33 = vmax.f32 %v2672_v18, 0.0 }
 0x64a   : > { %v2711_v48 = vmax.f32 %v2675_v37, 0.0  ;;  %v3542_v58 = vpop.f32.mrb[100].mxu0 }
 0x64b   : > { %v3543_v14 = vpop.f32.mrb[101].mxu0  ;;  %3687 = vmatpush3.bf16.msra.mxu0 %v4144_v7 }
 0x64c   : > { %v3544_v17 = vadd.f32 %v3543_v14, %v3542_v58  ;;  %v3545_v59 = vpop.f32.mrb[102].mxu0  ;;  %v2722_v27 = vpack.c.bf16 %v2711_v48, %v2710_v33  ;;  %3688 = vmatprep.subr.bf16.mxu0 %v4145_v36 }
 0x64d   : > { %v3546_v63 = vpop.f32.mrb[103].mxu0 }
 0x64e   : > { %v2680_v6 = vadd.f32 %v3544_v17, %v5072_v62  ;;  %v3547_v8 = vadd.f32 %v3546_v63, %v3545_v59  ;;  %3668 = vmatprep.mubr.bf16.mxu0 %v2722_v27 }
 0x64f   : > { %3689 = vmatpush3.bf16.msra.mxu0 %v4145_v36 }
 0x650   : > { %v2683_v12 = vadd.f32 %v3547_v8, %v5072_v62  ;;  %v2712_v20 = vmax.f32 %v2680_v6, 0.0  ;;  %3690 = vmatprep.subr.bf16.mxu0 %v4146_v39 }
 0x652   : > { %v2713_v38 = vmax.f32 %v2683_v12, 0.0  ;;  %v3548_v40 = vpop.f32.mrb[104].mxu0 }
 0x653   : > { %v3549_v45 = vpop.f32.mrb[105].mxu0  ;;  %3691 = vmatpush3.bf16.msra.mxu0 %v4146_v39 }
 0x654   : > { %v3550_v47 = vadd.f32 %v3549_v45, %v3548_v40  ;;  %v3551_v50 = vpop.f32.mrb[106].mxu0  ;;  %v2723_v52 = vpack.c.bf16 %v2713_v38, %v2712_v20 }
 0x655   : > { %v3552_v57 = vpop.f32.mrb[107].mxu0 }
 0x656   : > { %v2688_v23 = vadd.f32 %v3550_v47, %v5072_v62  ;;  %v3553_v13 = vadd.f32 %v3552_v57, %v3551_v50  ;;  %3669 = vmatmul.mubr.bf16.gmra.mrb[120].mxu0 %v2723_v52 }
 0x658   : > { %v2691_v16 = vadd.f32 %v3553_v13, %v5072_v62  ;;  %v2714_v24 = vmax.f32 %v2688_v23, 0.0 }
 0x65a   : > { %v2715_v21 = vmax.f32 %v2691_v16, 0.0  ;;  %v3554_v25 = vpop.f32.mrb[108].mxu0 }
 0x65b   : > { %v3555_v26 = vpop.f32.mrb[109].mxu0 }
 0x65c   : > { %v3556_v43 = vadd.f32 %v3555_v26, %v3554_v25  ;;  %v3557_v46 = vpop.f32.mrb[110].mxu0  ;;  %v2724_v29 = vpack.c.bf16 %v2715_v21, %v2714_v24 }
 0x65d   : > { %v3558_v54 = vpop.f32.mrb[111].mxu0 }
 0x65e   : > { %v2696_v56 = vadd.f32 %v3556_v43, %v5072_v62  ;;  %v3559_v61 = vadd.f32 %v3558_v54, %v3557_v46  ;;  %3672 = vmatprep.mubr.bf16.mxu0 %v2724_v29 }
 0x660   : > { %v2699_v15 = vadd.f32 %v3559_v61, %v5072_v62  ;;  %v2716_v19 = vmax.f32 %v2696_v56, 0.0  ;;  %v3455_v61 = vld [vmem:[%s5178_s9 + $0xc] ss:$0 sm:$0xff] }
 0x662   : > { %v2717_v32 = vmax.f32 %v2699_v15, 0.0 }
 0x664   : > { %v2725_v34 = vpack.c.bf16 %v2717_v32, %v2716_v19 }
 0x666   : > { %3673 = vmatmul.mubr.bf16.gmra.mrb[124].mxu0 %v2725_v34 }
 0x709   : > { %v3662_v2 = vpop.f32.mrb[112].mxu0 }
 0x70a   : > { %v2840_v9 = vadd.f32 %v3662_v2, %v3446_v0  ;;  %v2831_v11 = vpop.f32.mrb[113].mxu0 }
 0x70b   : > { %v2832_v30 = vadd.f32 %v3446_v0, %v2831_v11  ;;  %v3663_v22 = vpop.f32.mrb[114].mxu0 }
 0x70c   : > { %v2843_v62 = vadd.f32 %v3663_v22, %v3446_v0  ;;  %v2834_v35 = vpop.f32.mrb[115].mxu0  ;;  %v2896_v41 = vmax.f32 %v2840_v9, 0.0 }
 0x70d   : > { %v2835_v44 = vadd.f32 %v3446_v0, %v2834_v35  ;;  %v2894_v60 = vmax.f32 %v2832_v30, 0.0 }
 0x70e   : > { %v2897_v42 = vmax.f32 %v2843_v62, 0.0 }
 0x70f   : > { %v2895_v1 = vmax.f32 %v2835_v44, 0.0 }
 0x710   : > { %v2911_v28 = vpack.c.bf16 %v2897_v42, %v2896_v41 }
 0x711   : > { %v2910_v51 = vpack.c.bf16 %v2895_v1, %v2894_v60 }
 0x713   : > { %3692 = vmatprep.mubr.bf16.mxu0 %v2910_v51 }
 0x714   : > { %3693 = vmatmul.mubr.bf16.vlgmr.msra.gmra.mrb[128].mxu0 %v2911_v28 }
 0x719   : > { %v3666_v53 = vpop.f32.mrb[116].mxu0 }
 0x71a   : > { %v2856_v49 = vadd.f32 %v3666_v53, %v3446_v0  ;;  %v2847_v55 = vpop.f32.mrb[117].mxu0 }
 0x71b   : > { %v2848_v3 = vadd.f32 %v3446_v0, %v2847_v55  ;;  %v3667_v4 = vpop.f32.mrb[118].mxu0 }
 0x71c   : > { %v2859_v5 = vadd.f32 %v3667_v4, %v3446_v0  ;;  %v2850_v7 = vpop.f32.mrb[119].mxu0  ;;  %v2900_v18 = vmax.f32 %v2856_v49, 0.0 }
 0x71d   : > { %v2851_v10 = vadd.f32 %v3446_v0, %v2850_v7  ;;  %v2898_v37 = vmax.f32 %v2848_v3, 0.0 }
 0x71e   : > { %v2901_v31 = vmax.f32 %v2859_v5, 0.0 }
 0x71f   : > { %v2899_v33 = vmax.f32 %v2851_v10, 0.0 }
 0x720   : > { %v2913_v48 = vpack.c.bf16 %v2901_v31, %v2900_v18 }
 0x721   : > { %v2912_v58 = vpack.c.bf16 %v2899_v33, %v2898_v37 }
 0x723   : > { %3696 = vmatprep.mubr.bf16.mxu0 %v2912_v58 }
 0x724   : > { %3697 = vmatmul.mubr.bf16.gmra.mrb[132].mxu0 %v2913_v48 }
 0x729   : > { %v3670_v14 = vpop.f32.mrb[120].mxu0 }
 0x72a   : > { %v2872_v17 = vadd.f32 %v3670_v14, %v3446_v0  ;;  %v2863_v59 = vpop.f32.mrb[121].mxu0 }
 0x72b   : > { %v2864_v27 = vadd.f32 %v3446_v0, %v2863_v59  ;;  %v3671_v63 = vpop.f32.mrb[122].mxu0 }
 0x72c   : > { %v2875_v6 = vadd.f32 %v3671_v63, %v3446_v0  ;;  %v2866_v8 = vpop.f32.mrb[123].mxu0  ;;  %v2904_v20 = vmax.f32 %v2872_v17, 0.0 }
 0x72d   : > { %v2867_v12 = vadd.f32 %v3446_v0, %v2866_v8  ;;  %v2902_v40 = vmax.f32 %v2864_v27, 0.0 }
 0x72e   : > { %v2905_v38 = vmax.f32 %v2875_v6, 0.0 }
 0x72f   : > { %v2903_v45 = vmax.f32 %v2867_v12, 0.0 }
 0x730   : > { %v2915_v47 = vpack.c.bf16 %v2905_v38, %v2904_v20 }
 0x731   : > { %v2914_v50 = vpack.c.bf16 %v2903_v45, %v2902_v40 }
 0x733   : > { %3700 = vmatprep.mubr.bf16.mxu0 %v2914_v50 }
 0x734   : > { %3701 = vmatmul.mubr.bf16.gmra.mrb[136].mxu0 %v2915_v47 }
 0x739   : > { %v3674_v52 = vpop.f32.mrb[124].mxu0 }
 0x73a   : > { %v2888_v57 = vadd.f32 %v3674_v52, %v3446_v0  ;;  %v2879_v23 = vpop.f32.mrb[125].mxu0 }
 0x73b   : > { %v2880_v13 = vadd.f32 %v3446_v0, %v2879_v23  ;;  %v3675_v16 = vpop.f32.mrb[126].mxu0 }
 0x73c   : > { %v2891_v24 = vadd.f32 %v3675_v16, %v3446_v0  ;;  %v2882_v21 = vpop.f32.mrb[127].mxu0  ;;  %v2908_v26 = vmax.f32 %v2888_v57, 0.0 }
 0x73d   : > { %v2883_v25 = vadd.f32 %v3446_v0, %v2882_v21  ;;  %v2906_v46 = vmax.f32 %v2880_v13, 0.0 }
 0x73e   : > { %v2909_v43 = vmax.f32 %v2891_v24, 0.0 }
 0x73f   : > { %v2907_v29 = vmax.f32 %v2883_v25, 0.0 }
 0x740   : > { %v2917_v54 = vpack.c.bf16 %v2909_v43, %v2908_v26 }
 0x741   : > { %v2916_v56 = vpack.c.bf16 %v2907_v29, %v2906_v46 }
 0x743   : > { %3704 = vmatprep.mubr.bf16.mxu0 %v2916_v56 }
 0x744   : > { %3705 = vmatmul.mubr.bf16.gmra.mrb[140].mxu0 %v2917_v54 }
 0x7e7   : > { %v3694_v15 = vpop.f32.mrb[128].mxu0 }
 0x7e8   : > { %v3032_v19 = vadd.f32 %v3694_v15, %v3455_v61  ;;  %v3023_v32 = vpop.f32.mrb[129].mxu0 }
 0x7e9   : > { %v3024_v34 = vadd.f32 %v3455_v61, %v3023_v32  ;;  %v3695_v36 = vpop.f32.mrb[130].mxu0 }
 0x7ea   : > { %3088 = vst [vmem:[%s5099_s13 + $0x10] sm:$0xff] %v3032_v19  ;;  %v3035_v39 = vadd.f32 %v3695_v36, %v3455_v61  ;;  %v3026_v0 = vpop.f32.mrb[131].mxu0 }
 0x7eb   : > { %3086 = vst [vmem:[%s5099_s13] sm:$0xff] %v3024_v34  ;;  %v3027_v2 = vadd.f32 %v3455_v61, %v3026_v0 }
 0x7ec   : > { %3089 = vst [vmem:[%s5099_s13 + $0x18] sm:$0xff] %v3035_v39 }
 0x7ed   : > { %3087 = vst [vmem:[%s5099_s13 + $0x8] sm:$0xff] %v3027_v2 }
 0x7f7   : > { %v3698_v9 = vpop.f32.mrb[132].mxu0 }
 0x7f8   : > { %v3048_v11 = vadd.f32 %v3698_v9, %v3455_v61  ;;  %v3039_v30 = vpop.f32.mrb[133].mxu0 }
 0x7f9   : > { %v3040_v22 = vadd.f32 %v3455_v61, %v3039_v30  ;;  %v3699_v62 = vpop.f32.mrb[134].mxu0 }
 0x7fa   : > { %3092 = vst [vmem:[%s5099_s13 + $0x30] sm:$0xff] %v3048_v11  ;;  %v3051_v35 = vadd.f32 %v3699_v62, %v3455_v61  ;;  %v3042_v44 = vpop.f32.mrb[135].mxu0 }
 0x7fb   : > { %3090 = vst [vmem:[%s5099_s13 + $0x20] sm:$0xff] %v3040_v22  ;;  %v3043_v41 = vadd.f32 %v3455_v61, %v3042_v44 }
 0x7fc   : > { %3093 = vst [vmem:[%s5099_s13 + $0x38] sm:$0xff] %v3051_v35 }
 0x7fd   : > { %3091 = vst [vmem:[%s5099_s13 + $0x28] sm:$0xff] %v3043_v41 }
 0x807   : > { %v3702_v42 = vpop.f32.mrb[136].mxu0 }
 0x808   : > { %v3064_v60 = vadd.f32 %v3702_v42, %v3455_v61  ;;  %v3055_v1 = vpop.f32.mrb[137].mxu0 }
 0x809   : > { %v3056_v28 = vadd.f32 %v3455_v61, %v3055_v1  ;;  %v3703_v51 = vpop.f32.mrb[138].mxu0 }
 0x80a   : > { %3096 = vst [vmem:[%s5099_s13 + $0x50] sm:$0xff] %v3064_v60  ;;  %v3067_v53 = vadd.f32 %v3703_v51, %v3455_v61  ;;  %v3058_v49 = vpop.f32.mrb[139].mxu0 }
 0x80b   : > { %3094 = vst [vmem:[%s5099_s13 + $0x40] sm:$0xff] %v3056_v28  ;;  %v3059_v55 = vadd.f32 %v3455_v61, %v3058_v49 }
 0x80c   : > { %3097 = vst [vmem:[%s5099_s13 + $0x58] sm:$0xff] %v3067_v53 }
 0x80d   : > { %3095 = vst [vmem:[%s5099_s13 + $0x48] sm:$0xff] %v3059_v55 }
 0x817   : > { %v3706_v3 = vpop.f32.mrb[140].mxu0 }
 0x818   : > { %v3080_v4 = vadd.f32 %v3706_v3, %v3455_v61  ;;  %v3071_v5 = vpop.f32.mrb[141].mxu0 }
 0x819   : > { %v3072_v7 = vadd.f32 %v3455_v61, %v3071_v5  ;;  %v3707_v10 = vpop.f32.mrb[142].mxu0 }
 0x81a   : > { %3100 = vst [vmem:[%s5099_s13 + $0x70] sm:$0xff] %v3080_v4  ;;  %v3083_v18 = vadd.f32 %v3707_v10, %v3455_v61  ;;  %v3074_v31 = vpop.f32.mrb[143].mxu0 }
 0x81b   : > { %3098 = vst [vmem:[%s5099_s13 + $0x60] sm:$0xff] %v3072_v7  ;;  %v3075_v37 = vadd.f32 %v3455_v61, %v3074_v31 }
 0x81c   : > { %3101 = vst [vmem:[%s5099_s13 + $0x78] sm:$0xff] %v3083_v18 }
 0x81d   : > { %3099 = vst [vmem:[%s5099_s13 + $0x68] sm:$0xff] %v3075_v37 }
 0x81e   : > { %4328 = shalt.err (!%p4325_p9)
}
 0x81f   : > { %s4329_s16 = scalar_lea.hbm %s5119_s18, 2048  ;;  %s4333_s28 = scalar_lea.hbm %s5215_s22, 4096 }
 0x820   : > { %p4330_p10 = scmp.ne.s32.totalorder %s5119_s18, %s4329_s16  ;;  %p4334_p1 = scmp.lt.u32.totalorder %s5119_s18, %s5215_s22 }
 0x821   : > { %p4335_p2 = scmp.lt.u32.totalorder %s4333_s28, %s4329_s16  ;;  %p4337_p4 = scmp.lt.u32.totalorder %s4329_s16, %s5119_s18 }
 0x822   : > { %p4331_p13 = pnand %p4330_p10, %p5216_p7 }
 0x823   : > { %p4336_p3 = por %p4335_p2, %p4334_p1 }
 0x824   : > { %p4332_p12 = pneg %p4331_p13 }
 0x825   : > { %p4338_p8 = por %p4337_p4, %p4336_p3 }
 0x827   : > { %p4339_p11 = pnand %p4338_p8, %p4332_p12 }
 0x829   : > { %4342 = shalt.err (!%p4339_p11)
}
 0x82a   : > { %s4409_s15 = smov 128   ;;  %s4410_s13 = smov 8  }
 0x82b   : > { %3796 = dma.vmem_to_hbm [thread:$0]  (%p5216_p7), %s5121_s10, 2048, %s5119_s18, %s5128_s17, %s4409_s15, %s4409_s15, %s4410_s13  }
 0x82c PF: > { %s5217_s30 = sld [smem:[#allocation21_spill]]  ;;  %s5218_s24 = sld [smem:[#allocation19_spill]] }
 0x82d   : > { %s5219_s12 = sld [smem:[#allocation24_spill]] }
 0x832   : > { %p3833_p5 = scmp.ge.s32.totalorder %s5217_s30, 2  ;;  %s3131_s21 = sand.u32 1, %s5218_s24  }
 0x833   : > { %p5220_p0 = scmp.ne.s32.totalorder %s5219_s12, 0  ;;  %s3132_s20 = scalar_lea.sflag [#allocation4], %s3131_s21 }
 0x835   : > { %p3818_p6 = pnand %p3833_p5, %p5220_p0 }
 0x837   : > { %4376 = dma.done.wait (!%p3818_p6), %s3132_s20, 2048  }
 0x838   : > { %4378 = vsyncadd (!%p3818_p6), %s3132_s20, 4294965248  ;;  %s5221_s16 = sld [smem:[#allocation22_spill]]  ;;  %s5222_s27 = sld [smem:[#allocation20_spill]] }
 0x839   : > { %s5223_s15 = sld [smem:[#allocation23_spill]]  ;;  %s5224_s13 = smov %s4385_s14 }
 0x83e   : > { %p24_p9 = scmp.ge.s32.totalorder %s5221_s16, 4   ;;  %s5225_s14 = smov %s5222_s27 }
 0x840   :  { %26 = sbr.rel (!%p24_p9) target bundleno = 9 (0x9), region = 120 }
 0x847   :  { %3137 = vsyncpa [#allocation3], 1 }
 0x848   :  { %3139 = vsyncpa [#allocation3 + $0x1], 1 }
 0x849   :  { %3140 = vsyncpa [#allocation6], 1 }
 0x84a   :  { %3141 = vsyncpa [#allocation9], 1 }
 0x84b   :  { %3142 = vsyncpa [#allocation12], 1 }
 0x84c   :  { %3143 = vsyncpa [#allocation4], 1 }
 0x84d   :  { %3145 = vsyncpa [#allocation4 + $0x1], 1 }

// kernel: tpu_custom_call.1
= control target key start
LH: loop header
LB: loop body
LE: loop exit
PB: predicated region body
PF: predicated region fallthrough
CT: control target
= control target key end

     0   :  { %s5169_s0 = inlined_call_operand.vmem [shape: bf16[256,32], index: 0, kind: input, shape index: {}]   ;;  %s5170_s1 = inlined_call_operand.vmem [shape: bf16[32,128], index: 1, kind: input, shape index: {}]   ;;  %s5171_s2 = inlined_call_operand.hbm [shape: bf16[128,128], index: 2, kind: input, shape index: {}]   ;;  %s5172_s3 = inlined_call_operand.vmem [shape: bf16[128,256], index: 3, kind: input, shape index: {}]   ;;  %s5173_s4 = inlined_call_operand.hbm [shape: bf16[256,512], index: 4, kind: input, shape index: {}]   ;;  %s5174_s5 = inlined_call_operand.hbm [shape: bf16[512,256], index: 5, kind: input, shape index: {}]   ;;  %s5175_s6 = inlined_call_operand.hbm [shape: bf16[256,128], index: 6, kind: input, shape index: {}]   ;;  %s5176_s7 = inlined_call_operand.hbm [shape: bf16[128,128], index: 7, kind: input, shape index: {}]   ;;  %s5177_s8 = inlined_call_operand.hbm [shape: bf16[128,128], index: 8, kind: input, shape index: {}]   ;;  %s5178_s9 = inlined_call_operand.vmem [shape: f32[1,1664], index: 9, kind: input, shape index: {}]   ;;  %s5179_s10 = inlined_call_operand.hbm [shape: f32[256,128], index: 10, kind: output, shape index: {}]  }
   0x1   :  { %5192 = sst [smem:[#allocation25_spill]] %s5179_s10 }
   0x2   :  { %15 = vsyncpa [#allocation3], 0 }
   0x3   :  { %16 = vsyncpa [#allocation6], 0 }
   0x4   :  { %17 = vsyncpa [#allocation9], 0 }
   0x5   :  { %18 = vsyncpa [#allocation12], 0 }
   0x6   :  { %19 = vsyncpa [#allocation4], 0 }
   0x7   :  { %21 = vsyncpa [#allocation4 + $0x1], 0  ;;  %s4466_s13 = smov 0   ;;  %s4468_s14 = smov 0  }
   0x8   :  { %s4470_s15 = smov 0   ;;  %s4472_s16 = smov 0  }
   0x9 LB: > { %5193 = sst [smem:[#allocation19_spill]] %s4381_s13  ;;  %s4487_s17 = sadd.s32 4294967295, %s4393_s16   ;;  %s4393_s16 = sphi %s4472_s16, %s5221_s16   ;;  %s4389_s15 = sphi %s4470_s15, %s5223_s15   ;;  %s4385_s14 = sphi %s4468_s14, %s5225_s14   ;;  %s4381_s13 = sphi %s4466_s13, %s5224_s13  }
   0xa   : > { %5194 = sst [smem:[#allocation20_spill]] %s4389_s15  ;;  %s3238_s18 = sadd.s32 4294967294, %s4393_s16  }
   0xb   : > { %5195 = sst [smem:[#allocation21_spill]] %s4393_s16  ;;  %s4491_s19 = sadd.s32 1, %s4393_s16  }
   0xc   : > { %5196 = sst [smem:[#allocation22_spill]] %s4491_s19  ;;  %s249_s20 = sadd.s32 1, %s4389_s15 }
   0xd   : > { %s246_s21 = ssub.s32 %s4393_s16, %s4491_s19  ;;  %p259_p0 = scmp.ne.s32.totalorder %s4389_s15, %s4385_s14 }
   0xe   : > { %p247_p1 = scmp.eq.s32.totalorder %s246_s21, 0  ;;  %p260_p2 = scmp.eq.s32.totalorder %s4487_s17, 1 }
   0xf   : > { %p265_p3 = scmp.ne.s32.totalorder %s4385_s14, %s4381_s13  ;;  %p266_p4 = scmp.eq.s32.totalorder %s3238_s18, 1 }
  0x10   : > { %s4502_s22 = scalar_select %p247_p1, %s4389_s15, %s249_s20  }
  0x11   : > { %p4504_p5 = por %p260_p2, %p259_p0  ;;  %p4508_p6 = por %p266_p4, %p265_p3 }
  0x12   : > { %5197 = sst [smem:[#allocation23_spill]] %s4502_s22  ;;  %p3239_p7 = scmp.ge.s32.totalorder %s4393_s16, 1 }
  0x13   : > { %s5198_s23 = scalar_select %p4504_p5, 1, 0 }
  0x14   : > { %s5199_s24 = scalar_select %p4508_p6, 1, 0 }
  0x15   : > { %p273_p8 = scmp.lt.s32.totalorder %s4393_s16, 3  ;;  %p5181_p9 = scmp.eq.s32.totalorder %s4487_s17, 0 }
  0x16   : > { %5200 = sst [smem:[#allocation24_spill]] %s5199_s24  ;;  %s4395_s26 = smov [#allocation5]  }
  0x17   : > { %p4515_p10 = pnand %p3239_p7, %p273_p8  ;;  %s304_s27 = sshll.u32 %s4395_s26, 4  ;;  %s305_s27 = int_to_ptr.vmem [resolvable:$true] %s304_s27 }
  0x18   : > { %s4396_s29 = smov [#allocation8]   ;;  %s4147_s18 = scalar_lea.hbm %s5173_s4, 8192 }
  0x19   : > { %s5201_s25 = scalar_select %p4515_p10, 1, 0 }
  0x1a   : > { %p3798_p11 = pneg %p4515_p10  ;;  %s330_s30 = sshll.u32 %s4396_s29, 4  ;;  %s331_s30 = int_to_ptr.vmem [resolvable:$true] %s330_s30 }
  0x1b   : > { %p4148_p13 = scmp.ne.s32.totalorder %s5173_s4, %s4147_s18  ;;  %p4154_p3 = scmp.lt.u32.totalorder %s4147_s18, %s5173_s4 }
  0x1c   : > { %p4523_p12 = pnand %p5181_p9, %p3798_p11 }
  0x1e   : > { %p4535_p0 = pneg %p4523_p12 }
  0x20   : > { %p4150_p1 = pnand %p4535_p0, %p4148_p13 }
  0x22   : > { %p4151_p2 = pneg %p4150_p1 }
  0x24   : > { %p4156_p4 = pnand %p4154_p3, %p4151_p2 }
  0x26   : > { %4159 = shalt.err (!%p4156_p4)
}
  0x27   : > { %s4160_s29 = scalar_lea.vmem %s305_s27, 8192  ;;  %p4168_p9 = scmp.lt.s32.totalorder %s305_s27, %s305_s27 }
  0x28   : > { %p4161_p7 = scmp.ne.s32.totalorder %s305_s27, %s4160_s29  ;;  %p4169_p6 = scmp.lt.s32.totalorder %s4160_s29, %s4160_s29 }
  0x2a   : > { %p4163_p8 = pnand %p4161_p7, %p4535_p0  ;;  %p4170_p5 = por %p4169_p6, %p4168_p9 }
  0x2c   : > { %p4164_p11 = pneg %p4163_p8 }
  0x2e   : > { %p4171_p10 = pnand %p4170_p5, %p4164_p11 }
  0x30   : > { %4174 = shalt.err (!%p4171_p10)
}
  0x31   : > { %s4397_s11 = smov 256   ;;  %s4398_s12 = smov 16  }
  0x32   : > { %3804 = dma.hbm_to_vmem [thread:$0]  (!%p4523_p12), %s5173_s4, 8192, %s305_s27, [#allocation6], %s4397_s11, %s4397_s11, %s4398_s12  }
  0x33   : > { %s4399_s18 = smov [#allocation2]   ;;  %s4175_s24 = scalar_lea.hbm %s5175_s6, 2048 }
  0x34   : > { %s288_s20 = sshll.u32 %s4399_s18, 4  ;;  %p4176_p5 = scmp.ne.s32.totalorder %s5175_s6, %s4175_s24  ;;  %s289_s20 = int_to_ptr.vmem [resolvable:$true] %s288_s20 }
  0x35   : > { %p4182_p10 = scmp.lt.u32.totalorder %s4175_s24, %s5175_s6 }
  0x36   : > { %p4178_p6 = pnand %p4176_p5, %p4535_p0 }
  0x38   : > { %p4179_p9 = pneg %p4178_p6 }
  0x3a   : > { %p4184_p13 = pnand %p4182_p10, %p4179_p9 }
  0x3c   : > { %4187 = shalt.err (!%p4184_p13)
}
  0x3d   : > { %s4188_s27 = scalar_lea.vmem %s331_s30, 2048  ;;  %p4196_p4 = scmp.lt.s32.totalorder %s331_s30, %s331_s30 }
  0x3e   : > { %p4189_p1 = scmp.ne.s32.totalorder %s331_s30, %s4188_s27  ;;  %p4197_p7 = scmp.lt.s32.totalorder %s4188_s27, %s4188_s27 }
  0x40   : > { %p4191_p2 = pnand %p4189_p1, %p4535_p0  ;;  %p4198_p8 = por %p4197_p7, %p4196_p4 }
  0x42   : > { %p4192_p3 = pneg %p4191_p2 }
  0x44   : > { %p4199_p11 = pnand %p4198_p8, %p4192_p3 }
  0x46   : > { %4202 = shalt.err (!%p4199_p11)
}
  0x47   : > { %s5190_s13 = smov 64   ;;  %s4401_s19 = smov 4  }
  0x48   : > { %3810 = dma.hbm_to_vmem [thread:$0]  (!%p4523_p12), %s5175_s6, 2048, %s331_s30, [#allocation9], %s5190_s13, %s5190_s13, %s4401_s19  }
  0x49   : > { %s4203_s12 = scalar_lea.hbm %s5171_s2, 1024 }
  0x4a   : > { %p4204_p5 = scmp.ne.s32.totalorder %s5171_s2, %s4203_s12  ;;  %p4210_p10 = scmp.lt.u32.totalorder %s4203_s12, %s5171_s2 }
  0x4c   : > { %p4206_p6 = pnand %p4204_p5, %p4535_p0 }
  0x4e   : > { %p4207_p9 = pneg %p4206_p6 }
  0x50   : > { %p4212_p13 = pnand %p4210_p10, %p4207_p9 }
  0x52   : > { %4215 = shalt.err (!%p4212_p13)
}
  0x53   : > { %s4216_s29 = scalar_lea.vmem %s289_s20, 1024  ;;  %p4224_p4 = scmp.lt.s32.totalorder %s289_s20, %s289_s20 }
  0x54   : > { %p4217_p1 = scmp.ne.s32.totalorder %s289_s20, %s4216_s29  ;;  %p4225_p7 = scmp.lt.s32.totalorder %s4216_s29, %s4216_s29 }
  0x56   : > { %p4219_p2 = pnand %p4217_p1, %p4535_p0  ;;  %p4226_p8 = por %p4225_p7, %p4224_p4 }
  0x58   : > { %p4220_p3 = pneg %p4219_p2 }
  0x5a   : > { %p4227_p11 = pnand %p4226_p8, %p4220_p3 }
  0x5c   : > { %4230 = shalt.err (!%p4227_p11)
}
  0x5d   : > { %3801 = dma.hbm_to_vmem [thread:$0]  (!%p4523_p12), %s5171_s2, 1024, %s289_s20, [#allocation3], %s5190_s13, %s5190_s13, %s4401_s19  }
  0x5e   : > { %s4402_s10 = smov [#allocation7]   ;;  %s4231_s12 = scalar_lea.hbm %s5174_s5, 8192 }
  0x5f   : > { %s317_s16 = sshll.u32 %s4402_s10, 4  ;;  %p4232_p5 = scmp.ne.s32.totalorder %s5174_s5, %s4231_s12  ;;  %s318_s16 = int_to_ptr.vmem [resolvable:$true] %s317_s16 }
  0x60   : > { %p4238_p10 = scmp.lt.u32.totalorder %s4231_s12, %s5174_s5 }
  0x61   : > { %p4234_p6 = pnand %p4232_p5, %p4535_p0 }
  0x63   : > { %p4235_p9 = pneg %p4234_p6 }
  0x65   : > { %p4240_p13 = pnand %p4238_p10, %p4235_p9 }
  0x67   : > { %4243 = shalt.err (!%p4240_p13)
}
  0x68   : > { %s4244_s20 = scalar_lea.vmem %s318_s16, 8192  ;;  %p4252_p4 = scmp.lt.s32.totalorder %s318_s16, %s318_s16 }
  0x69   : > { %p4245_p1 = scmp.ne.s32.totalorder %s318_s16, %s4244_s20  ;;  %p4253_p7 = scmp.lt.s32.totalorder %s4244_s20, %s4244_s20 }
  0x6b   : > { %p4247_p2 = pnand %p4245_p1, %p4535_p0  ;;  %p4254_p8 = por %p4253_p7, %p4252_p4 }
  0x6d   : > { %p4248_p3 = pneg %p4247_p2 }
  0x6f   : > { %p4255_p11 = pnand %p4254_p8, %p4248_p3 }
  0x71   : > { %4258 = shalt.err (!%p4255_p11)
}
  0x72   : > { %s4403_s29 = smov 128   ;;  %s4404_s30 = smov 8  }
  0x73   : > { %3807 = dma.hbm_to_vmem [thread:$0]  (!%p4523_p12), %s5174_s5, 8192, %s318_s16, [#allocation6], %s4403_s29, %s4403_s29, %s4404_s30  }
  0x74   : > { %s4405_s24 = smov [#allocation10]   ;;  %s4406_s12 = smov [#allocation11]  }
  0x75   : > { %s343_s11 = sshll.u32 %s4405_s24, 4  ;;  %s356_s15 = sshll.u32 %s4406_s12, 4  ;;  %s344_s11 = int_to_ptr.vmem [resolvable:$true] %s343_s11  ;;  %s4611_s15 = int_to_ptr.vmem [resolvable:$true] %s356_s15 }
  0x76   : > { %s4259_s21 = scalar_lea.hbm %s5176_s7, 1024 }
  0x77   : > { %p4260_p5 = scmp.ne.s32.totalorder %s5176_s7, %s4259_s21  ;;  %p4266_p10 = scmp.lt.u32.totalorder %s4259_s21, %s5176_s7 }
  0x79   : > { %p4262_p6 = pnand %p4260_p5, %p4535_p0 }
  0x7b   : > { %p4263_p9 = pneg %p4262_p6 }
  0x7d   : > { %p4268_p13 = pnand %p4266_p10, %p4263_p9 }
  0x7f   : > { %4271 = shalt.err (!%p4268_p13)
}
  0x80   : > { %s4272_s29 = scalar_lea.vmem %s344_s11, 1024  ;;  %p4280_p4 = scmp.lt.s32.totalorder %s344_s11, %s344_s11 }
  0x81   : > { %p4273_p1 = scmp.ne.s32.totalorder %s344_s11, %s4272_s29  ;;  %p4281_p7 = scmp.lt.s32.totalorder %s4272_s29, %s4272_s29 }
  0x83   : > { %p4275_p2 = pnand %p4273_p1, %p4535_p0  ;;  %p4282_p8 = por %p4281_p7, %p4280_p4 }
  0x85   : > { %p4276_p3 = pneg %p4275_p2 }
  0x87   : > { %p4283_p11 = pnand %p4282_p8, %p4276_p3 }
  0x89   : > { %4286 = shalt.err (!%p4283_p11)
}
  0x8a   : > { %s5204_s13 = smov 64   ;;  %s4287_s22 = scalar_lea.hbm %s5177_s8, 1024 }
  0x8b   : > { %3813 = dma.hbm_to_vmem [thread:$0]  (!%p4523_p12), %s5176_s7, 1024, %s344_s11, [#allocation9], %s5204_s13, %s5204_s13, %s4401_s19  }
  0x8c   : > { %p4288_p5 = scmp.ne.s32.totalorder %s5177_s8, %s4287_s22  ;;  %p4294_p10 = scmp.lt.u32.totalorder %s4287_s22, %s5177_s8 }
  0x8e   : > { %p4290_p6 = pnand %p4288_p5, %p4535_p0 }
  0x90   : > { %p4291_p9 = pneg %p4290_p6 }
  0x92   : > { %p4296_p13 = pnand %p4294_p10, %p4291_p9 }
  0x94   : > { %4299 = shalt.err (!%p4296_p13)
}
  0x95   : > { %s4300_s11 = scalar_lea.vmem %s4611_s15, 1024  ;;  %p4308_p4 = scmp.lt.s32.totalorder %s4611_s15, %s4611_s15 }
  0x96   : > { %p4301_p1 = scmp.ne.s32.totalorder %s4611_s15, %s4300_s11  ;;  %p4309_p7 = scmp.lt.s32.totalorder %s4300_s11, %s4300_s11 }
  0x98   : > { %p4303_p2 = pnand %p4301_p1, %p4535_p0  ;;  %p4310_p8 = por %p4309_p7, %p4308_p4 }
  0x9a   : > { %p4304_p3 = pneg %p4303_p2 }
  0x9c   : > { %p4311_p11 = pnand %p4310_p8, %p4304_p3 }
  0x9e   : > { %4314 = shalt.err (!%p4311_p11)
}
  0x9f   : > { %3816 = dma.hbm_to_vmem [thread:$0]  (!%p4523_p12), %s5177_s8, 1024, %s4611_s15, [#allocation12], %s5204_s13, %s5204_s13, %s4401_s19  }
  0xa0   : > { %p5205_p5 = scmp.ne.s32.totalorder %s5201_s25, 0 }
  0xa1   : > { %p5206_p0 = scmp.eq.s32.totalorder (!%p5205_p5), %s4487_s17, 0 }
  0xa2   : > { %384 = sbr.rel (%p5205_p5) target bundleno = 2092 (0x82c), region = 60 }
  0xa9   : > { %4360 = dma.done.wait (%p5206_p0), [#allocation3], 1024   ;;  %p5207_p6 = pmov %p5206_p0 }
  0xaa   : > { %p5208_p9 = pmov %p5206_p0 }
  0xab   : > { %4362 = vsyncadd (%p5207_p6), [#allocation3], 4294966272 }
  0xac   : > { %4364 = dma.done.wait (%p5208_p9), [#allocation6], 16384   ;;  %p5209_p10 = pmov %p5206_p0 }
  0xad   : > { %p5210_p13 = pmov %p5206_p0 }
  0xae   : > { %4366 = vsyncadd (%p5209_p10), [#allocation6], 4294950912 }
  0xaf   : > { %4368 = dma.done.wait (%p5210_p13), [#allocation9], 3072   ;;  %p5211_p12 = pmov %p5206_p0 }
  0xb0   : > { %p5212_p1 = pmov %p5206_p0 }
  0xb1   : > { %4370 = vsyncadd (%p5211_p12), [#allocation9], 4294964224 }
  0xb2   : > { %4372 = dma.done.wait (%p5212_p1), [#allocation12], 1024   ;;  %p5213_p2 = pmov %p5206_p0 }
  0xb3   : > { %s3255_s25 = sshll.u32 %s4487_s17, 4  ;;  %v3881_v0 = vld [vmem:[%s5170_s1] sm:$0xff]   ;;  %v3882_v1 = vld [vmem:[%s5170_s1 + $0x8] sm:$0xff]   ;;  %vm529_vm0 = vcmask 261120   ;;  %v3893_v8 = vld [vmem:[#allocation2 + $0x10] sm:$0xff]   ;;  %s3469_s30 = sshll.u32 %s4487_s17, 11 }
  0xb4   : > { %4374 = vsyncadd (%p5213_p2), [#allocation12], 4294966272  ;;  %p443_p3 = scmp.lt.s32.totalorder %s3255_s25, 31  ;;  %3592 = vmatprep.subr.bf16.mxu0 %v3881_v0  ;;  %v3891_v5 = vld [vmem:[#allocation2] sm:$0xff]   ;;  %v3892_v6 = vld [vmem:[#allocation2 + $0x8] sm:$0xff]   ;;  %s5215_s22 = sld [smem:[#allocation25_spill]] }
  0xb5   : > { %3593 = vmatpush3.bf16.msra.mxu0 %v3881_v0  ;;  %3612 = vmatprep.subr.bf16.mxu1 %v3891_v5  ;;  %v3894_v10 = vld [vmem:[#allocation2 + $0x18] sm:$0xff]   ;;  %v3895_v12 = vld [vmem:[#allocation2 + $0x20] sm:$0xff]   ;;  %v3896_v14 = vld [vmem:[#allocation2 + $0x28] sm:$0xff]   ;;  %p5216_p7 = scmp.ne.s32.totalorder %s5198_s23, 0  ;;  %s4408_s20 = smov [#allocation13]  }
  0xb6   : > { %s5227_s25 = smov (!%p443_p3, %s3255_s25), 31  ;;  %3594 = vmatprep.subr.bf16.mxu0 %v3882_v1  ;;  %3613 = vmatpush3.bf16.msra.mxu1 %v3891_v5  ;;  %v3897_v16 = vld [vmem:[#allocation2 + $0x30] sm:$0xff]   ;;  %v3898_v17 = vld [vmem:[#allocation2 + $0x38] sm:$0xff]   ;;  %v3899_v18 = vld [vmem:[%s5172_s3] ss:$8 sps:$4 sm:$0xff]   ;;  %s4319_s27 = sshll.u32 %s4408_s20, 4  ;;  %s4320_s27 = int_to_ptr.vmem [resolvable:$false] %s4319_s27 }
  0xb7   : > { %s3256_s28 = sshll.u32 %s5227_s25, 2  ;;  %3614 = vmatprep.subr.bf16.mxu1 %v3892_v6  ;;  %v3901_v19 = vld [vmem:[%s5172_s3 + $0x4] ss:$8 sps:$4 sm:$0xff]   ;;  %v3904_v20 = vld [vmem:[%s5172_s3 + $0x14] ss:$8 sps:$4 sm:$0xff]   ;;  %s4321_s11 = scalar_lea.vmem %s4320_s27, 4096 }
  0xb8   : > { %s4682_s15 = scalar_lea.vmem %s5169_s0, %s3256_s28  ;;  %v3902_v21 = vld [vmem:[%s5172_s3 + $0x10] ss:$8 sps:$4 sm:$0xff]   ;;  %v3907_v22 = vld [vmem:[%s5172_s3 + $0x24] ss:$8 sps:$4 sm:$0xff]   ;;  %v3905_v23 = vld [vmem:[%s5172_s3 + $0x20] ss:$8 sps:$4 sm:$0xff]  }
  0xb9   : > { %v3883_v2 = vld [vmem:[%s4682_s15] sm:$0xff]   ;;  %v3884_v3 = vld [vmem:[%s4682_s15 + $0x8] sm:$0xff]   ;;  %3595 = vmatpush3.bf16.msra.mxu0 %v3882_v1  ;;  %v3885_v4 = vld [vmem:[%s4682_s15 + $0x10] sm:$0xff]   ;;  %s439_s28 = sand.u32 1, %s4385_s14  }
  0xba   : > { %3596 = vmatprep.mubr.msk.bf16.mxu0 %vm529_vm0, %v3883_v2  ;;  %v3886_v7 = vld [vmem:[%s4682_s15 + $0x18] sm:$0xff]   ;;  %v3887_v9 = vld [vmem:[%s4682_s15 + $0x20] sm:$0xff]   ;;  %3615 = vmatpush3.bf16.msra.mxu1 %v3892_v6  ;;  %v3888_v11 = vld [vmem:[%s4682_s15 + $0x28] sm:$0xff]   ;;  %s3254_s26 = sshll.u32 %s439_s28, 7  ;;  %s5119_s18 = scalar_lea.hbm %s5215_s22, %s3469_s30 }
  0xbb   : > { %3616 = vmatprep.subr.bf16.mxu1 %v3893_v8  ;;  %v3889_v13 = vld [vmem:[%s4682_s15 + $0x30] sm:$0xff]   ;;  %v3890_v15 = vld [vmem:[%s4682_s15 + $0x38] sm:$0xff]   ;;  %975 = vmatprep.subr.bf16.mxu0 %v3901_v19  ;;  %v3913_v26 = vld [vmem:[%s5172_s3 + $0x44] ss:$8 sps:$4 sm:$0xff]   ;;  %s5099_s13 = scalar_lea.vmem [#allocation13], %s3254_s26  ;;  %s5128_s17 = scalar_lea.sflag [#allocation4], %s439_s28 }
  0xbc   : > { %3597 = vmatmul.mubr.msk.bf16.vlgmr.msra.gmra.mrb[0].mxu0 %vm529_vm0, %v3884_v3  ;;  %v3910_v24 = vld [vmem:[%s5172_s3 + $0x34] ss:$8 sps:$4 sm:$0xff]   ;;  %v3908_v25 = vld [vmem:[%s5172_s3 + $0x30] ss:$8 sps:$4 sm:$0xff]   ;;  %v3911_v27 = vld [vmem:[%s5172_s3 + $0x40] ss:$8 sps:$4 sm:$0xff]  }
  0xbd   : > { %3600 = vmatprep.mubr.msk.bf16.mxu0 %vm529_vm0, %v3885_v4  ;;  %976 = vmatpush1.bf16.msra.mxu0 %v3899_v18  ;;  %v3916_v28 = vld [vmem:[%s5172_s3 + $0x54] ss:$8 sps:$4 sm:$0xff]   ;;  %v3914_v29 = vld [vmem:[%s5172_s3 + $0x50] ss:$8 sps:$4 sm:$0xff]   ;;  %v3257_v30 = vld [vmem:[%s5178_s9] ss:$0 sm:$0xff] }
  0xbe   : > { %3617 = vmatpush3.bf16.msra.mxu1 %v3893_v8  ;;  %977 = vmatprep.subr.bf16.mxu0 %v3904_v20  ;;  %s3116_s10 = sshll.u32 %s5099_s13, 4  ;;  %s5121_s10 = int_to_ptr.vmem [resolvable:$true] %s3116_s10 }
  0xbf   : > { %3618 = vmatprep.subr.bf16.mxu1 %v3894_v10  ;;  %s4315_s21 = scalar_lea.vmem %s5121_s10, 2048  ;;  %p4322_p5 = scmp.lt.s32.totalorder %s5121_s10, %s4320_s27 }
  0xc0   : > { %p4316_p4 = scmp.ne.s32.totalorder %s5121_s10, %s4315_s21  ;;  %p4323_p0 = scmp.lt.s32.totalorder %s4321_s11, %s4315_s21 }
  0xc1   : > { %978 = vmatpush1.bf16.msra.mxu0 %v3902_v21 }
  0xc2   : > { %3619 = vmatpush3.bf16.msra.mxu1 %v3894_v10  ;;  %979 = vmatprep.subr.bf16.mxu0 %v3907_v22  ;;  %p4317_p8 = pnand %p4316_p4, %p5216_p7  ;;  %p4324_p6 = por %p4323_p0, %p4322_p5 }
  0xc3   : > { %3620 = vmatprep.subr.bf16.mxu1 %v3895_v12 }
  0xc4   : > { %3601 = vmatmul.mubr.msk.bf16.gmra.mrb[4].mxu0 %vm529_vm0, %v3886_v7  ;;  %p4318_p11 = pneg %p4317_p8 }
  0xc5   : > { %3604 = vmatprep.mubr.msk.bf16.mxu0 %vm529_vm0, %v3887_v9  ;;  %980 = vmatpush1.bf16.msra.mxu0 %v3905_v23  ;;  %v3919_v23 = vld [vmem:[%s5172_s3 + $0x64] ss:$8 sps:$4 sm:$0xff]  }
  0xc6   : > { %3621 = vmatpush3.bf16.msra.mxu1 %v3895_v12  ;;  %981 = vmatprep.subr.bf16.mxu0 %v3910_v24  ;;  %v3917_v24 = vld [vmem:[%s5172_s3 + $0x60] ss:$8 sps:$4 sm:$0xff]   ;;  %p4325_p9 = pnand %p4324_p6, %p4318_p11 }
  0xc7   : > { %3622 = vmatprep.subr.bf16.mxu1 %v3896_v14 }
  0xc9   : > { %982 = vmatpush1.bf16.msra.mxu0 %v3908_v25  ;;  %v3922_v25 = vld [vmem:[%s5172_s3 + $0x74] ss:$8 sps:$4 sm:$0xff]  }
  0xca   : > { %3623 = vmatpush3.bf16.msra.mxu1 %v3896_v14  ;;  %983 = vmatprep.subr.bf16.mxu0 %v3913_v26  ;;  %v3920_v26 = vld [vmem:[%s5172_s3 + $0x70] ss:$8 sps:$4 sm:$0xff]  }
  0xcb   : > { %3624 = vmatprep.subr.bf16.mxu1 %v3897_v16 }
  0xcc   : > { %3605 = vmatmul.mubr.msk.bf16.gmra.mrb[8].mxu0 %vm529_vm0, %v3888_v11 }
  0xcd   : > { %3608 = vmatprep.mubr.msk.bf16.mxu0 %vm529_vm0, %v3889_v13  ;;  %984 = vmatpush1.bf16.msra.mxu0 %v3911_v27  ;;  %v4407_v27 = vmov 0  }
  0xce   : > { %3625 = vmatpush3.bf16.msra.mxu1 %v3897_v16  ;;  %985 = vmatprep.subr.bf16.mxu0 %v3916_v28  ;;  %v3923_v28 = vld [vmem:[#allocation5] ss:$16 sps:$4 sm:$0xff]  }
  0xcf   : > { %3626 = vmatprep.subr.bf16.mxu1 %v3898_v17 }
  0xd1   : > { %986 = vmatpush1.bf16.msra.mxu0 %v3914_v29  ;;  %v3925_v29 = vld [vmem:[#allocation5 + $0x4] ss:$16 sps:$4 sm:$0xff]  }
  0xd2   : > { %3627 = vmatpush3.bf16.msra.mxu1 %v3898_v17  ;;  %987 = vmatprep.subr.bf16.mxu0 %v3919_v23 }
  0xd3   : > { %1542 = vmatprep.subr.bf16.mxu1 %v3925_v29  ;;  %v3946_v29 = vld [vmem:[#allocation5 + $0x6c] ss:$16 sps:$4 sm:$0xff]  }
  0xd4   : > { %3609 = vmatmul.mubr.msk.bf16.gmra.mrb[12].mxu0 %vm529_vm0, %v3890_v15 }
  0xd5   : > { %988 = vmatpush1.bf16.msra.mxu0 %v3917_v24  ;;  %1007 = vmatprep.mubr.bf16.mxu0 %v4407_v27 }
  0xd6   : > { %989 = vmatprep.subr.bf16.mxu0 %v3922_v25  ;;  %v3938_v25 = vld [vmem:[#allocation5 + $0x48] ss:$16 sps:$4 sm:$0xff]  }
  0xd9   : > { %990 = vmatpush1.bf16.msra.mxu0 %v3920_v26 }
 0x18f   : > { %v3598_v31 = vpop.f32.mrb[0].mxu0 }
 0x190   : > { %v597_v32 = vadd.f32 %v3598_v31, %v3257_v30  ;;  %v588_v33 = vpop.f32.mrb[1].mxu0  ;;  %v3931_v31 = vld [vmem:[#allocation5 + $0x24] ss:$16 sps:$4 sm:$0xff]  }
 0x191   : > { %v589_v34 = vadd.f32 %v3257_v30, %v588_v33  ;;  %v3599_v35 = vpop.f32.mrb[2].mxu0  ;;  %v3937_v33 = vld [vmem:[#allocation5 + $0x44] ss:$16 sps:$4 sm:$0xff]  }
 0x192   : > { %v600_v36 = vadd.f32 %v3599_v35, %v3257_v30  ;;  %v591_v37 = vpop.f32.mrb[3].mxu0  ;;  %v653_v39 = vmax.f32 %v597_v32, 0.0  ;;  %v3929_v32 = vld [vmem:[#allocation5 + $0x20] ss:$16 sps:$4 sm:$0xff]   ;;  %v3943_v35 = vld [vmem:[#allocation5 + $0x64] ss:$16 sps:$4 sm:$0xff]  }
 0x193   : > { %v592_v38 = vadd.f32 %v3257_v30, %v591_v37  ;;  %v651_v41 = vmax.f32 %v589_v34, 0.0  ;;  %v3935_v34 = vld [vmem:[#allocation5 + $0x40] ss:$16 sps:$4 sm:$0xff]   ;;  %v3949_v37 = vld [vmem:[#allocation5 + $0x84] ss:$16 sps:$4 sm:$0xff]  }
 0x194   : > { %v654_v40 = vmax.f32 %v600_v36, 0.0  ;;  %v3941_v36 = vld [vmem:[#allocation5 + $0x60] ss:$16 sps:$4 sm:$0xff]  }
 0x195   : > { %v652_v42 = vmax.f32 %v592_v38, 0.0  ;;  %v3947_v38 = vld [vmem:[#allocation5 + $0x80] ss:$16 sps:$4 sm:$0xff]  }
 0x196   : > { %v668_v43 = vpack.c.bf16 %v654_v40, %v653_v39  ;;  %v3955_v39 = vld [vmem:[#allocation5 + $0xa4] ss:$16 sps:$4 sm:$0xff]   ;;  %v3953_v40 = vld [vmem:[#allocation5 + $0xa0] ss:$16 sps:$4 sm:$0xff]  }
 0x197   : > { %v3602_v44 = vpop.f32.mrb[4].mxu0  ;;  %v667_v45 = vpack.c.bf16 %v652_v42, %v651_v41  ;;  %v3961_v41 = vld [vmem:[#allocation5 + $0xc4] ss:$16 sps:$4 sm:$0xff]   ;;  %v3959_v42 = vld [vmem:[#allocation5 + $0xc0] ss:$16 sps:$4 sm:$0xff]  }
 0x198   : > { %v613_v46 = vadd.f32 %v3602_v44, %v3257_v30  ;;  %v604_v47 = vpop.f32.mrb[5].mxu0  ;;  %v3965_v44 = vld [vmem:[#allocation5 + $0xe0] ss:$16 sps:$4 sm:$0xff]  }
 0x199   : > { %v605_v48 = vadd.f32 %v3257_v30, %v604_v47  ;;  %3628 = vmatprep.mubr.bf16.mxu1 %v667_v45  ;;  %v3603_v49 = vpop.f32.mrb[6].mxu0  ;;  %v3973_v45 = vld [vmem:[#allocation5 + $0x104] ss:$16 sps:$4 sm:$0xff]  }
 0x19a   : > { %v657_v50 = vmax.f32 %v613_v46, 0.0  ;;  %v616_v51 = vadd.f32 %v3603_v49, %v3257_v30  ;;  %3629 = vmatmul.mubr.bf16.vlgmr.msra.gmra.mrb[0].mxu1 %v668_v43  ;;  %v607_v52 = vpop.f32.mrb[7].mxu0  ;;  %v3967_v43 = vld [vmem:[#allocation5 + $0xe4] ss:$16 sps:$4 sm:$0xff]   ;;  %v3971_v46 = vld [vmem:[#allocation5 + $0x100] ss:$16 sps:$4 sm:$0xff]  }
 0x19b   : > { %v655_v53 = vmax.f32 %v605_v48, 0.0  ;;  %v608_v54 = vadd.f32 %v3257_v30, %v607_v52  ;;  %1543 = vmatpush1.bf16.msra.mxu1 %v3923_v28  ;;  %v3979_v47 = vld [vmem:[#allocation5 + $0x124] ss:$16 sps:$4 sm:$0xff]   ;;  %v3977_v48 = vld [vmem:[#allocation5 + $0x120] ss:$16 sps:$4 sm:$0xff]  }
 0x19c   : > { %v658_v55 = vmax.f32 %v616_v51, 0.0  ;;  %1544 = vmatprep.subr.bf16.mxu1 %v3931_v31  ;;  %v3985_v49 = vld [vmem:[#allocation5 + $0x144] ss:$16 sps:$4 sm:$0xff]   ;;  %v3989_v52 = vld [vmem:[#allocation5 + $0x160] ss:$16 sps:$4 sm:$0xff]  }
 0x19d   : > { %v656_v56 = vmax.f32 %v608_v54, 0.0  ;;  %v3991_v51 = vld [vmem:[#allocation5 + $0x164] ss:$16 sps:$4 sm:$0xff]   ;;  %v3995_v54 = vld [vmem:[#allocation5 + $0x180] ss:$16 sps:$4 sm:$0xff]  }
 0x19e   : > { %v670_v57 = vpack.c.bf16 %v658_v55, %v657_v50  ;;  %v3983_v50 = vld [vmem:[#allocation5 + $0x140] ss:$16 sps:$4 sm:$0xff]   ;;  %v4003_v55 = vld [vmem:[#allocation5 + $0x1a4] ss:$16 sps:$4 sm:$0xff]  }
 0x19f   : > { %v669_v58 = vpack.c.bf16 %v656_v56, %v655_v53  ;;  %v3606_v59 = vpop.f32.mrb[8].mxu0  ;;  %1545 = vmatpush1.bf16.msra.mxu1 %v3929_v32  ;;  %v3997_v53 = vld [vmem:[#allocation5 + $0x184] ss:$16 sps:$4 sm:$0xff]   ;;  %v4001_v56 = vld [vmem:[#allocation5 + $0x1a0] ss:$16 sps:$4 sm:$0xff]  }
 0x1a0   : > { %v629_v60 = vadd.f32 %v3606_v59, %v3257_v30  ;;  %v620_v61 = vpop.f32.mrb[9].mxu0  ;;  %1546 = vmatprep.subr.bf16.mxu1 %v3937_v33 }
 0x1a1   : > { %3632 = vmatprep.mubr.bf16.mxu1 %v669_v58  ;;  %v621_v62 = vadd.f32 %v3257_v30, %v620_v61  ;;  %v3607_v63 = vpop.f32.mrb[10].mxu0 }
 0x1a2   : > { %3633 = vmatmul.mubr.bf16.gmra.mrb[4].mxu1 %v670_v57  ;;  %v661_v0 = vmax.f32 %v629_v60, 0.0  ;;  %v632_v1 = vadd.f32 %v3607_v63, %v3257_v30  ;;  %v623_v2 = vpop.f32.mrb[11].mxu0  ;;  %v4761_v57 = vld [vmem:[%s5178_s9 + $0x1] ss:$0 sm:$0xff] }
 0x1a3   : > { %v659_v3 = vmax.f32 %v621_v62, 0.0  ;;  %v624_v4 = vadd.f32 %v3257_v30, %v623_v2  ;;  %1547 = vmatpush1.bf16.msra.mxu1 %v3935_v34 }
 0x1a4   : > { %v662_v5 = vmax.f32 %v632_v1, 0.0  ;;  %1548 = vmatprep.subr.bf16.mxu1 %v3943_v35 }
 0x1a5   : > { %v660_v6 = vmax.f32 %v624_v4, 0.0 }
 0x1a6   : > { %v672_v7 = vpack.c.bf16 %v662_v5, %v661_v0 }
 0x1a7   : > { %v671_v8 = vpack.c.bf16 %v660_v6, %v659_v3  ;;  %v3610_v9 = vpop.f32.mrb[12].mxu0  ;;  %1549 = vmatpush1.bf16.msra.mxu1 %v3941_v36 }
 0x1a8   : > { %v645_v10 = vadd.f32 %v3610_v9, %v3257_v30  ;;  %v636_v11 = vpop.f32.mrb[13].mxu0  ;;  %1550 = vmatprep.subr.bf16.mxu1 %v3949_v37  ;;  %v3944_v37 = vld [vmem:[#allocation5 + $0x68] ss:$16 sps:$4 sm:$0xff]  }
 0x1a9   : > { %3636 = vmatprep.mubr.bf16.mxu1 %v671_v8  ;;  %v637_v12 = vadd.f32 %v3257_v30, %v636_v11  ;;  %v3611_v13 = vpop.f32.mrb[14].mxu0 }
 0x1aa   : > { %3637 = vmatmul.mubr.bf16.gmra.mrb[8].mxu1 %v672_v7  ;;  %v665_v14 = vmax.f32 %v645_v10, 0.0  ;;  %v648_v15 = vadd.f32 %v3611_v13, %v3257_v30  ;;  %v639_v16 = vpop.f32.mrb[15].mxu0  ;;  %v3926_v7 = vld [vmem:[#allocation5 + $0x8] ss:$16 sps:$4 sm:$0xff]   ;;  %v3934_v10 = vld [vmem:[#allocation5 + $0x2c] ss:$16 sps:$4 sm:$0xff]  }
 0x1ab   : > { %v663_v17 = vmax.f32 %v637_v12, 0.0  ;;  %v640_v18 = vadd.f32 %v3257_v30, %v639_v16  ;;  %v3928_v30 = vld [vmem:[#allocation5 + $0xc] ss:$16 sps:$4 sm:$0xff]   ;;  %1551 = vmatpush1.bf16.msra.mxu1 %v3947_v38 }
 0x1ac   : > { %v666_v19 = vmax.f32 %v648_v15, 0.0  ;;  %1655 = vmatprep.subr.bf16.mxu0 %v3928_v30  ;;  %1552 = vmatprep.subr.bf16.mxu1 %v3955_v39 }
 0x1ad   : > { %v664_v20 = vmax.f32 %v640_v18, 0.0  ;;  %v3932_v18 = vld [vmem:[#allocation5 + $0x28] ss:$16 sps:$4 sm:$0xff]  }
 0x1ae   : > { %v674_v21 = vpack.c.bf16 %v666_v19, %v665_v14 }
 0x1af   : > { %v673_v22 = vpack.c.bf16 %v664_v20, %v663_v17  ;;  %1553 = vmatpush1.bf16.msra.mxu1 %v3953_v40  ;;  %v3952_v40 = vld [vmem:[#allocation5 + $0x8c] ss:$16 sps:$4 sm:$0xff]  }
 0x1b0   : > { %1554 = vmatprep.subr.bf16.mxu1 %v3961_v41 }
 0x1b1   : > { %3640 = vmatprep.mubr.bf16.mxu1 %v673_v22 }
 0x1b2   : > { %3641 = vmatmul.mubr.bf16.gmra.mrb[12].mxu1 %v674_v21  ;;  %v3940_v21 = vld [vmem:[#allocation5 + $0x4c] ss:$16 sps:$4 sm:$0xff]  }
 0x1b3   : > { %1555 = vmatpush1.bf16.msra.mxu1 %v3959_v42 }
 0x1b4   : > { %1556 = vmatprep.subr.bf16.mxu1 %v3967_v43 }
 0x1b7   : > { %1557 = vmatpush1.bf16.msra.mxu1 %v3965_v44  ;;  %v3950_v44 = vld [vmem:[#allocation5 + $0x88] ss:$16 sps:$4 sm:$0xff]  }
 0x1b8   : > { %1558 = vmatprep.subr.bf16.mxu1 %v3973_v45 }
 0x1bb   : > { %1559 = vmatpush1.bf16.msra.mxu1 %v3971_v46 }
 0x1bc   : > { %1560 = vmatprep.subr.bf16.mxu1 %v3979_v47  ;;  %v3958_v47 = vld [vmem:[#allocation5 + $0xac] ss:$16 sps:$4 sm:$0xff]  }
 0x1bf   : > { %1561 = vmatpush1.bf16.msra.mxu1 %v3977_v48 }
 0x1c0   : > { %1562 = vmatprep.subr.bf16.mxu1 %v3985_v49 }
 0x1c3   : > { %1563 = vmatpush1.bf16.msra.mxu1 %v3983_v50 }
 0x1c4   : > { %1564 = vmatprep.subr.bf16.mxu1 %v3991_v51 }
 0x1c7   : > { %1565 = vmatpush1.bf16.msra.mxu1 %v3989_v52 }
 0x1c8   : > { %1566 = vmatprep.subr.bf16.mxu1 %v3997_v53 }
 0x1cb   : > { %1567 = vmatpush1.bf16.msra.mxu1 %v3995_v54 }
 0x1cc   : > { %1568 = vmatprep.subr.bf16.mxu1 %v4003_v55  ;;  %v3956_v55 = vld [vmem:[#allocation5 + $0xa8] ss:$16 sps:$4 sm:$0xff]  }
 0x1cf   : > { %1569 = vmatpush1.bf16.msra.mxu1 %v4001_v56 }
 0x26d   : > { %v3630_v58 = vpop.f32.mrb[0].mxu1 }
 0x26e   : > { %v789_v59 = vadd.f32 %v3630_v58, %v4761_v57  ;;  %v780_v60 = vpop.f32.mrb[1].mxu1 }
 0x26f   : > { %v781_v61 = vadd.f32 %v4761_v57, %v780_v60  ;;  %v3631_v62 = vpop.f32.mrb[2].mxu1 }
 0x270   : > { %v792_v63 = vadd.f32 %v3631_v62, %v4761_v57  ;;  %v783_v0 = vpop.f32.mrb[3].mxu1  ;;  %v845_v2 = vmax.f32 %v789_v59, 0.0  ;;  %v3964_v59 = vld [vmem:[#allocation5 + $0xcc] ss:$16 sps:$4 sm:$0xff]  }
 0x271   : > { %v784_v1 = vadd.f32 %v4761_v57, %v783_v0  ;;  %v843_v4 = vmax.f32 %v781_v61, 0.0 }
 0x272   : > { %v846_v3 = vmax.f32 %v792_v63, 0.0  ;;  %v3962_v63 = vld [vmem:[#allocation5 + $0xc8] ss:$16 sps:$4 sm:$0xff]  }
 0x273   : > { %v844_v5 = vmax.f32 %v784_v1, 0.0  ;;  %v3970_v1 = vld [vmem:[#allocation5 + $0xec] ss:$16 sps:$4 sm:$0xff]  }
 0x274   : > { %v860_v6 = vpack.c.bf16 %v846_v3, %v845_v2  ;;  %v3968_v2 = vld [vmem:[#allocation5 + $0xe8] ss:$16 sps:$4 sm:$0xff]   ;;  %v3976_v3 = vld [vmem:[#allocation5 + $0x10c] ss:$16 sps:$4 sm:$0xff]  }
 0x275   : > { %v859_v8 = vpack.c.bf16 %v844_v5, %v843_v4  ;;  %v3634_v9 = vpop.f32.mrb[4].mxu1  ;;  %v3974_v4 = vld [vmem:[#allocation5 + $0x108] ss:$16 sps:$4 sm:$0xff]  }
 0x276   : > { %v805_v11 = vadd.f32 %v3634_v9, %v4761_v57  ;;  %v796_v12 = vpop.f32.mrb[5].mxu1  ;;  %v3980_v5 = vld [vmem:[#allocation5 + $0x128] ss:$16 sps:$4 sm:$0xff]  }
 0x277   : > { %v797_v13 = vadd.f32 %v4761_v57, %v796_v12  ;;  %1008 = vmatmul.mubr.bf16.vlgmr.msra.gmra.mrb[16].mxu0 %v859_v8  ;;  %v3635_v14 = vpop.f32.mrb[6].mxu1  ;;  %v3994_v8 = vld [vmem:[#allocation5 + $0x16c] ss:$16 sps:$4 sm:$0xff]   ;;  %v3992_v9 = vld [vmem:[#allocation5 + $0x168] ss:$16 sps:$4 sm:$0xff]  }
 0x278   : > { %v849_v15 = vmax.f32 %v805_v11, 0.0  ;;  %v808_v16 = vadd.f32 %v3635_v14, %v4761_v57  ;;  %v799_v17 = vpop.f32.mrb[7].mxu1  ;;  %1017 = vmatprep.mubr.bf16.mxu0 %v4407_v27  ;;  %1656 = vmatpush1.bf16.msra.mxu0 %v3926_v7  ;;  %v3986_v7 = vld [vmem:[#allocation5 + $0x148] ss:$16 sps:$4 sm:$0xff]   ;;  %v4006_v12 = vld [vmem:[#allocation5 + $0x1ac] ss:$16 sps:$4 sm:$0xff]  }
 0x279   : > { %v847_v19 = vmax.f32 %v797_v13, 0.0  ;;  %v800_v20 = vadd.f32 %v4761_v57, %v799_v17  ;;  %1657 = vmatprep.subr.bf16.mxu0 %v3934_v10  ;;  %v4000_v10 = vld [vmem:[#allocation5 + $0x18c] ss:$16 sps:$4 sm:$0xff]   ;;  %v3998_v11 = vld [vmem:[#allocation5 + $0x188] ss:$16 sps:$4 sm:$0xff]  }
 0x27a   : > { %v850_v22 = vmax.f32 %v808_v16, 0.0  ;;  %v4004_v13 = vld [vmem:[#allocation5 + $0x1a8] ss:$16 sps:$4 sm:$0xff]   ;;  %v4009_v14 = vld [vmem:[#allocation5 + $0x1c4] ss:$16 sps:$4 sm:$0xff]  }
 0x27b   : > { %v848_v23 = vmax.f32 %v800_v20, 0.0  ;;  %v4007_v16 = vld [vmem:[#allocation5 + $0x1c0] ss:$16 sps:$4 sm:$0xff]   ;;  %v4010_v17 = vld [vmem:[#allocation5 + $0x1c8] ss:$16 sps:$4 sm:$0xff]   ;;  %1570 = vmatprep.subr.bf16.mxu1 %v4009_v14 }
 0x27c   : > { %v862_v24 = vpack.c.bf16 %v850_v22, %v849_v15  ;;  %1658 = vmatpush1.bf16.msra.mxu0 %v3932_v18  ;;  %v4012_v15 = vld [vmem:[#allocation5 + $0x1cc] ss:$16 sps:$4 sm:$0xff]   ;;  %1571 = vmatpush1.bf16.msra.mxu1 %v4007_v16  ;;  %v4015_v18 = vld [vmem:[#allocation5 + $0x1e4] ss:$16 sps:$4 sm:$0xff]   ;;  %v4013_v20 = vld [vmem:[#allocation5 + $0x1e0] ss:$16 sps:$4 sm:$0xff]   ;;  %v885_v22 = vlaneseq }
 0x27d   : > { %v861_v26 = vpack.c.bf16 %v848_v23, %v847_v19  ;;  %v3638_v28 = vpop.f32.mrb[8].mxu1  ;;  %1659 = vmatprep.subr.bf16.mxu0 %v3940_v21  ;;  %v4018_v19 = vld [vmem:[#allocation5 + $0x1ec] ss:$16 sps:$4 sm:$0xff]   ;;  %v4016_v21 = vld [vmem:[#allocation5 + $0x1e8] ss:$16 sps:$4 sm:$0xff]   ;;  %1572 = vmatprep.subr.bf16.mxu1 %v4015_v18 }
 0x27e   : > { %v821_v30 = vadd.f32 %v3638_v28, %v4761_v57  ;;  %v812_v31 = vpop.f32.mrb[9].mxu1  ;;  %v4786_v23 = vshrl.u32 %v885_v22, 7 }
 0x27f   : > { %1018 = vmatmul.mubr.bf16.gmra.mrb[20].mxu0 %v860_v6  ;;  %v813_v32 = vadd.f32 %v4761_v57, %v812_v31  ;;  %v3639_v33 = vpop.f32.mrb[10].mxu1  ;;  %v3988_v6 = vld [vmem:[#allocation5 + $0x14c] ss:$16 sps:$4 sm:$0xff]  }
 0x280   : > { %v853_v34 = vmax.f32 %v821_v30, 0.0  ;;  %1027 = vmatprep.mubr.bf16.mxu0 %v4407_v27  ;;  %v824_v35 = vadd.f32 %v3639_v33, %v4761_v57  ;;  %v815_v36 = vpop.f32.mrb[11].mxu1  ;;  %1660 = vmatpush1.bf16.msra.mxu0 %v3938_v25  ;;  %v883_v25 = vld [vmem:[%s5178_s9 + $0x2] sm:$0x3] }
 0x281   : > { %v851_v38 = vmax.f32 %v813_v32, 0.0  ;;  %v816_v39 = vadd.f32 %v4761_v57, %v815_v36  ;;  %1661 = vmatprep.subr.bf16.mxu0 %v3946_v29  ;;  %1573 = vmatpush1.bf16.msra.mxu1 %v4013_v20  ;;  %v4036_v20 = vld [vmem:[#allocation7 + $0x54] ss:$8 sps:$4 sm:$0xff]  }
 0x282   : > { %v854_v41 = vmax.f32 %v824_v35, 0.0 }
 0x283   : > { %v852_v42 = vmax.f32 %v816_v39, 0.0 }
 0x284   : > { %v864_v43 = vpack.c.bf16 %v854_v41, %v853_v34  ;;  %1662 = vmatpush1.bf16.msra.mxu0 %v3944_v37 }
 0x285   : > { %v863_v45 = vpack.c.bf16 %v852_v42, %v851_v38  ;;  %v3642_v46 = vpop.f32.mrb[12].mxu1  ;;  %1663 = vmatprep.subr.bf16.mxu0 %v3952_v40 }
 0x286   : > { %v837_v48 = vadd.f32 %v3642_v46, %v4761_v57  ;;  %v828_v49 = vpop.f32.mrb[13].mxu1 }
 0x287   : > { %1028 = vmatmul.mubr.bf16.gmra.mrb[24].mxu0 %v861_v26  ;;  %v829_v50 = vadd.f32 %v4761_v57, %v828_v49  ;;  %v3643_v51 = vpop.f32.mrb[14].mxu1  ;;  %v4795_v26 = vsub.s32 1, %v4786_v23 }
 0x288   : > { %1037 = vmatprep.mubr.bf16.mxu0 %v4407_v27  ;;  %v857_v52 = vmax.f32 %v837_v48, 0.0  ;;  %v840_v53 = vadd.f32 %v3643_v51, %v4761_v57  ;;  %v831_v54 = vpop.f32.mrb[15].mxu1  ;;  %1664 = vmatpush1.bf16.msra.mxu0 %v3950_v44  ;;  %v4024_v48 = vld [vmem:[#allocation7 + $0x14] ss:$8 sps:$4 sm:$0xff]  }
 0x289   : > { %v855_v56 = vmax.f32 %v829_v50, 0.0  ;;  %v832_v58 = vadd.f32 %v4761_v57, %v831_v54  ;;  %1665 = vmatprep.subr.bf16.mxu0 %v3958_v47  ;;  %v3982_v57 = vld [vmem:[#allocation5 + $0x12c] ss:$16 sps:$4 sm:$0xff]   ;;  %v4801_v29 = vrot.slane %v883_v25, %v4795_v26  ;;  %v4022_v54 = vld [vmem:[#allocation7 + $0x10] ss:$8 sps:$4 sm:$0xff]  }
 0x28a   : > { %v858_v60 = vmax.f32 %v840_v53, 0.0 }
 0x28b   : > { %v856_v61 = vmax.f32 %v832_v58, 0.0  ;;  %v4027_v58 = vld [vmem:[#allocation7 + $0x24] ss:$8 sps:$4 sm:$0xff]  }
 0x28c   : > { %v866_v62 = vpack.c.bf16 %v858_v60, %v857_v52  ;;  %1666 = vmatpush1.bf16.msra.mxu0 %v3956_v55 }
 0x28d   : > { %v865_v0 = vpack.c.bf16 %v856_v61, %v855_v56  ;;  %1667 = vmatprep.subr.bf16.mxu0 %v3964_v59 }
 0x28f   : > { %1038 = vmatmul.mubr.bf16.gmra.mrb[28].mxu0 %v862_v24  ;;  %v4789_v24 = vsub.s32 0, %v4786_v23 }
 0x290   : > { %1047 = vmatprep.mubr.bf16.mxu0 %v4407_v27  ;;  %1668 = vmatpush1.bf16.msra.mxu0 %v3962_v63 }
 0x291   : > { %1669 = vmatprep.subr.bf16.mxu0 %v3970_v1  ;;  %v4798_v28 = vrot.slane %v883_v25, %v4789_v24 }
 0x294   : > { %1670 = vmatpush1.bf16.msra.mxu0 %v3968_v2 }
 0x295   : > { %1671 = vmatprep.subr.bf16.mxu0 %v3976_v3  ;;  %v4030_v3 = vld [vmem:[#allocation7 + $0x34] ss:$8 sps:$4 sm:$0xff]  }
 0x297   : > { %1048 = vmatmul.mubr.bf16.gmra.mrb[32].mxu0 %v863_v45  ;;  %v4019_v45 = vld [vmem:[#allocation7] ss:$8 sps:$4 sm:$0xff]  }
 0x298   : > { %1057 = vmatprep.mubr.bf16.mxu0 %v4407_v27  ;;  %1672 = vmatpush1.bf16.msra.mxu0 %v3974_v4 }
 0x299   : > { %1673 = vmatprep.subr.bf16.mxu0 %v3982_v57 }
 0x29c   : > { %1674 = vmatpush1.bf16.msra.mxu0 %v3980_v5 }
 0x29d   : > { %1675 = vmatprep.subr.bf16.mxu0 %v3988_v6 }
 0x29f   : > { %1058 = vmatmul.mubr.bf16.gmra.mrb[36].mxu0 %v864_v43 }
 0x2a0   : > { %1067 = vmatprep.mubr.bf16.mxu0 %v4407_v27  ;;  %1676 = vmatpush1.bf16.msra.mxu0 %v3986_v7 }
 0x2a1   : > { %1677 = vmatprep.subr.bf16.mxu0 %v3994_v8  ;;  %v4028_v8 = vld [vmem:[#allocation7 + $0x30] ss:$8 sps:$4 sm:$0xff]  }
 0x2a4   : > { %1678 = vmatpush1.bf16.msra.mxu0 %v3992_v9 }
 0x2a5   : > { %1679 = vmatprep.subr.bf16.mxu0 %v4000_v10 }
 0x2a7   : > { %1068 = vmatmul.mubr.bf16.gmra.mrb[40].mxu0 %v865_v0  ;;  %v4025_v0 = vld [vmem:[#allocation7 + $0x20] ss:$8 sps:$4 sm:$0xff]  }
 0x2a8   : > { %1077 = vmatprep.mubr.bf16.mxu0 %v4407_v27  ;;  %1680 = vmatpush1.bf16.msra.mxu0 %v3998_v11  ;;  %v4021_v27 = vld [vmem:[#allocation7 + $0x4] ss:$8 sps:$4 sm:$0xff]  }
 0x2a9   : > { %1681 = vmatprep.subr.bf16.mxu0 %v4006_v12  ;;  %2196 = vmatprep.subr.bf16.mxu1 %v4021_v27  ;;  %v4033_v11 = vld [vmem:[#allocation7 + $0x44] ss:$8 sps:$4 sm:$0xff]  }
 0x2ac   : > { %1682 = vmatpush1.bf16.msra.mxu0 %v4004_v13 }
 0x2ad   : > { %1683 = vmatprep.subr.bf16.mxu0 %v4012_v15 }
 0x2af   : > { %1078 = vmatmul.mubr.bf16.gmra.mrb[44].mxu0 %v866_v62 }
 0x2b0   : > { %1684 = vmatpush1.bf16.msra.mxu0 %v4010_v17  ;;  %v4031_v17 = vld [vmem:[#allocation7 + $0x40] ss:$8 sps:$4 sm:$0xff]  }
 0x2b1   : > { %1685 = vmatprep.subr.bf16.mxu0 %v4018_v19 }
 0x2b4   : > { %1686 = vmatpush1.bf16.msra.mxu0 %v4016_v21 }
 0x34a   : > { %v1009_v30 = vpop.f32.mrb[16].mxu0 }
 0x34b   : > { %v1010_v31 = vadd.f32 %v1009_v30, %v4798_v28  ;;  %v1011_v32 = vpop.f32.mrb[17].mxu0 }
 0x34c   : > { %v1012_v33 = vadd.f32 %v1011_v32, %v4801_v29  ;;  %v1013_v34 = vpop.f32.mrb[18].mxu0 }
 0x34d   : > { %v1014_v35 = vadd.f32 %v1013_v34, %v4798_v28  ;;  %v1015_v36 = vpop.f32.mrb[19].mxu0  ;;  %v1088_v38 = vmax.f32 %v1010_v31, 0.0  ;;  %v4034_v31 = vld [vmem:[#allocation7 + $0x50] ss:$8 sps:$4 sm:$0xff]   ;;  %v4039_v34 = vld [vmem:[#allocation7 + $0x64] ss:$8 sps:$4 sm:$0xff]  }
 0x34e   : > { %v1016_v37 = vadd.f32 %v1015_v36, %v4801_v29  ;;  %v1089_v40 = vmax.f32 %v1012_v33, 0.0 }
 0x34f   : > { %v1090_v39 = vmax.f32 %v1014_v35, 0.0 }
 0x350   : > { %v1091_v41 = vmax.f32 %v1016_v37, 0.0 }
 0x351   : > { %v1120_v42 = vpack.c.bf16 %v1090_v39, %v1088_v38 }
 0x352   : > { %v1121_v43 = vpack.c.bf16 %v1091_v41, %v1089_v40  ;;  %v1019_v44 = vpop.f32.mrb[20].mxu0  ;;  %v4037_v40 = vld [vmem:[#allocation7 + $0x60] ss:$8 sps:$4 sm:$0xff]  }
 0x353   : > { %v1020_v46 = vadd.f32 %v1019_v44, %v4798_v28  ;;  %v1021_v47 = vpop.f32.mrb[21].mxu0 }
 0x354   : > { %v1022_v49 = vadd.f32 %v1021_v47, %v4801_v29  ;;  %v1023_v50 = vpop.f32.mrb[22].mxu0  ;;  %1574 = vmatprep.mubr.bf16.mxu1 %v1121_v43  ;;  %1687 = vmatprep.mubr.bf16.mxu0 %v1121_v43  ;;  %v4042_v43 = vld [vmem:[#allocation7 + $0x74] ss:$8 sps:$4 sm:$0xff]  }
 0x355   : > { %v1024_v51 = vadd.f32 %v1023_v50, %v4798_v28  ;;  %v1025_v52 = vpop.f32.mrb[23].mxu0  ;;  %1575 = vmatmul.mubr.bf16.vlgmr.msra.gmra.mrb[16].mxu1 %v1120_v42  ;;  %1688 = vmatmul.mubr.bf16.vlgmr.msra.gmra.mrb[48].mxu0 %v1120_v42  ;;  %v1092_v55 = vmax.f32 %v1020_v46, 0.0 }
 0x356   : > { %v1026_v53 = vadd.f32 %v1025_v52, %v4801_v29  ;;  %2197 = vmatpush1.bf16.msra.mxu1 %v4019_v45  ;;  %v1093_v59 = vmax.f32 %v1022_v49, 0.0  ;;  %v4040_v49 = vld [vmem:[#allocation7 + $0x70] ss:$8 sps:$4 sm:$0xff]   ;;  %v4045_v52 = vld [vmem:[#allocation7 + $0x84] ss:$8 sps:$4 sm:$0xff]  }
 0x357   : > { %v1094_v56 = vmax.f32 %v1024_v51, 0.0  ;;  %2198 = vmatprep.subr.bf16.mxu1 %v4024_v48 }
 0x358   : > { %v1095_v60 = vmax.f32 %v1026_v53, 0.0 }
 0x359   : > { %v1122_v61 = vpack.c.bf16 %v1094_v56, %v1092_v55 }
 0x35a   : > { %v1123_v62 = vpack.c.bf16 %v1095_v60, %v1093_v59  ;;  %v1029_v63 = vpop.f32.mrb[24].mxu0  ;;  %2199 = vmatpush1.bf16.msra.mxu1 %v4022_v54  ;;  %v4043_v59 = vld [vmem:[#allocation7 + $0x80] ss:$8 sps:$4 sm:$0xff]  }
 0x35b   : > { %v1030_v1 = vadd.f32 %v1029_v63, %v4798_v28  ;;  %v1031_v2 = vpop.f32.mrb[25].mxu0  ;;  %2200 = vmatprep.subr.bf16.mxu1 %v4027_v58 }
 0x35c   : > { %v1032_v4 = vadd.f32 %v1031_v2, %v4801_v29  ;;  %v1033_v57 = vpop.f32.mrb[26].mxu0  ;;  %1584 = vmatprep.mubr.bf16.mxu1 %v1123_v62  ;;  %1697 = vmatprep.mubr.bf16.mxu0 %v1123_v62  ;;  %v4048_v62 = vld [vmem:[#allocation7 + $0x94] ss:$8 sps:$4 sm:$0xff]  }
 0x35d   : > { %v1034_v5 = vadd.f32 %v1033_v57, %v4798_v28  ;;  %v1035_v6 = vpop.f32.mrb[27].mxu0  ;;  %1585 = vmatmul.mubr.bf16.gmra.mrb[20].mxu1 %v1122_v61  ;;  %1698 = vmatmul.mubr.bf16.gmra.mrb[52].mxu0 %v1122_v61  ;;  %v1096_v9 = vmax.f32 %v1030_v1, 0.0 }
 0x35e   : > { %v1036_v7 = vadd.f32 %v1035_v6, %v4801_v29  ;;  %2201 = vmatpush1.bf16.msra.mxu1 %v4025_v0  ;;  %v1097_v12 = vmax.f32 %v1032_v4, 0.0  ;;  %v4046_v4 = vld [vmem:[#allocation7 + $0x90] ss:$8 sps:$4 sm:$0xff]   ;;  %v4051_v6 = vld [vmem:[#allocation7 + $0xa4] ss:$8 sps:$4 sm:$0xff]  }
 0x35f   : > { %v1098_v10 = vmax.f32 %v1034_v5, 0.0  ;;  %2202 = vmatprep.subr.bf16.mxu1 %v4030_v3 }
 0x360   : > { %v1099_v13 = vmax.f32 %v1036_v7, 0.0 }
 0x361   : > { %v1124_v14 = vpack.c.bf16 %v1098_v10, %v1096_v9 }
 0x362   : > { %v1125_v15 = vpack.c.bf16 %v1099_v13, %v1097_v12  ;;  %v1039_v16 = vpop.f32.mrb[28].mxu0  ;;  %2203 = vmatpush1.bf16.msra.mxu1 %v4028_v8  ;;  %v4049_v12 = vld [vmem:[#allocation7 + $0xa0] ss:$8 sps:$4 sm:$0xff]  }
 0x363   : > { %v1040_v18 = vadd.f32 %v1039_v16, %v4798_v28  ;;  %v1041_v19 = vpop.f32.mrb[29].mxu0  ;;  %2204 = vmatprep.subr.bf16.mxu1 %v4033_v11 }
 0x364   : > { %v1042_v21 = vadd.f32 %v1041_v19, %v4801_v29  ;;  %v1043_v27 = vpop.f32.mrb[30].mxu0  ;;  %1594 = vmatprep.mubr.bf16.mxu1 %v1125_v15  ;;  %1707 = vmatprep.mubr.bf16.mxu0 %v1125_v15  ;;  %v4054_v15 = vld [vmem:[#allocation7 + $0xb4] ss:$8 sps:$4 sm:$0xff]  }
 0x365   : > { %v1044_v22 = vadd.f32 %v1043_v27, %v4798_v28  ;;  %v1045_v25 = vpop.f32.mrb[31].mxu0  ;;  %1595 = vmatmul.mubr.bf16.gmra.mrb[24].mxu1 %v1124_v14  ;;  %1708 = vmatmul.mubr.bf16.gmra.mrb[56].mxu0 %v1124_v14  ;;  %v1100_v32 = vmax.f32 %v1040_v18, 0.0 }
 0x366   : > { %v1046_v30 = vadd.f32 %v1045_v25, %v4801_v29  ;;  %2205 = vmatpush1.bf16.msra.mxu1 %v4031_v17  ;;  %v1101_v35 = vmax.f32 %v1042_v21, 0.0  ;;  %v4052_v21 = vld [vmem:[#allocation7 + $0xb0] ss:$8 sps:$4 sm:$0xff]   ;;  %v4057_v25 = vld [vmem:[#allocation7 + $0xc4] ss:$8 sps:$4 sm:$0xff]  }
 0x367   : > { %v1102_v33 = vmax.f32 %v1044_v22, 0.0  ;;  %2206 = vmatprep.subr.bf16.mxu1 %v4036_v20 }
 0x368   : > { %v1103_v36 = vmax.f32 %v1046_v30, 0.0 }
 0x369   : > { %v1126_v37 = vpack.c.bf16 %v1102_v33, %v1100_v32 }
 0x36a   : > { %v1127_v38 = vpack.c.bf16 %v1103_v36, %v1101_v35  ;;  %v1049_v39 = vpop.f32.mrb[32].mxu0  ;;  %2207 = vmatpush1.bf16.msra.mxu1 %v4034_v31  ;;  %v4055_v35 = vld [vmem:[#allocation7 + $0xc0] ss:$8 sps:$4 sm:$0xff]  }
 0x36b   : > { %v1050_v41 = vadd.f32 %v1049_v39, %v4798_v28  ;;  %v1051_v42 = vpop.f32.mrb[33].mxu0  ;;  %2208 = vmatprep.subr.bf16.mxu1 %v4039_v34 }
 0x36c   : > { %v1052_v44 = vadd.f32 %v1051_v42, %v4801_v29  ;;  %v1053_v45 = vpop.f32.mrb[34].mxu0  ;;  %1604 = vmatprep.mubr.bf16.mxu1 %v1127_v38  ;;  %1717 = vmatprep.mubr.bf16.mxu0 %v1127_v38  ;;  %v4060_v38 = vld [vmem:[#allocation7 + $0xd4] ss:$8 sps:$4 sm:$0xff]  }
 0x36d   : > { %v1054_v46 = vadd.f32 %v1053_v45, %v4798_v28  ;;  %v1055_v47 = vpop.f32.mrb[35].mxu0  ;;  %1605 = vmatmul.mubr.bf16.gmra.mrb[28].mxu1 %v1126_v37  ;;  %1718 = vmatmul.mubr.bf16.gmra.mrb[60].mxu0 %v1126_v37  ;;  %v1104_v50 = vmax.f32 %v1050_v41, 0.0 }
 0x36e   : > { %v1056_v48 = vadd.f32 %v1055_v47, %v4801_v29  ;;  %2209 = vmatpush1.bf16.msra.mxu1 %v4037_v40  ;;  %v1105_v53 = vmax.f32 %v1052_v44, 0.0  ;;  %v4058_v44 = vld [vmem:[#allocation7 + $0xd0] ss:$8 sps:$4 sm:$0xff]  }
 0x36f   : > { %v1106_v51 = vmax.f32 %v1054_v46, 0.0  ;;  %2210 = vmatprep.subr.bf16.mxu1 %v4042_v43 }
 0x370   : > { %v1107_v54 = vmax.f32 %v1056_v48, 0.0 }
 0x371   : > { %v1128_v55 = vpack.c.bf16 %v1106_v51, %v1104_v50  ;;  %v4061_v51 = vld [vmem:[#allocation7 + $0xe0] ss:$8 sps:$4 sm:$0xff]  }
 0x372   : > { %v1129_v56 = vpack.c.bf16 %v1107_v54, %v1105_v53  ;;  %v1059_v58 = vpop.f32.mrb[36].mxu0  ;;  %2211 = vmatpush1.bf16.msra.mxu1 %v4040_v49  ;;  %v4069_v53 = vld [vmem:[#allocation7 + $0x104] ss:$8 sps:$4 sm:$0xff]   ;;  %v1212_v54 = vsub.s32 2, %v4786_v23 }
 0x373   : > { %v1060_v60 = vadd.f32 %v1059_v58, %v4798_v28  ;;  %v1061_v61 = vpop.f32.mrb[37].mxu0  ;;  %2212 = vmatprep.subr.bf16.mxu1 %v4045_v52  ;;  %v4066_v52 = vld [vmem:[#allocation7 + $0xf4] ss:$8 sps:$4 sm:$0xff]  }
 0x374   : > { %v1062_v63 = vadd.f32 %v1061_v61, %v4801_v29  ;;  %v1063_v0 = vpop.f32.mrb[38].mxu0  ;;  %1614 = vmatprep.mubr.bf16.mxu1 %v1129_v56  ;;  %1727 = vmatprep.mubr.bf16.mxu0 %v1129_v56  ;;  %v1216_v56 = vsub.s32 3, %v4786_v23 }
 0x375   : > { %v1064_v1 = vadd.f32 %v1063_v0, %v4798_v28  ;;  %v1065_v2 = vpop.f32.mrb[39].mxu0  ;;  %1615 = vmatmul.mubr.bf16.gmra.mrb[32].mxu1 %v1128_v55  ;;  %1728 = vmatmul.mubr.bf16.gmra.mrb[64].mxu0 %v1128_v55  ;;  %v1108_v57 = vmax.f32 %v1060_v60, 0.0  ;;  %v1200_v55 = vld [vmem:[%s5178_s9 + $0x4] sm:$0xf] }
 0x376   : > { %v1066_v3 = vadd.f32 %v1065_v2, %v4801_v29  ;;  %2213 = vmatpush1.bf16.msra.mxu1 %v4043_v59  ;;  %v1109_v7 = vmax.f32 %v1062_v63, 0.0  ;;  %v4841_v58 = vrot.slane %v1200_v55, %v4789_v24  ;;  %v4843_v59 = vrot.slane %v1200_v55, %v1212_v54  ;;  %v4115_v2 = vld [vmem:[#allocation8 + $0x40] sm:$0xff]  }
 0x377   : > { %v1110_v5 = vmax.f32 %v1064_v1, 0.0  ;;  %2214 = vmatprep.subr.bf16.mxu1 %v4048_v62  ;;  %v4846_v62 = vrot.slane %v1200_v55, %v4795_v26  ;;  %v4848_v63 = vrot.slane %v1200_v55, %v1216_v56  ;;  %3496 = vmatprep.subr.bf16.mxu0 %v4115_v2  ;;  %v4124_v56 = vld [vmem:[#allocation8 + $0x20] sm:$0xff]  }
 0x378   : > { %v1111_v8 = vmax.f32 %v1066_v3, 0.0  ;;  %v4116_v3 = vld [vmem:[#allocation8] sm:$0xff]  }
 0x379   : > { %v1130_v9 = vpack.c.bf16 %v1110_v5, %v1108_v57  ;;  %3497 = vmatpush3.bf16.msra.mxu0 %v4116_v3  ;;  %v4076_v3 = vld [vmem:[#allocation7 + $0x130] ss:$8 sps:$4 sm:$0xff]  }
 0x37a   : > { %v1131_v10 = vpack.c.bf16 %v1111_v8, %v1109_v7  ;;  %v1069_v11 = vpop.f32.mrb[40].mxu0  ;;  %2215 = vmatpush1.bf16.msra.mxu1 %v4046_v4  ;;  %v4117_v4 = vld [vmem:[#allocation8 + $0x48] sm:$0xff]  }
 0x37b   : > { %v1070_v13 = vadd.f32 %v1069_v11, %v4798_v28  ;;  %v1071_v14 = vpop.f32.mrb[41].mxu0  ;;  %2216 = vmatprep.subr.bf16.mxu1 %v4051_v6  ;;  %3498 = vmatprep.subr.bf16.mxu0 %v4117_v4 }
 0x37c   : > { %v1072_v16 = vadd.f32 %v1071_v14, %v4801_v29  ;;  %v1073_v17 = vpop.f32.mrb[42].mxu0  ;;  %1624 = vmatprep.mubr.bf16.mxu1 %v1131_v10  ;;  %1737 = vmatprep.mubr.bf16.mxu0 %v1131_v10 }
 0x37d   : > { %v1074_v18 = vadd.f32 %v1073_v17, %v4798_v28  ;;  %v1075_v19 = vpop.f32.mrb[43].mxu0  ;;  %1625 = vmatmul.mubr.bf16.gmra.mrb[36].mxu1 %v1130_v9  ;;  %1738 = vmatmul.mubr.bf16.gmra.mrb[68].mxu0 %v1130_v9  ;;  %v1112_v27 = vmax.f32 %v1070_v13, 0.0 }
 0x37e   : > { %v1076_v20 = vadd.f32 %v1075_v19, %v4801_v29  ;;  %2217 = vmatpush1.bf16.msra.mxu1 %v4049_v12  ;;  %v1113_v30 = vmax.f32 %v1072_v16, 0.0 }
 0x37f   : > { %v1114_v22 = vmax.f32 %v1074_v18, 0.0  ;;  %2218 = vmatprep.subr.bf16.mxu1 %v4054_v15  ;;  %v4118_v15 = vld [vmem:[#allocation8 + $0x8] sm:$0xff]   ;;  %v4119_v18 = vld [vmem:[#allocation8 + $0x50] sm:$0xff]  }
 0x380   : > { %v1115_v31 = vmax.f32 %v1076_v20, 0.0  ;;  %3499 = vmatpush3.bf16.msra.mxu0 %v4118_v15 }
 0x381   : > { %v1132_v32 = vpack.c.bf16 %v1114_v22, %v1112_v27  ;;  %v4072_v27 = vld [vmem:[#allocation7 + $0x114] ss:$8 sps:$4 sm:$0xff]   ;;  %3500 = vmatprep.subr.bf16.mxu0 %v4119_v18  ;;  %v4126_v18 = vld [vmem:[#allocation8 + $0x28] sm:$0xff]  }
 0x382   : > { %v1133_v33 = vpack.c.bf16 %v1115_v31, %v1113_v30  ;;  %v1079_v34 = vpop.f32.mrb[44].mxu0  ;;  %2219 = vmatpush1.bf16.msra.mxu1 %v4052_v21  ;;  %v4067_v21 = vld [vmem:[#allocation7 + $0x100] ss:$8 sps:$4 sm:$0xff]   ;;  %v4120_v30 = vld [vmem:[#allocation8 + $0x10] sm:$0xff]  }
 0x383   : > { %v1080_v36 = vadd.f32 %v1079_v34, %v4798_v28  ;;  %v1081_v37 = vpop.f32.mrb[45].mxu0  ;;  %2220 = vmatprep.subr.bf16.mxu1 %v4057_v25 }
 0x384   : > { %v1082_v39 = vadd.f32 %v1081_v37, %v4801_v29  ;;  %v1083_v40 = vpop.f32.mrb[46].mxu0  ;;  %1634 = vmatprep.mubr.bf16.mxu1 %v1133_v33  ;;  %1747 = vmatprep.mubr.bf16.mxu0 %v1133_v33  ;;  %v4121_v33 = vld [vmem:[#allocation8 + $0x58] sm:$0xff]  }
 0x385   : > { %v1084_v41 = vadd.f32 %v1083_v40, %v4798_v28  ;;  %v1085_v42 = vpop.f32.mrb[47].mxu0  ;;  %1635 = vmatmul.mubr.bf16.gmra.mrb[40].mxu1 %v1132_v32  ;;  %1748 = vmatmul.mubr.bf16.gmra.mrb[72].mxu0 %v1132_v32  ;;  %v1116_v45 = vmax.f32 %v1080_v36, 0.0  ;;  %v4063_v28 = vld [vmem:[#allocation7 + $0xe4] ss:$8 sps:$4 sm:$0xff]   ;;  %v4070_v36 = vld [vmem:[#allocation7 + $0x110] ss:$8 sps:$4 sm:$0xff]  }
 0x386   : > { %v1086_v43 = vadd.f32 %v1085_v42, %v4801_v29  ;;  %2221 = vmatpush1.bf16.msra.mxu1 %v4055_v35  ;;  %v1117_v47 = vmax.f32 %v1082_v39, 0.0  ;;  %v4064_v29 = vld [vmem:[#allocation7 + $0xf0] ss:$8 sps:$4 sm:$0xff]   ;;  %3501 = vmatpush3.bf16.msra.mxu0 %v4120_v30  ;;  %v4079_v30 = vld [vmem:[#allocation7 + $0x140] ss:$8 sps:$4 sm:$0xff]  }
 0x387   : > { %v1118_v46 = vmax.f32 %v1084_v41, 0.0  ;;  %2222 = vmatprep.subr.bf16.mxu1 %v4060_v38  ;;  %3502 = vmatprep.subr.bf16.mxu0 %v4121_v33 }
 0x388   : > { %v1119_v48 = vmax.f32 %v1086_v43, 0.0  ;;  %v4075_v43 = vld [vmem:[#allocation7 + $0x124] ss:$8 sps:$4 sm:$0xff]  }
 0x389   : > { %v1134_v49 = vpack.c.bf16 %v1118_v46, %v1116_v45 }
 0x38a   : > { %v1135_v50 = vpack.c.bf16 %v1119_v48, %v1117_v47  ;;  %2223 = vmatpush1.bf16.msra.mxu1 %v4058_v44  ;;  %v4122_v48 = vld [vmem:[#allocation8 + $0x18] sm:$0xff]  }
 0x38b   : > { %2224 = vmatprep.subr.bf16.mxu1 %v4063_v28  ;;  %v4123_v28 = vld [vmem:[#allocation8 + $0x60] sm:$0xff]   ;;  %3503 = vmatpush3.bf16.msra.mxu0 %v4122_v48 }
 0x38c   : > { %1644 = vmatprep.mubr.bf16.mxu1 %v1135_v50  ;;  %1757 = vmatprep.mubr.bf16.mxu0 %v1135_v50 }
 0x38d   : > { %1645 = vmatmul.mubr.bf16.gmra.mrb[44].mxu1 %v1134_v49  ;;  %1758 = vmatmul.mubr.bf16.gmra.mrb[76].mxu0 %v1134_v49 }
 0x38e   : > { %2225 = vmatpush1.bf16.msra.mxu1 %v4061_v51  ;;  %3504 = vmatprep.subr.bf16.mxu0 %v4123_v28  ;;  %v4087_v28 = vld [vmem:[#allocation7 + $0x164] ss:$8 sps:$4 sm:$0xff]  }
 0x38f   : > { %2226 = vmatprep.subr.bf16.mxu1 %v4066_v52  ;;  %3505 = vmatpush3.bf16.msra.mxu0 %v4124_v56 }
 0x392   : > { %2227 = vmatpush1.bf16.msra.mxu1 %v4064_v29  ;;  %v4073_v29 = vld [vmem:[#allocation7 + $0x120] ss:$8 sps:$4 sm:$0xff]  }
 0x393   : > { %2309 = vmatprep.subr.bf16.mxu1 %v4069_v53  ;;  %v4078_v53 = vld [vmem:[#allocation7 + $0x134] ss:$8 sps:$4 sm:$0xff]  }
 0x428   : > { %v1576_v60 = vpop.f32.mrb[16].mxu1  ;;  %v1689_v61 = vpop.f32.mrb[48].mxu0 }
 0x429   : > { %v1578_v0 = vpop.f32.mrb[17].mxu1  ;;  %v1691_v1 = vpop.f32.mrb[49].mxu0  ;;  %v1577_v23 = vadd.f32 %v1576_v60, %v4841_v58  ;;  %v4852_v6 = vadd.f32 %v1689_v61, %v4843_v59 }
 0x42a   : > { %v1580_v57 = vpop.f32.mrb[18].mxu1  ;;  %v1693_v5 = vpop.f32.mrb[50].mxu0  ;;  %v1579_v11 = vadd.f32 %v1578_v0, %v4846_v62  ;;  %v4860_v12 = vadd.f32 %v1691_v1, %v4848_v63  ;;  %v4125_v0 = vld [vmem:[#allocation8 + $0x68] sm:$0xff]  }
 0x42b   : > { %v1581_v7 = vadd.f32 %v1580_v57, %v4841_v58  ;;  %v4856_v8 = vadd.f32 %v1693_v5, %v4843_v59  ;;  %v1582_v9 = vpop.f32.mrb[19].mxu1  ;;  %v1695_v10 = vpop.f32.mrb[51].mxu0  ;;  %3506 = vmatprep.subr.bf16.mxu0 %v4125_v0  ;;  %v4085_v0 = vld [vmem:[#allocation7 + $0x160] ss:$8 sps:$4 sm:$0xff]  }
 0x42c   : > { %v1583_v13 = vadd.f32 %v1582_v9, %v4846_v62  ;;  %v4864_v14 = vadd.f32 %v1695_v10, %v4848_v63  ;;  %v4081_v10 = vld [vmem:[#allocation7 + $0x144] ss:$8 sps:$4 sm:$0xff]   ;;  %3507 = vmatpush3.bf16.msra.mxu0 %v4126_v18 }
 0x42d   : > { %v1768_v16 = vpack.c.bf16 %v1581_v7, %v1577_v23  ;;  %v1770_v17 = vpack.c.bf16 %v4856_v8, %v4852_v6  ;;  %v4130_v6 = vld [vmem:[#allocation8 + $0x38] sm:$0xff]   ;;  %v4131_v8 = vld [vmem:[#allocation10] sm:$0xff]  }
 0x42e   : > { %v1769_v19 = vpack.c.bf16 %v1583_v13, %v1579_v11  ;;  %v1771_v20 = vpack.c.bf16 %v4864_v14, %v4860_v12  ;;  %v1864_v12 = vld [vmem:[%s5178_s9 + $0x8] sm:$0x3] }
 0x42f   : > { %v5032_v14 = vrot.slane %v1864_v12, %v4789_v24 }
 0x430   : > { %v1586_v22 = vpop.f32.mrb[20].mxu1  ;;  %v1699_v25 = vpop.f32.mrb[52].mxu0  ;;  %2228 = vmatprep.mubr.bf16.mxu1 %v1769_v19 }
 0x431   : > { %v1588_v31 = vpop.f32.mrb[21].mxu1  ;;  %v1701_v32 = vpop.f32.mrb[53].mxu0  ;;  %2229 = vmatmul.mubr.bf16.vlgmr.msra.gmra.mrb[48].mxu1 %v1768_v16  ;;  %v1587_v37 = vadd.f32 %v1586_v22, %v4841_v58  ;;  %v4872_v38 = vadd.f32 %v1699_v25, %v4843_v59 }
 0x432   : > { %2310 = vmatpush1.bf16.msra.mxu1 %v4067_v21  ;;  %v1590_v34 = vpop.f32.mrb[22].mxu1  ;;  %v1703_v35 = vpop.f32.mrb[54].mxu0  ;;  %v1589_v44 = vadd.f32 %v1588_v31, %v4846_v62  ;;  %v4880_v45 = vadd.f32 %v1701_v32, %v4848_v63  ;;  %v4084_v31 = vld [vmem:[#allocation7 + $0x154] ss:$8 sps:$4 sm:$0xff]  }
 0x433   : > { %v1591_v39 = vadd.f32 %v1590_v34, %v4841_v58  ;;  %v4876_v40 = vadd.f32 %v1703_v35, %v4843_v59  ;;  %v1592_v41 = vpop.f32.mrb[23].mxu1  ;;  %v1705_v42 = vpop.f32.mrb[55].mxu0  ;;  %2311 = vmatprep.subr.bf16.mxu1 %v4072_v27  ;;  %v4127_v27 = vld [vmem:[#allocation8 + $0x70] sm:$0xff]  }
 0x434   : > { %v1593_v46 = vadd.f32 %v1592_v41, %v4846_v62  ;;  %v4884_v47 = vadd.f32 %v1705_v42, %v4848_v63  ;;  %v4128_v34 = vld [vmem:[#allocation8 + $0x30] sm:$0xff]   ;;  %3508 = vmatprep.subr.bf16.mxu0 %v4127_v27 }
 0x435   : > { %v1772_v49 = vpack.c.bf16 %v1591_v39, %v1587_v37  ;;  %v1774_v50 = vpack.c.bf16 %v4876_v40, %v4872_v38  ;;  %v4082_v41 = vld [vmem:[#allocation7 + $0x150] ss:$8 sps:$4 sm:$0xff]   ;;  %3509 = vmatpush3.bf16.msra.mxu0 %v4128_v34 }
 0x436   : > { %v1773_v51 = vpack.c.bf16 %v1593_v46, %v1589_v44  ;;  %v1775_v52 = vpack.c.bf16 %v4884_v47, %v4880_v45  ;;  %2312 = vmatpush1.bf16.msra.mxu1 %v4070_v36 }
 0x437   : > { %2313 = vmatprep.subr.bf16.mxu1 %v4075_v43 }
 0x438   : > { %v1596_v54 = vpop.f32.mrb[24].mxu1  ;;  %v1709_v55 = vpop.f32.mrb[56].mxu0  ;;  %2238 = vmatprep.mubr.bf16.mxu1 %v1773_v51 }
 0x439   : > { %v1598_v60 = vpop.f32.mrb[25].mxu1  ;;  %v1711_v61 = vpop.f32.mrb[57].mxu0  ;;  %2239 = vmatmul.mubr.bf16.gmra.mrb[52].mxu1 %v1772_v49  ;;  %v1597_v4 = vadd.f32 %v1596_v54, %v4841_v58  ;;  %v4892_v57 = vadd.f32 %v1709_v55, %v4843_v59 }
 0x43a   : > { %2314 = vmatpush1.bf16.msra.mxu1 %v4073_v29  ;;  %v1600_v1 = vpop.f32.mrb[26].mxu1  ;;  %v1713_v2 = vpop.f32.mrb[58].mxu0  ;;  %v1599_v11 = vadd.f32 %v1598_v60, %v4846_v62  ;;  %v4900_v13 = vadd.f32 %v1711_v61, %v4848_v63 }
 0x43b   : > { %v1601_v5 = vadd.f32 %v1600_v1, %v4841_v58  ;;  %v4896_v23 = vadd.f32 %v1713_v2, %v4843_v59  ;;  %v1602_v7 = vpop.f32.mrb[27].mxu1  ;;  %v1715_v9 = vpop.f32.mrb[59].mxu0  ;;  %2315 = vmatprep.subr.bf16.mxu1 %v4078_v53  ;;  %v4090_v1 = vld [vmem:[#allocation7 + $0x174] ss:$8 sps:$4 sm:$0xff]  }
 0x43c   : > { %v1603_v15 = vadd.f32 %v1602_v7, %v4846_v62  ;;  %v4904_v16 = vadd.f32 %v1715_v9, %v4848_v63 }
 0x43d   : > { %v1776_v19 = vpack.c.bf16 %v1601_v5, %v1597_v4  ;;  %v1778_v21 = vpack.c.bf16 %v4896_v23, %v4892_v57 }
 0x43e   : > { %v1777_v22 = vpack.c.bf16 %v1603_v15, %v1599_v11  ;;  %v1779_v25 = vpack.c.bf16 %v4904_v16, %v4900_v13  ;;  %2316 = vmatpush1.bf16.msra.mxu1 %v4076_v3 }
 0x43f   : > { %2317 = vmatprep.subr.bf16.mxu1 %v4081_v10  ;;  %v4088_v10 = vld [vmem:[#allocation7 + $0x170] ss:$8 sps:$4 sm:$0xff]  }
 0x440   : > { %v1606_v32 = vpop.f32.mrb[28].mxu1  ;;  %v1719_v33 = vpop.f32.mrb[60].mxu0  ;;  %2248 = vmatprep.mubr.bf16.mxu1 %v1777_v22 }
 0x441   : > { %v1608_v35 = vpop.f32.mrb[29].mxu1  ;;  %v1721_v36 = vpop.f32.mrb[61].mxu0  ;;  %2249 = vmatmul.mubr.bf16.gmra.mrb[56].mxu1 %v1776_v19  ;;  %v1607_v42 = vadd.f32 %v1606_v32, %v4841_v58  ;;  %v4912_v43 = vadd.f32 %v1719_v33, %v4843_v59 }
 0x442   : > { %2318 = vmatpush1.bf16.msra.mxu1 %v4079_v30  ;;  %v1610_v37 = vpop.f32.mrb[30].mxu1  ;;  %v1723_v39 = vpop.f32.mrb[62].mxu0  ;;  %v1609_v51 = vadd.f32 %v1608_v35, %v4846_v62  ;;  %v4920_v29 = vadd.f32 %v1721_v36, %v4848_v63  ;;  %v4093_v30 = vld [vmem:[#allocation7 + $0x184] ss:$8 sps:$4 sm:$0xff]  }
 0x443   : > { %v1611_v44 = vadd.f32 %v1610_v37, %v4841_v58  ;;  %v4916_v46 = vadd.f32 %v1723_v39, %v4843_v59  ;;  %v1612_v48 = vpop.f32.mrb[31].mxu1  ;;  %v1725_v49 = vpop.f32.mrb[63].mxu0  ;;  %2319 = vmatprep.subr.bf16.mxu1 %v4084_v31 }
 0x444   : > { %v1613_v53 = vadd.f32 %v1612_v48, %v4846_v62  ;;  %v4924_v54 = vadd.f32 %v1725_v49, %v4848_v63 }
 0x445   : > { %v1780_v55 = vpack.c.bf16 %v1611_v44, %v1607_v42  ;;  %v1782_v56 = vpack.c.bf16 %v4916_v46, %v4912_v43  ;;  %v4096_v42 = vld [vmem:[#allocation7 + $0x194] ss:$8 sps:$4 sm:$0xff]  }
 0x446   : > { %v1781_v60 = vpack.c.bf16 %v1613_v53, %v1609_v51  ;;  %v1783_v61 = vpack.c.bf16 %v4924_v54, %v4920_v29  ;;  %2320 = vmatpush1.bf16.msra.mxu1 %v4082_v41  ;;  %v4091_v41 = vld [vmem:[#allocation7 + $0x180] ss:$8 sps:$4 sm:$0xff]  }
 0x447   : > { %2321 = vmatprep.subr.bf16.mxu1 %v4087_v28  ;;  %v4132_v29 = vld [vmem:[#allocation10 + $0x8] sm:$0xff]  }
 0x448   : > { %v1616_v2 = vpop.f32.mrb[32].mxu1  ;;  %v1729_v3 = vpop.f32.mrb[64].mxu0  ;;  %2258 = vmatprep.mubr.bf16.mxu1 %v1781_v60 }
 0x449   : > { %v1618_v4 = vpop.f32.mrb[33].mxu1  ;;  %v1731_v5 = vpop.f32.mrb[65].mxu0  ;;  %2259 = vmatmul.mubr.bf16.gmra.mrb[60].mxu1 %v1780_v55  ;;  %v1617_v11 = vadd.f32 %v1616_v2, %v4841_v58  ;;  %v4932_v15 = vadd.f32 %v1729_v3, %v4843_v59  ;;  %v4094_v55 = vld [vmem:[#allocation7 + $0x190] ss:$8 sps:$4 sm:$0xff]  }
 0x44a   : > { %2322 = vmatpush1.bf16.msra.mxu1 %v4085_v0  ;;  %v1620_v7 = vpop.f32.mrb[34].mxu1  ;;  %v1733_v9 = vpop.f32.mrb[66].mxu0  ;;  %v1619_v31 = vadd.f32 %v1618_v4, %v4846_v62  ;;  %v4940_v32 = vadd.f32 %v1731_v5, %v4848_v63  ;;  %v4099_v5 = vld [vmem:[#allocation7 + $0x1a4] ss:$8 sps:$4 sm:$0xff]  }
 0x44b   : > { %v1621_v18 = vadd.f32 %v1620_v7, %v4841_v58  ;;  %v4936_v19 = vadd.f32 %v1733_v9, %v4843_v59  ;;  %v1622_v27 = vpop.f32.mrb[35].mxu1  ;;  %v1735_v22 = vpop.f32.mrb[67].mxu0  ;;  %2323 = vmatprep.subr.bf16.mxu1 %v4090_v1 }
 0x44c   : > { %v1623_v33 = vadd.f32 %v1622_v27, %v4846_v62  ;;  %v4944_v34 = vadd.f32 %v1735_v22, %v4848_v63 }
 0x44d   : > { %v1784_v35 = vpack.c.bf16 %v1621_v18, %v1617_v11  ;;  %v1786_v36 = vpack.c.bf16 %v4936_v19, %v4932_v15 }
 0x44e   : > { %v1785_v37 = vpack.c.bf16 %v1623_v33, %v1619_v31  ;;  %v1787_v39 = vpack.c.bf16 %v4944_v34, %v4940_v32  ;;  %2324 = vmatpush1.bf16.msra.mxu1 %v4088_v10  ;;  %v4097_v31 = vld [vmem:[#allocation7 + $0x1a0] ss:$8 sps:$4 sm:$0xff]   ;;  %v4102_v33 = vld [vmem:[#allocation7 + $0x1b4] ss:$8 sps:$4 sm:$0xff]  }
 0x44f   : > { %2325 = vmatprep.subr.bf16.mxu1 %v4093_v30 }
 0x450   : > { %v1626_v44 = vpop.f32.mrb[36].mxu1  ;;  %v1739_v48 = vpop.f32.mrb[68].mxu0  ;;  %2268 = vmatprep.mubr.bf16.mxu1 %v1785_v37 }
 0x451   : > { %v1628_v49 = vpop.f32.mrb[37].mxu1  ;;  %v1741_v28 = vpop.f32.mrb[69].mxu0  ;;  %2269 = vmatmul.mubr.bf16.gmra.mrb[64].mxu1 %v1784_v35  ;;  %v1627_v60 = vadd.f32 %v1626_v44, %v4841_v58  ;;  %v4952_v0 = vadd.f32 %v1739_v48, %v4843_v59 }
 0x452   : > { %2326 = vmatpush1.bf16.msra.mxu1 %v4091_v41  ;;  %v1630_v51 = vpop.f32.mrb[38].mxu1  ;;  %v1743_v53 = vpop.f32.mrb[70].mxu0  ;;  %v1629_v7 = vadd.f32 %v1628_v49, %v4846_v62  ;;  %v4960_v9 = vadd.f32 %v1741_v28, %v4848_v63  ;;  %v4100_v49 = vld [vmem:[#allocation7 + $0x1b0] ss:$8 sps:$4 sm:$0xff]  }
 0x453   : > { %v1631_v1 = vadd.f32 %v1630_v51, %v4841_v58  ;;  %v4956_v2 = vadd.f32 %v1743_v53, %v4843_v59  ;;  %v1632_v3 = vpop.f32.mrb[39].mxu1  ;;  %v1745_v4 = vpop.f32.mrb[71].mxu0  ;;  %2327 = vmatprep.subr.bf16.mxu1 %v4096_v42 }
 0x454   : > { %v1633_v10 = vadd.f32 %v1632_v3, %v4846_v62  ;;  %v4964_v11 = vadd.f32 %v1745_v4, %v4848_v63  ;;  %v4105_v3 = vld [vmem:[#allocation7 + $0x1c4] ss:$8 sps:$4 sm:$0xff]  }
 0x455   : > { %v1788_v18 = vpack.c.bf16 %v1631_v1, %v1627_v60 }
 0x456   : > { %v1789_v22 = vpack.c.bf16 %v1633_v10, %v1629_v7  ;;  %v1791_v30 = vpack.c.bf16 %v4964_v11, %v4960_v9  ;;  %2328 = vmatpush1.bf16.msra.mxu1 %v4094_v55 }
 0x457   : > { %2329 = vmatprep.subr.bf16.mxu1 %v4099_v5 }
 0x458   : > { %v1636_v35 = vpop.f32.mrb[40].mxu1  ;;  %v1749_v37 = vpop.f32.mrb[72].mxu0  ;;  %2278 = vmatprep.mubr.bf16.mxu1 %v1789_v22 }
 0x459   : > { %v1638_v41 = vpop.f32.mrb[41].mxu1  ;;  %v1751_v42 = vpop.f32.mrb[73].mxu0  ;;  %2279 = vmatmul.mubr.bf16.gmra.mrb[68].mxu1 %v1788_v18  ;;  %v1637_v28 = vadd.f32 %v1636_v35, %v4841_v58  ;;  %v4972_v51 = vadd.f32 %v1749_v37, %v4843_v59  ;;  %v4103_v37 = vld [vmem:[#allocation7 + $0x1c0] ss:$8 sps:$4 sm:$0xff]  }
 0x45a   : > { %2330 = vmatpush1.bf16.msra.mxu1 %v4097_v31  ;;  %v1640_v44 = vpop.f32.mrb[42].mxu1  ;;  %v1753_v48 = vpop.f32.mrb[74].mxu0  ;;  %v1639_v4 = vadd.f32 %v1638_v41, %v4846_v62  ;;  %v1752_v5 = vadd.f32 %v1751_v42, %v4848_v63 }
 0x45b   : > { %v1641_v53 = vadd.f32 %v1640_v44, %v4841_v58  ;;  %v4976_v55 = vadd.f32 %v1753_v48, %v4843_v59  ;;  %v1642_v60 = vpop.f32.mrb[43].mxu1  ;;  %v1755_v1 = vpop.f32.mrb[75].mxu0  ;;  %2331 = vmatprep.subr.bf16.mxu1 %v4102_v33  ;;  %v4108_v44 = vld [vmem:[#allocation7 + $0x1d4] ss:$8 sps:$4 sm:$0xff]  }
 0x45c   : > { %v1643_v7 = vadd.f32 %v1642_v60, %v4846_v62  ;;  %v1756_v10 = vadd.f32 %v1755_v1, %v4848_v63  ;;  %v4106_v1 = vld [vmem:[#allocation7 + $0x1d0] ss:$8 sps:$4 sm:$0xff]  }
 0x45d   : > { %v1792_v18 = vpack.c.bf16 %v1641_v53, %v1637_v28  ;;  %v1794_v22 = vpack.c.bf16 %v4976_v55, %v4972_v51 }
 0x45e   : > { %v1793_v31 = vpack.c.bf16 %v1643_v7, %v1639_v4  ;;  %v1795_v35 = vpack.c.bf16 %v1756_v10, %v1752_v5  ;;  %2332 = vmatpush1.bf16.msra.mxu1 %v4100_v49  ;;  %v4111_v4 = vld [vmem:[#allocation7 + $0x1e4] ss:$8 sps:$4 sm:$0xff]  }
 0x45f   : > { %2333 = vmatprep.subr.bf16.mxu1 %v4105_v3 }
 0x460   : > { %v1646_v33 = vpop.f32.mrb[44].mxu1  ;;  %v1759_v48 = vpop.f32.mrb[76].mxu0  ;;  %2288 = vmatprep.mubr.bf16.mxu1 %v1793_v31 }
 0x461   : > { %v1648_v41 = vpop.f32.mrb[45].mxu1  ;;  %v1761_v27 = vpop.f32.mrb[77].mxu0  ;;  %2289 = vmatmul.mubr.bf16.gmra.mrb[72].mxu1 %v1792_v18  ;;  %v1647_v28 = vadd.f32 %v1646_v33, %v4841_v58  ;;  %v1760_v51 = vadd.f32 %v1759_v48, %v4843_v59 }
 0x462   : > { %2334 = vmatpush1.bf16.msra.mxu1 %v4103_v37  ;;  %v1650_v42 = vpop.f32.mrb[46].mxu1  ;;  %v1763_v60 = vpop.f32.mrb[78].mxu0  ;;  %v1649_v5 = vadd.f32 %v1648_v41, %v4846_v62  ;;  %v1762_v7 = vadd.f32 %v1761_v27, %v4848_v63  ;;  %v4112_v27 = vld [vmem:[#allocation7 + $0x1f0] ss:$8 sps:$4 sm:$0xff]  }
 0x463   : > { %v1651_v53 = vadd.f32 %v1650_v42, %v4841_v58  ;;  %v1764_v49 = vadd.f32 %v1763_v60, %v4843_v59  ;;  %v1652_v55 = vpop.f32.mrb[47].mxu1  ;;  %v1765_v3 = vpop.f32.mrb[79].mxu0  ;;  %2335 = vmatprep.subr.bf16.mxu1 %v4108_v44  ;;  %v4109_v58 = vld [vmem:[#allocation7 + $0x1e0] ss:$8 sps:$4 sm:$0xff]   ;;  %v4114_v59 = vld [vmem:[#allocation7 + $0x1f4] ss:$8 sps:$4 sm:$0xff]  }
 0x464   : > { %v1653_v10 = vadd.f32 %v1652_v55, %v4846_v62  ;;  %v1766_v18 = vadd.f32 %v1765_v3, %v4848_v63  ;;  %v5214_v62 = vpack.c.bf16 %v4956_v2, %v4952_v0  ;;  %v4129_v63 = vld [vmem:[#allocation8 + $0x78] sm:$0xff]  }
 0x465   : > { %v1796_v31 = vpack.c.bf16 %v1651_v53, %v1647_v28  ;;  %v1798_v37 = vpack.c.bf16 %v1764_v49, %v1760_v51  ;;  %3510 = vmatprep.subr.bf16.mxu0 %v4129_v63 }
 0x466   : > { %v1797_v33 = vpack.c.bf16 %v1653_v10, %v1649_v5  ;;  %v1799_v48 = vpack.c.bf16 %v1766_v18, %v1762_v7  ;;  %2336 = vmatpush1.bf16.msra.mxu1 %v4106_v1  ;;  %3511 = vmatpush3.bf16.msra.mxu0 %v4130_v6 }
 0x467   : > { %2337 = vmatprep.subr.bf16.mxu1 %v4111_v4  ;;  %3644 = vmatprep.subr.bf16.mxu0 %v4131_v8 }
 0x468   : > { %2298 = vmatprep.mubr.bf16.mxu1 %v1797_v33 }
 0x469   : > { %2299 = vmatmul.mubr.bf16.gmra.mrb[76].mxu1 %v1796_v31 }
 0x46a   : > { %2338 = vmatpush1.bf16.msra.mxu1 %v4109_v58  ;;  %2341 = vmatprep.mubr.bf16.mxu1 %v1771_v20 }
 0x46b   : > { %2339 = vmatprep.subr.bf16.mxu1 %v4114_v59 }
 0x46e   : > { %2340 = vmatpush1.bf16.msra.mxu1 %v4112_v27 }
 0x471   : > { %2342 = vmatmul.mubr.bf16.vlgmr.msra.gmra.mrb[48].mxu1 %v1770_v17  ;;  %v5035_v17 = vrot.slane %v1864_v12, %v4795_v26 }
 0x472   : > { %2351 = vmatprep.mubr.bf16.mxu1 %v1775_v52 }
 0x479   : > { %2352 = vmatmul.mubr.bf16.gmra.mrb[52].mxu1 %v1774_v50 }
 0x47a   : > { %2361 = vmatprep.mubr.bf16.mxu1 %v1779_v25 }
 0x481   : > { %2362 = vmatmul.mubr.bf16.gmra.mrb[56].mxu1 %v1778_v21 }
 0x482   : > { %2371 = vmatprep.mubr.bf16.mxu1 %v1783_v61 }
 0x489   : > { %2372 = vmatmul.mubr.bf16.gmra.mrb[60].mxu1 %v1782_v56 }
 0x48a   : > { %2381 = vmatprep.mubr.bf16.mxu1 %v1787_v39 }
 0x491   : > { %2382 = vmatmul.mubr.bf16.gmra.mrb[64].mxu1 %v1786_v36  ;;  %v4133_v36 = vld [vmem:[#allocation10 + $0x10] sm:$0xff]  }
 0x492   : > { %2391 = vmatprep.mubr.bf16.mxu1 %v1791_v30 }
 0x499   : > { %2392 = vmatmul.mubr.bf16.gmra.mrb[68].mxu1 %v5214_v62 }
 0x49a   : > { %2401 = vmatprep.mubr.bf16.mxu1 %v1795_v35 }
 0x4a1   : > { %2402 = vmatmul.mubr.bf16.gmra.mrb[72].mxu1 %v1794_v22 }
 0x4a2   : > { %2411 = vmatprep.mubr.bf16.mxu1 %v1799_v48 }
 0x4a9   : > { %2412 = vmatmul.mubr.bf16.gmra.mrb[76].mxu1 %v1798_v37 }
 0x544   : > { %v2343_v20 = vpop.f32.mrb[48].mxu1 }
 0x545   : > { %v3708_v38 = vadd.f32 %v2343_v20, %v5032_v14  ;;  %v2345_v40 = vpop.f32.mrb[49].mxu1 }
 0x546   : > { %v3709_v45 = vadd.f32 %v2345_v40, %v5035_v17  ;;  %v2347_v47 = vpop.f32.mrb[50].mxu1 }
 0x547   : > { %v3710_v50 = vadd.f32 %v2347_v47, %v5032_v14  ;;  %v2349_v52 = vpop.f32.mrb[51].mxu1  ;;  %v2422_v23 = vmax.f32 %v3708_v38, 0.0 }
 0x548   : > { %v3711_v57 = vadd.f32 %v2349_v52, %v5035_v17  ;;  %v2423_v16 = vmax.f32 %v3709_v45, 0.0 }
 0x549   : > { %v2424_v13 = vmax.f32 %v3710_v50, 0.0 }
 0x54a   : > { %v2425_v24 = vmax.f32 %v3711_v57, 0.0 }
 0x54b   : > { %v2454_v21 = vpack.c.bf16 %v2424_v13, %v2422_v23 }
 0x54c   : > { %v2455_v25 = vpack.c.bf16 %v2425_v24, %v2423_v16  ;;  %v2353_v26 = vpop.f32.mrb[52].mxu1 }
 0x54d   : > { %v3712_v43 = vadd.f32 %v2353_v26, %v5032_v14  ;;  %v2355_v46 = vpop.f32.mrb[53].mxu1 }
 0x54e   : > { %v3713_v54 = vadd.f32 %v2355_v46, %v5035_v17  ;;  %v2357_v56 = vpop.f32.mrb[54].mxu1  ;;  %2637 = vmatprep.mubr.bf16.mxu0 %v2455_v25 }
 0x54f   : > { %v3714_v61 = vadd.f32 %v2357_v56, %v5032_v14  ;;  %v2359_v15 = vpop.f32.mrb[55].mxu1  ;;  %2638 = vmatmul.mubr.bf16.vlgmr.msra.gmra.mrb[80].mxu0 %v2454_v21  ;;  %v2426_v32 = vmax.f32 %v3712_v43, 0.0 }
 0x550   : > { %v3715_v19 = vadd.f32 %v2359_v15, %v5035_v17  ;;  %3645 = vmatpush3.bf16.msra.mxu0 %v4131_v8  ;;  %v2427_v39 = vmax.f32 %v3713_v54, 0.0 }
 0x551   : > { %v2428_v34 = vmax.f32 %v3714_v61, 0.0  ;;  %3646 = vmatprep.subr.bf16.mxu0 %v4132_v29 }
 0x552   : > { %v2429_v0 = vmax.f32 %v3715_v19, 0.0 }
 0x553   : > { %v2456_v2 = vpack.c.bf16 %v2428_v34, %v2426_v32 }
 0x554   : > { %v2457_v9 = vpack.c.bf16 %v2429_v0, %v2427_v39  ;;  %v2363_v11 = vpop.f32.mrb[56].mxu1  ;;  %3647 = vmatpush3.bf16.msra.mxu0 %v4132_v29 }
 0x555   : > { %v3716_v30 = vadd.f32 %v2363_v11, %v5032_v14  ;;  %v2365_v22 = vpop.f32.mrb[57].mxu1  ;;  %3648 = vmatprep.subr.bf16.mxu0 %v4133_v36 }
 0x556   : > { %v3717_v35 = vadd.f32 %v2365_v22, %v5035_v17  ;;  %v2367_v44 = vpop.f32.mrb[58].mxu1  ;;  %2645 = vmatprep.mubr.bf16.mxu0 %v2457_v9 }
 0x557   : > { %v3718_v41 = vadd.f32 %v2367_v44, %v5032_v14  ;;  %v2369_v42 = vpop.f32.mrb[59].mxu1  ;;  %2646 = vmatmul.mubr.bf16.gmra.mrb[84].mxu0 %v2456_v2  ;;  %v2430_v1 = vmax.f32 %v3716_v30, 0.0 }
 0x558   : > { %v3719_v60 = vadd.f32 %v2369_v42, %v5035_v17  ;;  %3649 = vmatpush3.bf16.msra.mxu0 %v4133_v36  ;;  %v2431_v51 = vmax.f32 %v3717_v35, 0.0 }
 0x559   : > { %v2432_v28 = vmax.f32 %v3718_v41, 0.0 }
 0x55a   : > { %v2433_v53 = vmax.f32 %v3719_v60, 0.0 }
 0x55b   : > { %v2458_v49 = vpack.c.bf16 %v2432_v28, %v2430_v1 }
 0x55c   : > { %v2459_v55 = vpack.c.bf16 %v2433_v53, %v2431_v51  ;;  %v2373_v3 = vpop.f32.mrb[60].mxu1 }
 0x55d   : > { %v3720_v4 = vadd.f32 %v2373_v3, %v5032_v14  ;;  %v2375_v5 = vpop.f32.mrb[61].mxu1 }
 0x55e   : > { %v3721_v7 = vadd.f32 %v2375_v5, %v5035_v17  ;;  %v2377_v10 = vpop.f32.mrb[62].mxu1  ;;  %2653 = vmatprep.mubr.bf16.mxu0 %v2459_v55 }
 0x55f   : > { %v3722_v18 = vadd.f32 %v2377_v10, %v5032_v14  ;;  %v2379_v31 = vpop.f32.mrb[63].mxu1  ;;  %2654 = vmatmul.mubr.bf16.gmra.mrb[88].mxu0 %v2458_v49  ;;  %v2434_v33 = vmax.f32 %v3720_v4, 0.0 }
 0x560   : > { %v3723_v37 = vadd.f32 %v2379_v31, %v5035_v17  ;;  %v2435_v58 = vmax.f32 %v3721_v7, 0.0 }
 0x561   : > { %v2436_v48 = vmax.f32 %v3722_v18, 0.0 }
 0x562   : > { %v2437_v59 = vmax.f32 %v3723_v37, 0.0 }
 0x563   : > { %v2460_v27 = vpack.c.bf16 %v2436_v48, %v2434_v33  ;;  %v4134_v33 = vld [vmem:[#allocation10 + $0x18] sm:$0xff]   ;;  %v4135_v48 = vld [vmem:[#allocation10 + $0x20] sm:$0xff]  }
 0x564   : > { %v2461_v62 = vpack.c.bf16 %v2437_v59, %v2435_v58  ;;  %v2383_v63 = vpop.f32.mrb[64].mxu1  ;;  %3650 = vmatprep.subr.bf16.mxu0 %v4134_v33  ;;  %v4136_v58 = vld [vmem:[#allocation10 + $0x28] sm:$0xff]   ;;  %v4139_v59 = vld [vmem:[#allocation11] sm:$0xff]  }
 0x565   : > { %v3724_v6 = vadd.f32 %v2383_v63, %v5032_v14  ;;  %v2385_v8 = vpop.f32.mrb[65].mxu1  ;;  %3651 = vmatpush3.bf16.msra.mxu0 %v4134_v33 }
 0x566   : > { %v3725_v12 = vadd.f32 %v2385_v8, %v5035_v17  ;;  %v2387_v20 = vpop.f32.mrb[66].mxu1  ;;  %2661 = vmatprep.mubr.bf16.mxu0 %v2461_v62  ;;  %3652 = vmatprep.subr.bf16.mxu0 %v4135_v48  ;;  %v5072_v62 = vld [vmem:[%s5178_s9 + $0xa] ss:$0 sm:$0xff] }
 0x567   : > { %v3726_v38 = vadd.f32 %v2387_v20, %v5032_v14  ;;  %v2389_v40 = vpop.f32.mrb[67].mxu1  ;;  %2662 = vmatmul.mubr.bf16.gmra.mrb[92].mxu0 %v2460_v27  ;;  %v2438_v47 = vmax.f32 %v3724_v6, 0.0 }
 0x568   : > { %v3727_v45 = vadd.f32 %v2389_v40, %v5035_v17  ;;  %v2439_v52 = vmax.f32 %v3725_v12, 0.0 }
 0x569   : > { %v2440_v50 = vmax.f32 %v3726_v38, 0.0  ;;  %3653 = vmatpush3.bf16.msra.mxu0 %v4135_v48 }
 0x56a   : > { %v2441_v57 = vmax.f32 %v3727_v45, 0.0  ;;  %3654 = vmatprep.subr.bf16.mxu0 %v4136_v58 }
 0x56b   : > { %v2462_v23 = vpack.c.bf16 %v2440_v50, %v2438_v47 }
 0x56c   : > { %v2463_v13 = vpack.c.bf16 %v2441_v57, %v2439_v52  ;;  %v2393_v16 = vpop.f32.mrb[68].mxu1 }
 0x56d   : > { %v3728_v24 = vadd.f32 %v2393_v16, %v5032_v14  ;;  %v2395_v21 = vpop.f32.mrb[69].mxu1  ;;  %3655 = vmatpush3.bf16.msra.mxu0 %v4136_v58 }
 0x56e   : > { %v3729_v25 = vadd.f32 %v2395_v21, %v5035_v17  ;;  %v2397_v26 = vpop.f32.mrb[70].mxu1  ;;  %2669 = vmatprep.mubr.bf16.mxu0 %v2463_v13 }
 0x56f   : > { %v3730_v43 = vadd.f32 %v2397_v26, %v5032_v14  ;;  %v2399_v46 = vpop.f32.mrb[71].mxu1  ;;  %2670 = vmatmul.mubr.bf16.gmra.mrb[96].mxu0 %v2462_v23  ;;  %v2442_v54 = vmax.f32 %v3728_v24, 0.0 }
 0x570   : > { %v3731_v29 = vadd.f32 %v2399_v46, %v5035_v17  ;;  %v2443_v61 = vmax.f32 %v3729_v25, 0.0 }
 0x571   : > { %v2444_v56 = vmax.f32 %v3730_v43, 0.0 }
 0x572   : > { %v2445_v15 = vmax.f32 %v3731_v29, 0.0 }
 0x573   : > { %v2464_v19 = vpack.c.bf16 %v2444_v56, %v2442_v54 }
 0x574   : > { %v2465_v32 = vpack.c.bf16 %v2445_v15, %v2443_v61  ;;  %v2403_v34 = vpop.f32.mrb[72].mxu1  ;;  %v4140_v15 = vld [vmem:[#allocation11 + $0x8] sm:$0xff]  }
 0x575   : > { %v3732_v36 = vadd.f32 %v2403_v34, %v5032_v14  ;;  %v2405_v39 = vpop.f32.mrb[73].mxu1 }
 0x576   : > { %v3733_v0 = vadd.f32 %v2405_v39, %v5035_v17  ;;  %v2407_v2 = vpop.f32.mrb[74].mxu1  ;;  %2677 = vmatprep.mubr.bf16.mxu0 %v2465_v32  ;;  %v4141_v39 = vld [vmem:[#allocation11 + $0x10] sm:$0xff]  }
 0x577   : > { %v3734_v9 = vadd.f32 %v2407_v2, %v5032_v14  ;;  %v2409_v11 = vpop.f32.mrb[75].mxu1  ;;  %2678 = vmatmul.mubr.bf16.gmra.mrb[100].mxu0 %v2464_v19  ;;  %v2446_v22 = vmax.f32 %v3732_v36, 0.0 }
 0x578   : > { %v3735_v30 = vadd.f32 %v2409_v11, %v5035_v17  ;;  %v2447_v44 = vmax.f32 %v3733_v0, 0.0 }
 0x579   : > { %v2448_v35 = vmax.f32 %v3734_v9, 0.0 }
 0x57a   : > { %v2449_v41 = vmax.f32 %v3735_v30, 0.0 }
 0x57b   : > { %v2466_v42 = vpack.c.bf16 %v2448_v35, %v2446_v22 }
 0x57c   : > { %v2467_v60 = vpack.c.bf16 %v2449_v41, %v2447_v44  ;;  %v2413_v1 = vpop.f32.mrb[76].mxu1  ;;  %v4142_v44 = vld [vmem:[#allocation11 + $0x18] sm:$0xff]  }
 0x57d   : > { %v3736_v28 = vadd.f32 %v2413_v1, %v5032_v14  ;;  %v2415_v51 = vpop.f32.mrb[77].mxu1 }
 0x57e   : > { %v3737_v53 = vadd.f32 %v2415_v51, %v5035_v17  ;;  %v2417_v49 = vpop.f32.mrb[78].mxu1  ;;  %2685 = vmatprep.mubr.bf16.mxu0 %v2467_v60 }
 0x57f   : > { %v3738_v55 = vadd.f32 %v2417_v49, %v5032_v14  ;;  %v2419_v3 = vpop.f32.mrb[79].mxu1  ;;  %2686 = vmatmul.mubr.bf16.gmra.mrb[104].mxu0 %v2466_v42  ;;  %v2450_v5 = vmax.f32 %v3736_v28, 0.0  ;;  %v4137_v14 = vld [vmem:[#allocation10 + $0x30] sm:$0xff]   ;;  %v4143_v28 = vld [vmem:[#allocation11 + $0x20] sm:$0xff]  }
 0x580   : > { %v3739_v4 = vadd.f32 %v2419_v3, %v5035_v17  ;;  %v2451_v10 = vmax.f32 %v3737_v53, 0.0  ;;  %3656 = vmatprep.subr.bf16.mxu0 %v4137_v14  ;;  %v4138_v17 = vld [vmem:[#allocation10 + $0x38] sm:$0xff]  }
 0x581   : > { %v2452_v7 = vmax.f32 %v3738_v55, 0.0  ;;  %3657 = vmatpush3.bf16.msra.mxu0 %v4137_v14 }
 0x582   : > { %v2453_v18 = vmax.f32 %v3739_v4, 0.0  ;;  %3658 = vmatprep.subr.bf16.mxu0 %v4138_v17 }
 0x583   : > { %v2468_v31 = vpack.c.bf16 %v2452_v7, %v2450_v5  ;;  %v4144_v7 = vld [vmem:[#allocation11 + $0x28] sm:$0xff]  }
 0x584   : > { %v2469_v37 = vpack.c.bf16 %v2453_v18, %v2451_v10 }
 0x585   : > { %3659 = vmatpush3.bf16.msra.mxu0 %v4138_v17 }
 0x586   : > { %2693 = vmatprep.mubr.bf16.mxu0 %v2469_v37  ;;  %3676 = vmatprep.subr.bf16.mxu0 %v4139_v59 }
 0x587   : > { %2694 = vmatmul.mubr.bf16.gmra.mrb[108].mxu0 %v2468_v31 }
 0x622   : > { %v3512_v27 = vpop.f32.mrb[80].mxu0 }
 0x623   : > { %v3513_v63 = vpop.f32.mrb[81].mxu0 }
 0x624   : > { %v3514_v6 = vadd.f32 %v3513_v63, %v3512_v27  ;;  %v3515_v8 = vpop.f32.mrb[82].mxu0 }
 0x625   : > { %v3516_v12 = vpop.f32.mrb[83].mxu0 }
 0x626   : > { %v2640_v20 = vadd.f32 %v3514_v6, %v5072_v62  ;;  %v3517_v38 = vadd.f32 %v3516_v12, %v3515_v8 }
 0x628   : > { %v2643_v40 = vadd.f32 %v3517_v38, %v5072_v62  ;;  %v2702_v45 = vmax.f32 %v2640_v20, 0.0 }
 0x62a   : > { %v2703_v47 = vmax.f32 %v2643_v40, 0.0  ;;  %v3518_v50 = vpop.f32.mrb[84].mxu0 }
 0x62b   : > { %v3519_v52 = vpop.f32.mrb[85].mxu0 }
 0x62c   : > { %v3520_v57 = vadd.f32 %v3519_v52, %v3518_v50  ;;  %v3521_v23 = vpop.f32.mrb[86].mxu0  ;;  %v2718_v13 = vpack.c.bf16 %v2703_v47, %v2702_v45 }
 0x62d   : > { %v3522_v16 = vpop.f32.mrb[87].mxu0 }
 0x62e   : > { %v2648_v24 = vadd.f32 %v3520_v57, %v5072_v62  ;;  %v3523_v21 = vadd.f32 %v3522_v16, %v3521_v23  ;;  %3660 = vmatprep.mubr.bf16.mxu0 %v2718_v13 }
 0x630   : > { %v2651_v25 = vadd.f32 %v3523_v21, %v5072_v62  ;;  %v2704_v26 = vmax.f32 %v2648_v24, 0.0 }
 0x632   : > { %v2705_v43 = vmax.f32 %v2651_v25, 0.0  ;;  %v3524_v46 = vpop.f32.mrb[88].mxu0 }
 0x633   : > { %v3525_v29 = vpop.f32.mrb[89].mxu0 }
 0x634   : > { %v2719_v54 = vpack.c.bf16 %v2705_v43, %v2704_v26  ;;  %v3526_v56 = vadd.f32 %v3525_v29, %v3524_v46  ;;  %v3527_v61 = vpop.f32.mrb[90].mxu0 }
 0x635   : > { %v3528_v19 = vpop.f32.mrb[91].mxu0 }
 0x636   : > { %v2656_v32 = vadd.f32 %v3526_v56, %v5072_v62  ;;  %v3529_v34 = vadd.f32 %v3528_v19, %v3527_v61  ;;  %3661 = vmatmul.mubr.bf16.vlgmr.msra.gmra.mrb[112].mxu0 %v2719_v54 }
 0x637   : > { %3677 = vmatpush3.bf16.msra.mxu0 %v4139_v59 }
 0x638   : > { %v2659_v36 = vadd.f32 %v3529_v34, %v5072_v62  ;;  %3678 = vmatprep.subr.bf16.mxu0 %v4140_v15  ;;  %v2706_v0 = vmax.f32 %v2656_v32, 0.0 }
 0x63a   : > { %v2707_v2 = vmax.f32 %v2659_v36, 0.0  ;;  %v3530_v9 = vpop.f32.mrb[92].mxu0  ;;  %v4145_v36 = vld [vmem:[#allocation11 + $0x30] sm:$0xff]  }
 0x63b   : > { %v3531_v11 = vpop.f32.mrb[93].mxu0  ;;  %3679 = vmatpush3.bf16.msra.mxu0 %v4140_v15 }
 0x63c   : > { %v3532_v30 = vadd.f32 %v3531_v11, %v3530_v9  ;;  %v3533_v22 = vpop.f32.mrb[94].mxu0  ;;  %v2720_v35 = vpack.c.bf16 %v2707_v2, %v2706_v0  ;;  %3680 = vmatprep.subr.bf16.mxu0 %v4141_v39  ;;  %v3446_v0 = vld [vmem:[%s5178_s9 + $0xb] ss:$0 sm:$0xff] }
 0x63d   : > { %v3534_v41 = vpop.f32.mrb[95].mxu0 }
 0x63e   : > { %v2664_v42 = vadd.f32 %v3532_v30, %v5072_v62  ;;  %v3535_v60 = vadd.f32 %v3534_v41, %v3533_v22  ;;  %3664 = vmatprep.mubr.bf16.mxu0 %v2720_v35 }
 0x63f   : > { %3681 = vmatpush3.bf16.msra.mxu0 %v4141_v39  ;;  %v4146_v39 = vld [vmem:[#allocation11 + $0x38] sm:$0xff]  }
 0x640   : > { %v2667_v1 = vadd.f32 %v3535_v60, %v5072_v62  ;;  %3682 = vmatprep.subr.bf16.mxu0 %v4142_v44  ;;  %v2708_v51 = vmax.f32 %v2664_v42, 0.0 }
 0x642   : > { %v2709_v53 = vmax.f32 %v2667_v1, 0.0  ;;  %v3536_v49 = vpop.f32.mrb[96].mxu0 }
 0x643   : > { %v3537_v55 = vpop.f32.mrb[97].mxu0  ;;  %3683 = vmatpush3.bf16.msra.mxu0 %v4142_v44 }
 0x644   : > { %v3538_v3 = vadd.f32 %v3537_v55, %v3536_v49  ;;  %v3539_v4 = vpop.f32.mrb[98].mxu0  ;;  %v2721_v5 = vpack.c.bf16 %v2709_v53, %v2708_v51  ;;  %3684 = vmatprep.subr.bf16.mxu0 %v4143_v28 }
 0x645   : > { %v3540_v10 = vpop.f32.mrb[99].mxu0 }
 0x646   : > { %v2672_v18 = vadd.f32 %v3538_v3, %v5072_v62  ;;  %v3541_v31 = vadd.f32 %v3540_v10, %v3539_v4  ;;  %3665 = vmatmul.mubr.bf16.gmra.mrb[116].mxu0 %v2721_v5 }
 0x647   : > { %3685 = vmatpush3.bf16.msra.mxu0 %v4143_v28 }
 0x648   : > { %v2675_v37 = vadd.f32 %v3541_v31, %v5072_v62  ;;  %3686 = vmatprep.subr.bf16.mxu0 %v4144_v7  ;;  %v2710_v33 = vmax.f32 %v2672_v18, 0.0 }
 0x64a   : > { %v2711_v48 = vmax.f32 %v2675_v37, 0.0  ;;  %v3542_v58 = vpop.f32.mrb[100].mxu0 }
 0x64b   : > { %v3543_v14 = vpop.f32.mrb[101].mxu0  ;;  %3687 = vmatpush3.bf16.msra.mxu0 %v4144_v7 }
 0x64c   : > { %v3544_v17 = vadd.f32 %v3543_v14, %v3542_v58  ;;  %v3545_v59 = vpop.f32.mrb[102].mxu0  ;;  %v2722_v27 = vpack.c.bf16 %v2711_v48, %v2710_v33  ;;  %3688 = vmatprep.subr.bf16.mxu0 %v4145_v36 }
 0x64d   : > { %v3546_v63 = vpop.f32.mrb[103].mxu0 }
 0x64e   : > { %v2680_v6 = vadd.f32 %v3544_v17, %v5072_v62  ;;  %v3547_v8 = vadd.f32 %v3546_v63, %v3545_v59  ;;  %3668 = vmatprep.mubr.bf16.mxu0 %v2722_v27 }
 0x64f   : > { %3689 = vmatpush3.bf16.msra.mxu0 %v4145_v36 }
 0x650   : > { %v2683_v12 = vadd.f32 %v3547_v8, %v5072_v62  ;;  %v2712_v20 = vmax.f32 %v2680_v6, 0.0  ;;  %3690 = vmatprep.subr.bf16.mxu0 %v4146_v39 }
 0x652   : > { %v2713_v38 = vmax.f32 %v2683_v12, 0.0  ;;  %v3548_v40 = vpop.f32.mrb[104].mxu0 }
 0x653   : > { %v3549_v45 = vpop.f32.mrb[105].mxu0  ;;  %3691 = vmatpush3.bf16.msra.mxu0 %v4146_v39 }
 0x654   : > { %v3550_v47 = vadd.f32 %v3549_v45, %v3548_v40  ;;  %v3551_v50 = vpop.f32.mrb[106].mxu0  ;;  %v2723_v52 = vpack.c.bf16 %v2713_v38, %v2712_v20 }
 0x655   : > { %v3552_v57 = vpop.f32.mrb[107].mxu0 }
 0x656   : > { %v2688_v23 = vadd.f32 %v3550_v47, %v5072_v62  ;;  %v3553_v13 = vadd.f32 %v3552_v57, %v3551_v50  ;;  %3669 = vmatmul.mubr.bf16.gmra.mrb[120].mxu0 %v2723_v52 }
 0x658   : > { %v2691_v16 = vadd.f32 %v3553_v13, %v5072_v62  ;;  %v2714_v24 = vmax.f32 %v2688_v23, 0.0 }
 0x65a   : > { %v2715_v21 = vmax.f32 %v2691_v16, 0.0  ;;  %v3554_v25 = vpop.f32.mrb[108].mxu0 }
 0x65b   : > { %v3555_v26 = vpop.f32.mrb[109].mxu0 }
 0x65c   : > { %v3556_v43 = vadd.f32 %v3555_v26, %v3554_v25  ;;  %v3557_v46 = vpop.f32.mrb[110].mxu0  ;;  %v2724_v29 = vpack.c.bf16 %v2715_v21, %v2714_v24 }
 0x65d   : > { %v3558_v54 = vpop.f32.mrb[111].mxu0 }
 0x65e   : > { %v2696_v56 = vadd.f32 %v3556_v43, %v5072_v62  ;;  %v3559_v61 = vadd.f32 %v3558_v54, %v3557_v46  ;;  %3672 = vmatprep.mubr.bf16.mxu0 %v2724_v29 }
 0x660   : > { %v2699_v15 = vadd.f32 %v3559_v61, %v5072_v62  ;;  %v2716_v19 = vmax.f32 %v2696_v56, 0.0  ;;  %v3455_v61 = vld [vmem:[%s5178_s9 + $0xc] ss:$0 sm:$0xff] }
 0x662   : > { %v2717_v32 = vmax.f32 %v2699_v15, 0.0 }
 0x664   : > { %v2725_v34 = vpack.c.bf16 %v2717_v32, %v2716_v19 }
 0x666   : > { %3673 = vmatmul.mubr.bf16.gmra.mrb[124].mxu0 %v2725_v34 }
 0x709   : > { %v3662_v2 = vpop.f32.mrb[112].mxu0 }
 0x70a   : > { %v2840_v9 = vadd.f32 %v3662_v2, %v3446_v0  ;;  %v2831_v11 = vpop.f32.mrb[113].mxu0 }
 0x70b   : > { %v2832_v30 = vadd.f32 %v3446_v0, %v2831_v11  ;;  %v3663_v22 = vpop.f32.mrb[114].mxu0 }
 0x70c   : > { %v2843_v62 = vadd.f32 %v3663_v22, %v3446_v0  ;;  %v2834_v35 = vpop.f32.mrb[115].mxu0  ;;  %v2896_v41 = vmax.f32 %v2840_v9, 0.0 }
 0x70d   : > { %v2835_v44 = vadd.f32 %v3446_v0, %v2834_v35  ;;  %v2894_v60 = vmax.f32 %v2832_v30, 0.0 }
 0x70e   : > { %v2897_v42 = vmax.f32 %v2843_v62, 0.0 }
 0x70f   : > { %v2895_v1 = vmax.f32 %v2835_v44, 0.0 }
 0x710   : > { %v2911_v28 = vpack.c.bf16 %v2897_v42, %v2896_v41 }
 0x711   : > { %v2910_v51 = vpack.c.bf16 %v2895_v1, %v2894_v60 }
 0x713   : > { %3692 = vmatprep.mubr.bf16.mxu0 %v2910_v51 }
 0x714   : > { %3693 = vmatmul.mubr.bf16.vlgmr.msra.gmra.mrb[128].mxu0 %v2911_v28 }
 0x719   : > { %v3666_v53 = vpop.f32.mrb[116].mxu0 }
 0x71a   : > { %v2856_v49 = vadd.f32 %v3666_v53, %v3446_v0  ;;  %v2847_v55 = vpop.f32.mrb[117].mxu0 }
 0x71b   : > { %v2848_v3 = vadd.f32 %v3446_v0, %v2847_v55  ;;  %v3667_v4 = vpop.f32.mrb[118].mxu0 }
 0x71c   : > { %v2859_v5 = vadd.f32 %v3667_v4, %v3446_v0  ;;  %v2850_v7 = vpop.f32.mrb[119].mxu0  ;;  %v2900_v18 = vmax.f32 %v2856_v49, 0.0 }
 0x71d   : > { %v2851_v10 = vadd.f32 %v3446_v0, %v2850_v7  ;;  %v2898_v37 = vmax.f32 %v2848_v3, 0.0 }
 0x71e   : > { %v2901_v31 = vmax.f32 %v2859_v5, 0.0 }
 0x71f   : > { %v2899_v33 = vmax.f32 %v2851_v10, 0.0 }
 0x720   : > { %v2913_v48 = vpack.c.bf16 %v2901_v31, %v2900_v18 }
 0x721   : > { %v2912_v58 = vpack.c.bf16 %v2899_v33, %v2898_v37 }
 0x723   : > { %3696 = vmatprep.mubr.bf16.mxu0 %v2912_v58 }
 0x724   : > { %3697 = vmatmul.mubr.bf16.gmra.mrb[132].mxu0 %v2913_v48 }
 0x729   : > { %v3670_v14 = vpop.f32.mrb[120].mxu0 }
 0x72a   : > { %v2872_v17 = vadd.f32 %v3670_v14, %v3446_v0  ;;  %v2863_v59 = vpop.f32.mrb[121].mxu0 }
 0x72b   : > { %v2864_v27 = vadd.f32 %v3446_v0, %v2863_v59  ;;  %v3671_v63 = vpop.f32.mrb[122].mxu0 }
 0x72c   : > { %v2875_v6 = vadd.f32 %v3671_v63, %v3446_v0  ;;  %v2866_v8 = vpop.f32.mrb[123].mxu0  ;;  %v2904_v20 = vmax.f32 %v2872_v17, 0.0 }
 0x72d   : > { %v2867_v12 = vadd.f32 %v3446_v0, %v2866_v8  ;;  %v2902_v40 = vmax.f32 %v2864_v27, 0.0 }
 0x72e   : > { %v2905_v38 = vmax.f32 %v2875_v6, 0.0 }
 0x72f   : > { %v2903_v45 = vmax.f32 %v2867_v12, 0.0 }
 0x730   : > { %v2915_v47 = vpack.c.bf16 %v2905_v38, %v2904_v20 }
 0x731   : > { %v2914_v50 = vpack.c.bf16 %v2903_v45, %v2902_v40 }
 0x733   : > { %3700 = vmatprep.mubr.bf16.mxu0 %v2914_v50 }
 0x734   : > { %3701 = vmatmul.mubr.bf16.gmra.mrb[136].mxu0 %v2915_v47 }
 0x739   : > { %v3674_v52 = vpop.f32.mrb[124].mxu0 }
 0x73a   : > { %v2888_v57 = vadd.f32 %v3674_v52, %v3446_v0  ;;  %v2879_v23 = vpop.f32.mrb[125].mxu0 }
 0x73b   : > { %v2880_v13 = vadd.f32 %v3446_v0, %v2879_v23  ;;  %v3675_v16 = vpop.f32.mrb[126].mxu0 }
 0x73c   : > { %v2891_v24 = vadd.f32 %v3675_v16, %v3446_v0  ;;  %v2882_v21 = vpop.f32.mrb[127].mxu0  ;;  %v2908_v26 = vmax.f32 %v2888_v57, 0.0 }
 0x73d   : > { %v2883_v25 = vadd.f32 %v3446_v0, %v2882_v21  ;;  %v2906_v46 = vmax.f32 %v2880_v13, 0.0 }
 0x73e   : > { %v2909_v43 = vmax.f32 %v2891_v24, 0.0 }
 0x73f   : > { %v2907_v29 = vmax.f32 %v2883_v25, 0.0 }
 0x740   : > { %v2917_v54 = vpack.c.bf16 %v2909_v43, %v2908_v26 }
 0x741   : > { %v2916_v56 = vpack.c.bf16 %v2907_v29, %v2906_v46 }
 0x743   : > { %3704 = vmatprep.mubr.bf16.mxu0 %v2916_v56 }
 0x744   : > { %3705 = vmatmul.mubr.bf16.gmra.mrb[140].mxu0 %v2917_v54 }
 0x7e7   : > { %v3694_v15 = vpop.f32.mrb[128].mxu0 }
 0x7e8   : > { %v3032_v19 = vadd.f32 %v3694_v15, %v3455_v61  ;;  %v3023_v32 = vpop.f32.mrb[129].mxu0 }
 0x7e9   : > { %v3024_v34 = vadd.f32 %v3455_v61, %v3023_v32  ;;  %v3695_v36 = vpop.f32.mrb[130].mxu0 }
 0x7ea   : > { %3088 = vst [vmem:[%s5099_s13 + $0x10] sm:$0xff] %v3032_v19  ;;  %v3035_v39 = vadd.f32 %v3695_v36, %v3455_v61  ;;  %v3026_v0 = vpop.f32.mrb[131].mxu0 }
 0x7eb   : > { %3086 = vst [vmem:[%s5099_s13] sm:$0xff] %v3024_v34  ;;  %v3027_v2 = vadd.f32 %v3455_v61, %v3026_v0 }
 0x7ec   : > { %3089 = vst [vmem:[%s5099_s13 + $0x18] sm:$0xff] %v3035_v39 }
 0x7ed   : > { %3087 = vst [vmem:[%s5099_s13 + $0x8] sm:$0xff] %v3027_v2 }
 0x7f7   : > { %v3698_v9 = vpop.f32.mrb[132].mxu0 }
 0x7f8   : > { %v3048_v11 = vadd.f32 %v3698_v9, %v3455_v61  ;;  %v3039_v30 = vpop.f32.mrb[133].mxu0 }
 0x7f9   : > { %v3040_v22 = vadd.f32 %v3455_v61, %v3039_v30  ;;  %v3699_v62 = vpop.f32.mrb[134].mxu0 }
 0x7fa   : > { %3092 = vst [vmem:[%s5099_s13 + $0x30] sm:$0xff] %v3048_v11  ;;  %v3051_v35 = vadd.f32 %v3699_v62, %v3455_v61  ;;  %v3042_v44 = vpop.f32.mrb[135].mxu0 }
 0x7fb   : > { %3090 = vst [vmem:[%s5099_s13 + $0x20] sm:$0xff] %v3040_v22  ;;  %v3043_v41 = vadd.f32 %v3455_v61, %v3042_v44 }
 0x7fc   : > { %3093 = vst [vmem:[%s5099_s13 + $0x38] sm:$0xff] %v3051_v35 }
 0x7fd   : > { %3091 = vst [vmem:[%s5099_s13 + $0x28] sm:$0xff] %v3043_v41 }
 0x807   : > { %v3702_v42 = vpop.f32.mrb[136].mxu0 }
 0x808   : > { %v3064_v60 = vadd.f32 %v3702_v42, %v3455_v61  ;;  %v3055_v1 = vpop.f32.mrb[137].mxu0 }
 0x809   : > { %v3056_v28 = vadd.f32 %v3455_v61, %v3055_v1  ;;  %v3703_v51 = vpop.f32.mrb[138].mxu0 }
 0x80a   : > { %3096 = vst [vmem:[%s5099_s13 + $0x50] sm:$0xff] %v3064_v60  ;;  %v3067_v53 = vadd.f32 %v3703_v51, %v3455_v61  ;;  %v3058_v49 = vpop.f32.mrb[139].mxu0 }
 0x80b   : > { %3094 = vst [vmem:[%s5099_s13 + $0x40] sm:$0xff] %v3056_v28  ;;  %v3059_v55 = vadd.f32 %v3455_v61, %v3058_v49 }
 0x80c   : > { %3097 = vst [vmem:[%s5099_s13 + $0x58] sm:$0xff] %v3067_v53 }
 0x80d   : > { %3095 = vst [vmem:[%s5099_s13 + $0x48] sm:$0xff] %v3059_v55 }
 0x817   : > { %v3706_v3 = vpop.f32.mrb[140].mxu0 }
 0x818   : > { %v3080_v4 = vadd.f32 %v3706_v3, %v3455_v61  ;;  %v3071_v5 = vpop.f32.mrb[141].mxu0 }
 0x819   : > { %v3072_v7 = vadd.f32 %v3455_v61, %v3071_v5  ;;  %v3707_v10 = vpop.f32.mrb[142].mxu0 }
 0x81a   : > { %3100 = vst [vmem:[%s5099_s13 + $0x70] sm:$0xff] %v3080_v4  ;;  %v3083_v18 = vadd.f32 %v3707_v10, %v3455_v61  ;;  %v3074_v31 = vpop.f32.mrb[143].mxu0 }
 0x81b   : > { %3098 = vst [vmem:[%s5099_s13 + $0x60] sm:$0xff] %v3072_v7  ;;  %v3075_v37 = vadd.f32 %v3455_v61, %v3074_v31 }
 0x81c   : > { %3101 = vst [vmem:[%s5099_s13 + $0x78] sm:$0xff] %v3083_v18 }
 0x81d   : > { %3099 = vst [vmem:[%s5099_s13 + $0x68] sm:$0xff] %v3075_v37 }
 0x81e   : > { %4328 = shalt.err (!%p4325_p9)
}
 0x81f   : > { %s4329_s16 = scalar_lea.hbm %s5119_s18, 2048  ;;  %s4333_s28 = scalar_lea.hbm %s5215_s22, 4096 }
 0x820   : > { %p4330_p10 = scmp.ne.s32.totalorder %s5119_s18, %s4329_s16  ;;  %p4334_p1 = scmp.lt.u32.totalorder %s5119_s18, %s5215_s22 }
 0x821   : > { %p4335_p2 = scmp.lt.u32.totalorder %s4333_s28, %s4329_s16  ;;  %p4337_p4 = scmp.lt.u32.totalorder %s4329_s16, %s5119_s18 }
 0x822   : > { %p4331_p13 = pnand %p4330_p10, %p5216_p7 }
 0x823   : > { %p4336_p3 = por %p4335_p2, %p4334_p1 }
 0x824   : > { %p4332_p12 = pneg %p4331_p13 }
 0x825   : > { %p4338_p8 = por %p4337_p4, %p4336_p3 }
 0x827   : > { %p4339_p11 = pnand %p4338_p8, %p4332_p12 }
 0x829   : > { %4342 = shalt.err (!%p4339_p11)
}
 0x82a   : > { %s4409_s15 = smov 128   ;;  %s4410_s13 = smov 8  }
 0x82b   : > { %3796 = dma.vmem_to_hbm [thread:$0]  (%p5216_p7), %s5121_s10, 2048, %s5119_s18, %s5128_s17, %s4409_s15, %s4409_s15, %s4410_s13  }
 0x82c PF: > { %s5217_s30 = sld [smem:[#allocation21_spill]]  ;;  %s5218_s24 = sld [smem:[#allocation19_spill]] }
 0x82d   : > { %s5219_s12 = sld [smem:[#allocation24_spill]] }
 0x832   : > { %p3833_p5 = scmp.ge.s32.totalorder %s5217_s30, 2  ;;  %s3131_s21 = sand.u32 1, %s5218_s24  }
 0x833   : > { %p5220_p0 = scmp.ne.s32.totalorder %s5219_s12, 0  ;;  %s3132_s20 = scalar_lea.sflag [#allocation4], %s3131_s21 }
 0x835   : > { %p3818_p6 = pnand %p3833_p5, %p5220_p0 }
 0x837   : > { %4376 = dma.done.wait (!%p3818_p6), %s3132_s20, 2048  }
 0x838   : > { %4378 = vsyncadd (!%p3818_p6), %s3132_s20, 4294965248  ;;  %s5221_s16 = sld [smem:[#allocation22_spill]]  ;;  %s5222_s27 = sld [smem:[#allocation20_spill]] }
 0x839   : > { %s5223_s15 = sld [smem:[#allocation23_spill]]  ;;  %s5224_s13 = smov %s4385_s14 }
 0x83e   : > { %p24_p9 = scmp.ge.s32.totalorder %s5221_s16, 4   ;;  %s5225_s14 = smov %s5222_s27 }
 0x840   :  { %26 = sbr.rel (!%p24_p9) target bundleno = 9 (0x9), region = 120 }
 0x847   :  { %3137 = vsyncpa [#allocation3], 1 }
 0x848   :  { %3139 = vsyncpa [#allocation3 + $0x1], 1 }
 0x849   :  { %3140 = vsyncpa [#allocation6], 1 }
 0x84a   :  { %3141 = vsyncpa [#allocation9], 1 }
 0x84b   :  { %3142 = vsyncpa [#allocation12], 1 }
 0x84c   :  { %3143 = vsyncpa [#allocation4], 1 }
 0x84d   :  { %3145 = vsyncpa [#allocation4 + $0x1], 1 }

</bundles_post_ra>
